<compile_context>
chip_gen: v5e
topology: v5e:2x2
jax: 0.10.0
libtpu: 0.0.40
codegen_flags: <defaults>
</compile_context>

<pallas_src>
import functools

import numpy as np
import jax
import jax.numpy as jnp
from jax import lax
from jax.experimental import pallas as pl
from jax.experimental.pallas import tpu as pltpu

F32 = jnp.float32
VMEM_SPEC = pl.BlockSpec(memory_space=pltpu.MemorySpace.VMEM)


# ----------------------------------------------------------------------------
# Single fused Pallas kernel
# ----------------------------------------------------------------------------
def _fused_forward_kernel(*refs, B, S, H, K, BL, PAD, has_scratch,
                          block_has_ds, block_shift_rows):
    it = iter(refs)
    # ---- text branch refs ----
    x2d_ref = next(it)                       # (S*B, D) time-major flattened hidden states
    wih_f_ref = next(it); whh_f_ref = next(it); b_f_ref = next(it)
    wih_b_ref = next(it); whh_b_ref = next(it); b_b_ref = next(it)
    attn_wf_ref = next(it); attn_wb_ref = next(it); attn_b_ref = next(it)
    # ---- financial branch refs ----
    y0_ref = next(it)                        # (T*B, F) time-major
    blocks = []
    for has_ds in block_has_ds:
        blk = {'w1': next(it), 'b1': next(it), 'w2': next(it), 'b2': next(it)}
        if has_ds:
            blk['wds'] = next(it); blk['bds'] = next(it)
        blocks.append(blk)
    avg_ref = next(it)                       # (B, T*B) per-batch temporal-mean operator
    fcw_ref = next(it); fcb_ref = next(it)
    # ---- fusion head refs ----
    w1tf_ref = next(it); w1tb_ref = next(it); w1fin_ref = next(it); b1_ref = next(it)
    w2_ref = next(it); b2_ref = next(it)
    o_ref = next(it)                         # (B, 1) output
    zpad_ref = next(it) if has_scratch else None   # (PAD + BL, CMAX) scratch

    # =============================== text branch ============================
    x2d = x2d_ref[...]                       # (S*B, D)

    def run_direction(wih_ref, whh_ref, b_ref, reverse):
        # Input projection hoisted out of the recurrence: one matmul per direction.
        gx = jnp.dot(x2d, wih_ref[...], preferred_element_type=F32) + b_ref[...]  # (S*B, 4H)
        gxs = [gx[:, g * H:(g + 1) * H] for g in range(4)]    # sliced once (i, f, g, o)
        whh = [whh_ref[g] for g in range(4)]                  # per-gate (H, H), loaded once
        h = jnp.zeros((B, H), F32)
        c = jnp.zeros((B, H), F32)
        hs = [None] * S
        for step in range(S):                                 # fully unrolled recurrence
            t = (S - 1 - step) if reverse else step
            r0 = t * B
            pre = [gxs[g][r0:r0 + B, :]
                   + jnp.dot(h, whh[g], preferred_element_type=F32) for g in range(4)]
            i_g = 1.0 / (1.0 + jnp.exp(-pre[0]))
            f_g = 1.0 / (1.0 + jnp.exp(-pre[1]))
            g_g = jnp.tanh(pre[2])
            o_g = 1.0 / (1.0 + jnp.exp(-pre[3]))
            c = f_g * c + i_g * g_g
            h = o_g * jnp.tanh(c)
            hs[t] = h
        return hs

    hs_f = run_direction(wih_f_ref, whh_f_ref, b_f_ref, reverse=False)
    hs_b = run_direction(wih_b_ref, whh_b_ref, b_b_ref, reverse=True)

    # Attention over time: scores via matmuls, streamed softmax (no concat needed).
    wf = attn_wf_ref[...]                    # (H, 1)
    wb = attn_wb_ref[...]                    # (H, 1)
    ab = attn_b_ref[...]                     # (1, 1)
    sc = [jnp.dot(hs_f[s], wf, preferred_element_type=F32)
          + jnp.dot(hs_b[s], wb, preferred_element_type=F32) + ab
          for s in range(S)]                 # each (B, 1)
    m = sc[0]
    for s in range(1, S):
        m = jnp.maximum(m, sc[s])
    es = [jnp.exp(sc[s] - m) for s in range(S)]
    denom = es[0]
    for s in range(1, S):
        denom = denom + es[s]
    inv_denom = 1.0 / denom
    ctx_f = jnp.zeros((B, H), F32)
    ctx_b = jnp.zeros((B, H), F32)
    for s in range(S):
        a_s = es[s] * inv_denom
        ctx_f = ctx_f + a_s * hs_f[s]
        ctx_b = ctx_b + a_s * hs_b[s]

    # ============================= financial branch ==========================
    # Activations kept resident as time-major (T*B, C) values; causal tap shift
    # is a static row-slice of a zero-padded VMEM scratch (no dense shift
    # matmuls); per-batch temporal mean is one small MXU matmul.
    if zpad_ref is not None:
        zpad_ref[...] = jnp.zeros_like(zpad_ref)   # pad rows stay zero forever

    y = y0_ref[...]                          # (T*B, F)

    def causal_conv(z, taps_ref, b_ref, shift_rows):
        c_in = taps_ref.shape[1]
        acc = jnp.dot(z, taps_ref[K - 1], preferred_element_type=F32)   # shift-0 tap
        live = [r for r in shift_rows if r < BL]
        if zpad_ref is not None and live:
            zpad_ref[PAD:PAD + BL, :c_in] = z          # place below zero pad
            zfull = zpad_ref[...]                      # (PAD+BL, CMAX) one load
            for k in range(K - 1):
                rows = shift_rows[k]
                if rows >= BL:                          # tap fully out of range -> zeros
                    continue
                zs = zfull[PAD - rows:PAD - rows + BL, :c_in]
                acc = acc + jnp.dot(zs, taps_ref[k], preferred_element_type=F32)
        acc = acc + b_ref[...]
        return jnp.maximum(acc, 0.0)

    for has_ds, blk, shift_rows in zip(block_has_ds, blocks, block_shift_rows):
        out1 = causal_conv(y, blk['w1'], blk['b1'], shift_rows)
        out2 = causal_conv(out1, blk['w2'], blk['b2'], shift_rows)
        if has_ds:
            res = jnp.dot(y, blk['wds'][...], preferred_element_type=F32) + blk['bds'][...]
        else:
            res = y
        y = jnp.maximum(out2 + res, 0.0)     # residual add + relu fused

    means = jnp.dot(avg_ref[...], y, preferred_element_type=F32)      # (B, C_last)
    fin_feat = jnp.maximum(
        jnp.dot(means, fcw_ref[...], preferred_element_type=F32) + fcb_ref[...], 0.0)  # (B, 64)

    # ================================ fusion head ============================
    h1 = (jnp.dot(ctx_f, w1tf_ref[...], preferred_element_type=F32)
          + jnp.dot(ctx_b, w1tb_ref[...], preferred_element_type=F32)
          + jnp.dot(fin_feat, w1fin_ref[...], preferred_element_type=F32)
          + b1_ref[...])
    h1 = jnp.maximum(h1, 0.0)
    o_ref[...] = jnp.dot(h1, w2_ref[...], preferred_element_type=F32) + b2_ref[...]


# ----------------------------------------------------------------------------
# Build-time weight preparation + jitted forward wrapper
# ----------------------------------------------------------------------------
def build_fusion_forward(params, *, kernel_size, B, T, S):
    embed = params['embed']
    D = embed.shape[1]
    H = params['whh_f'].shape[1]
    K = kernel_size
    L = T
    BL = B * L

    def gate_stack(whh):                      # (4H, H) -> (4, H, H) pre-transposed per gate
        return jnp.stack([whh[g * H:(g + 1) * H, :].T for g in range(4)], axis=0)

    text_inputs = [
        params['wih_f'].T, gate_stack(params['whh_f']), params['b_f'],
        params['wih_b'].T, gate_stack(params['whh_b']), params['b_b'],
        params['attn_w'][:, :H].T, params['attn_w'][:, H:].T, params['attn_b'],
    ]

    fin_inputs = []
    block_has_ds = []
    block_shift_rows = []
    chans = [int(params['tcn'][0]['w1'].shape[1])]
    for blk in params['tcn']:
        d = int(blk['dilation'])
        has_ds = 'w_ds' in blk
        block_has_ds.append(has_ds)
        block_shift_rows.append(tuple((K - 1 - k) * d * B for k in range(K - 1)))
        chans.append(int(blk['w1'].shape[0]))
        fin_inputs.append(jnp.transpose(blk['w1'], (2, 1, 0)))   # (K, C_in, C_out)
        fin_inputs.append(blk['b1'].reshape(1, -1))
        fin_inputs.append(jnp.transpose(blk['w2'], (2, 1, 0)))
        fin_inputs.append(blk['b2'].reshape(1, -1))
        if has_ds:
            fin_inputs.append(blk['w_ds'][:, :, 0].T)            # (C_in, C_out)
            fin_inputs.append(blk['b_ds'].reshape(1, -1))

    # per-batch temporal mean over time-major (T*B, C) activations
    avg = np.zeros((B, BL), np.float32)
    for b in range(B):
        for t in range(L):
            avg[b, t * B + b] = 1.0 / L
    fin_inputs += [jnp.asarray(avg), params['fin_fc_w'].T, params['fin_fc_b'].reshape(1, -1)]

    head_inputs = [
        params['fc1_w'][:, :H].T, params['fc1_w'][:, H:2 * H].T,
        params['fc1_w'][:, 2 * H:].T, params['fc1_b'],
        params['fc2_w'].T, params['fc2_b'],
    ]

    live_rows = [r for rows in block_shift_rows for r in rows if r < BL]
    has_scratch = (K > 1) and bool(live_rows)
    PAD = 0
    scratch_shapes = []
    if has_scratch:
        PAD = max(8, -(-max(live_rows) // 8) * 8)    # round up to sublane multiple
        CMAX = max(chans)
        scratch_shapes = [pltpu.VMEM((PAD + BL, CMAX), F32)]

    kernel = functools.partial(
        _fused_forward_kernel, B=B, S=S, H=H, K=K, BL=BL, PAD=PAD,
        has_scratch=has_scratch, block_has_ds=tuple(block_has_ds),
        block_shift_rows=tuple(block_shift_rows))
    n_inputs = 2 + len(text_inputs) + len(fin_inputs) + len(head_inputs)
    fused_call = pl.pallas_call(
        kernel,
        out_shape=jax.ShapeDtypeStruct((B, 1), F32),
        in_specs=[VMEM_SPEC] * n_inputs,
        out_specs=VMEM_SPEC,
        scratch_shapes=scratch_shapes,
    )

    @jax.jit
    def forward(fin_data, fin_lengths, input_ids, attention_mask):
        del fin_lengths, attention_mask                      # unused by reference forward too
        # TODO(synk): frozen pretrained BERT has no Pallas equivalent; its
        # last_hidden_state is stood in by a deterministic embedding lookup.
        last_hidden = embed[input_ids]                       # (B, S, D)
        x2d = jnp.transpose(last_hidden, (1, 0, 2)).reshape(S * B, D)
        y0 = jnp.transpose(fin_data, (1, 0, 2)).reshape(T * B, -1)   # time-major (T*B, F)
        out = fused_call(x2d, *text_inputs, y0, *fin_inputs, *head_inputs)
        return out[:, 0]

    return forward


# ----------------------------------------------------------------------------
# Deterministic parameter init (shapes match the PyTorch module __init__)
# ----------------------------------------------------------------------------
def init_params(key, *, fin_input_dim, tcn_channels, kernel_size, bert_hidden,
                lstm_hidden, fc_hidden, vocab_size):
    keys = iter(jax.random.split(key, 64))

    def nrm(shape, scale=0.1):
        return (scale * jax.random.normal(next(keys), shape)).astype(F32)

    H = lstm_hidden
    p = {
        'embed': nrm((vocab_size, bert_hidden), 0.5),
        # nn.LSTM (bidirectional, 1 layer); biases stored combined (b_ih + b_hh)
        'wih_f': nrm((4 * H, bert_hidden)), 'whh_f': nrm((4 * H, H)), 'b_f': nrm((1, 4 * H)),
        'wih_b': nrm((4 * H, bert_hidden)), 'whh_b': nrm((4 * H, H)), 'b_b': nrm((1, 4 * H)),
        # Attention: nn.Linear(2H, 1)
        'attn_w': nrm((1, 2 * H)), 'attn_b': nrm((1, 1)),
        # FinancialBranch fc: nn.Linear(tcn_channels[-1], 64)
        'fin_fc_w': nrm((64, tcn_channels[-1])), 'fin_fc_b': nrm((64,)),
        # Fusion head
        'fc1_w': nrm((fc_hidden, 2 * H + 64)), 'fc1_b': nrm((1, fc_hidden)),
        'fc2_w': nrm((1, fc_hidden)), 'fc2_b': nrm((1, 1)),
    }
    blocks = []
    in_ch = fin_input_dim
    for i, out_ch in enumerate(tcn_channels):
        blk = {
            'w1': nrm((out_ch, in_ch, kernel_size)), 'b1': nrm((out_ch,)),
            'w2': nrm((out_ch, out_ch, kernel_size)), 'b2': nrm((out_ch,)),
            'dilation': 2 ** i,
        }
        if in_ch != out_ch:
            blk['w_ds'] = nrm((out_ch, in_ch, 1))
            blk['b_ds'] = nrm((out_ch,))
        blocks.append(blk)
        in_ch = out_ch
    p['tcn'] = blocks
    return p


# ----------------------------------------------------------------------------
# Pure-JAX reference (for a correctness check)
# ----------------------------------------------------------------------------
def _sigmoid(x):
    return 1.0 / (1.0 + jnp.exp(-x))


def _conv1d_ref(x, w, b, dilation, padding, apply_relu):
    B, C_in, L = x.shape
    C_out, _, K = w.shape
    xp = jnp.pad(x, ((0, 0), (0, 0), (padding, padding)))
    L_out = L + 2 * padding - dilation * (K - 1)
    acc = jnp.zeros((B, C_out, L_out), F32)
    for k in range(K):
        acc = acc + jnp.einsum('oc,bcl->bol', w[:, :, k],
                               xp[:, :, k * dilation:k * dilation + L_out])
    acc = acc + b[None, :, None]
    return jnp.maximum(acc, 0.0) if apply_relu else acc


def _lstm_dir_ref(x_tm, wih, whh, b, H):
    B = x_tm.shape[1]

    def step(carry, x_t):
        h, c = carry
        gates = x_t @ wih.T + h @ whh.T + b
        i = _sigmoid(gates[:, :H])
        f = _sigmoid(gates[:, H:2 * H])
        g = jnp.tanh(gates[:, 2 * H:3 * H])
        o = _sigmoid(gates[:, 3 * H:])
        c = f * c + i * g
        h = o * jnp.tanh(c)
        return (h, c), h

    _, outs = lax.scan(step, (jnp.zeros((B, H), F32), jnp.zeros((B, H), F32)), x_tm)
    return outs


def fusion_model_ref(params, fin_data, fin_lengths, input_ids, attention_mask,
                     *, kernel_size):
    last_hidden = params['embed'][input_ids]
    x_tm = jnp.transpose(last_hidden, (1, 0, 2))
    H = params['whh_f'].shape[1]
    out_f = _lstm_dir_ref(x_tm, params['wih_f'], params['whh_f'], params['b_f'], H)
    out_b = _lstm_dir_ref(x_tm[::-1], params['wih_b'], params['whh_b'], params['b_b'], H)[::-1]
    lstm_out = jnp.concatenate([jnp.transpose(out_f, (1, 0, 2)),
                                jnp.transpose(out_b, (1, 0, 2))], axis=-1)
    scores = jnp.einsum('bsh,h->bs', lstm_out, params['attn_w'][0]) + params['attn_b'][0, 0]
    aw = jax.nn.softmax(scores, axis=1)[..., None]
    text_feat = jnp.sum(aw * lstm_out, axis=1)

    y = jnp.transpose(fin_data, (0, 2, 1))
    for blk in params['tcn']:
        d = blk['dilation']
        p_pad = (kernel_size - 1) * d
        out1 = _conv1d_ref(y, blk['w1'], blk['b1'], d, p_pad, True)
        out2 = _conv1d_ref(out1, blk['w2'], blk['b2'], d, p_pad, True)
        res = (_conv1d_ref(y, blk['w_ds'], blk['b_ds'], 1, 0, False)
               if 'w_ds' in blk else y)
        min_len = min(out2.shape[2], res.shape[2])
        y = jnp.maximum(out2[:, :, :min_len] + res[:, :, :min_len], 0.0)
    m = jnp.mean(y, axis=2)
    fin_feat = jnp.maximum(m @ params['fin_fc_w'].T + params['fin_fc_b'], 0.0)

    fused = jnp.concatenate([text_feat, fin_feat], axis=1)
    h = jnp.maximum(fused @ params['fc1_w'].T + params['fc1_b'][0], 0.0)
    out = h @ params['fc2_w'].T + params['fc2_b'][0]
    return out[:, 0]


# ----------------------------------------------------------------------------
if __name__ == "__main__":
    B = 2
    T_fin, fin_input_dim = 16, 4
    tcn_channels = (8, 8)
    kernel_size = 2
    S_text, bert_hidden = 8, 32
    lstm_hidden, fc_hidden = 16, 32
    vocab_size = 100

    key = jax.random.PRNGKey(0)
    kp, kd, ki = jax.random.split(key, 3)
    params = init_params(kp, fin_input_dim=fin_input_dim, tcn_channels=tcn_channels,
                         kernel_size=kernel_size, bert_hidden=bert_hidden,
                         lstm_hidden=lstm_hidden, fc_hidden=fc_hidden,
                         vocab_size=vocab_size)

    fin_data = jax.random.normal(kd, (B, T_fin, fin_input_dim), dtype=F32)
    fin_lengths = jnp.full((B,), T_fin, dtype=jnp.int32)
    input_ids = jax.random.randint(ki, (B, S_text), 0, vocab_size)
    attention_mask = jnp.ones((B, S_text), dtype=jnp.int32)

    forward = build_fusion_forward(params, kernel_size=kernel_size,
                                   B=B, T=T_fin, S=S_text)
    out = forward(fin_data, fin_lengths, input_ids, attention_mask)
    out = jax.block_until_ready(out)

    ref = fusion_model_ref(params, fin_data, fin_lengths, input_ids,
                           attention_mask, kernel_size=kernel_size)
    np.testing.assert_allclose(np.asarray(out), np.asarray(ref),
                               rtol=1e-3, atol=1e-3)
    print("KERNEL_OK")
</pallas_src>

<mosaic_0001>
module attributes {stable_mosaic.version = 11 : i64} {
  func.func @_fused_forward_kernel(%arg0: memref<16x32xf32, #tpu.memory_space<vmem>>, %arg1: memref<32x64xf32, #tpu.memory_space<vmem>>, %arg2: memref<4x16x16xf32, #tpu.memory_space<vmem>>, %arg3: memref<1x64xf32, #tpu.memory_space<vmem>>, %arg4: memref<32x64xf32, #tpu.memory_space<vmem>>, %arg5: memref<4x16x16xf32, #tpu.memory_space<vmem>>, %arg6: memref<1x64xf32, #tpu.memory_space<vmem>>, %arg7: memref<16x1xf32, #tpu.memory_space<vmem>>, %arg8: memref<16x1xf32, #tpu.memory_space<vmem>>, %arg9: memref<1x1xf32, #tpu.memory_space<vmem>>, %arg10: memref<32x4xf32, #tpu.memory_space<vmem>>, %arg11: memref<2x4x8xf32, #tpu.memory_space<vmem>>, %arg12: memref<1x8xf32, #tpu.memory_space<vmem>>, %arg13: memref<2x8x8xf32, #tpu.memory_space<vmem>>, %arg14: memref<1x8xf32, #tpu.memory_space<vmem>>, %arg15: memref<4x8xf32, #tpu.memory_space<vmem>>, %arg16: memref<1x8xf32, #tpu.memory_space<vmem>>, %arg17: memref<2x8x8xf32, #tpu.memory_space<vmem>>, %arg18: memref<1x8xf32, #tpu.memory_space<vmem>>, %arg19: memref<2x8x8xf32, #tpu.memory_space<vmem>>, %arg20: memref<1x8xf32, #tpu.memory_space<vmem>>, %arg21: memref<2x32xf32, #tpu.memory_space<vmem>>, %arg22: memref<8x64xf32, #tpu.memory_space<vmem>>, %arg23: memref<1x64xf32, #tpu.memory_space<vmem>>, %arg24: memref<16x32xf32, #tpu.memory_space<vmem>>, %arg25: memref<16x32xf32, #tpu.memory_space<vmem>>, %arg26: memref<64x32xf32, #tpu.memory_space<vmem>>, %arg27: memref<1x32xf32, #tpu.memory_space<vmem>>, %arg28: memref<32x1xf32, #tpu.memory_space<vmem>>, %arg29: memref<1x1xf32, #tpu.memory_space<vmem>>, %arg30: memref<2x1xf32, #tpu.memory_space<vmem>>, %arg31: memref<40x8xf32, #tpu.memory_space<vmem>>) attributes {dimension_semantics = [], scalar_prefetch = 0 : i64, scratch_operands = 1 : i64, tpu.core_type = #tpu.core_type<tc>} {
    %c0 = arith.constant 0 : index
    %c0_0 = arith.constant 0 : index
    %0 = vector.load %arg0[%c0, %c0_0] : memref<16x32xf32, #tpu.memory_space<vmem>>, vector<16x32xf32>
    %c0_1 = arith.constant 0 : index
    %c0_2 = arith.constant 0 : index
    %1 = vector.load %arg1[%c0_1, %c0_2] : memref<32x64xf32, #tpu.memory_space<vmem>>, vector<32x64xf32>
    %cst = arith.constant dense<0.000000e+00> : vector<16x64xf32>
    %2 = tpu.matmul %0, %1, %cst {dimension_numbers = #tpu.dot_dimension_numbers<[1], [0], [0], [1], [0, 0, 1, 1], [], []>} : vector<16x32xf32>, vector<32x64xf32>, vector<16x64xf32> -> vector<16x64xf32>
    %c0_3 = arith.constant 0 : index
    %c0_4 = arith.constant 0 : index
    %3 = vector.load %arg3[%c0_3, %c0_4] : memref<1x64xf32, #tpu.memory_space<vmem>>, vector<1x64xf32>
    %4 = vector.broadcast %3 : vector<1x64xf32> to vector<16x64xf32>
    %5 = arith.addf %2, %4 : vector<16x64xf32>
    %6 = vector.extract_strided_slice %5 {offsets = [0, 0], sizes = [16, 16], strides = [1, 1]} : vector<16x64xf32> to vector<16x16xf32>
    %7 = vector.extract_strided_slice %5 {offsets = [0, 16], sizes = [16, 16], strides = [1, 1]} : vector<16x64xf32> to vector<16x16xf32>
    %8 = vector.extract_strided_slice %5 {offsets = [0, 32], sizes = [16, 16], strides = [1, 1]} : vector<16x64xf32> to vector<16x16xf32>
    %9 = vector.extract_strided_slice %5 {offsets = [0, 48], sizes = [16, 16], strides = [1, 1]} : vector<16x64xf32> to vector<16x16xf32>
    %c0_5 = arith.constant 0 : index
    %c0_6 = arith.constant 0 : index
    %c0_7 = arith.constant 0 : index
    %10 = vector.load %arg2[%c0_5, %c0_6, %c0_7] : memref<4x16x16xf32, #tpu.memory_space<vmem>>, vector<1x16x16xf32>
    %11 = vector.shape_cast %10 : vector<1x16x16xf32> to vector<16x16xf32>
    %c1 = arith.constant 1 : index
    %c0_8 = arith.constant 0 : index
    %c0_9 = arith.constant 0 : index
    %12 = vector.load %arg2[%c1, %c0_8, %c0_9] : memref<4x16x16xf32, #tpu.memory_space<vmem>>, vector<1x16x16xf32>
    %13 = vector.shape_cast %12 : vector<1x16x16xf32> to vector<16x16xf32>
    %c2 = arith.constant 2 : index
    %c0_10 = arith.constant 0 : index
    %c0_11 = arith.constant 0 : index
    %14 = vector.load %arg2[%c2, %c0_10, %c0_11] : memref<4x16x16xf32, #tpu.memory_space<vmem>>, vector<1x16x16xf32>
    %15 = vector.shape_cast %14 : vector<1x16x16xf32> to vector<16x16xf32>
    %c3 = arith.constant 3 : index
    %c0_12 = arith.constant 0 : index
    %c0_13 = arith.constant 0 : index
    %16 = vector.load %arg2[%c3, %c0_12, %c0_13] : memref<4x16x16xf32, #tpu.memory_space<vmem>>, vector<1x16x16xf32>
    %17 = vector.shape_cast %16 : vector<1x16x16xf32> to vector<16x16xf32>
    %cst_14 = arith.constant 0.000000e+00 : f32
    %18 = vector.broadcast %cst_14 : f32 to vector<2x16xf32>
    %cst_15 = arith.constant 0.000000e+00 : f32
    %19 = vector.broadcast %cst_15 : f32 to vector<2x16xf32>
    %20 = vector.extract_strided_slice %6 {offsets = [0, 0], sizes = [2, 16], strides = [1, 1]} : vector<16x16xf32> to vector<2x16xf32>
    %cst_16 = arith.constant dense<0.000000e+00> : vector<2x16xf32>
    %21 = tpu.matmul %18, %11, %cst_16 {dimension_numbers = #tpu.dot_dimension_numbers<[1], [0], [0], [1], [0, 0, 1, 1], [], []>} : vector<2x16xf32>, vector<16x16xf32>, vector<2x16xf32> -> vector<2x16xf32>
    %22 = arith.addf %20, %21 : vector<2x16xf32>
    %23 = vector.extract_strided_slice %7 {offsets = [0, 0], sizes = [2, 16], strides = [1, 1]} : vector<16x16xf32> to vector<2x16xf32>
    %cst_17 = arith.constant dense<0.000000e+00> : vector<2x16xf32>
    %24 = tpu.matmul %18, %13, %cst_17 {dimension_numbers = #tpu.dot_dimension_numbers<[1], [0], [0], [1], [0, 0, 1, 1], [], []>} : vector<2x16xf32>, vector<16x16xf32>, vector<2x16xf32> -> vector<2x16xf32>
    %25 = arith.addf %23, %24 : vector<2x16xf32>
    %26 = vector.extract_strided_slice %8 {offsets = [0, 0], sizes = [2, 16], strides = [1, 1]} : vector<16x16xf32> to vector<2x16xf32>
    %cst_18 = arith.constant dense<0.000000e+00> : vector<2x16xf32>
    %27 = tpu.matmul %18, %15, %cst_18 {dimension_numbers = #tpu.dot_dimension_numbers<[1], [0], [0], [1], [0, 0, 1, 1], [], []>} : vector<2x16xf32>, vector<16x16xf32>, vector<2x16xf32> -> vector<2x16xf32>
    %28 = arith.addf %26, %27 : vector<2x16xf32>
    %29 = vector.extract_strided_slice %9 {offsets = [0, 0], sizes = [2, 16], strides = [1, 1]} : vector<16x16xf32> to vector<2x16xf32>
    %cst_19 = arith.constant dense<0.000000e+00> : vector<2x16xf32>
    %30 = tpu.matmul %18, %17, %cst_19 {dimension_numbers = #tpu.dot_dimension_numbers<[1], [0], [0], [1], [0, 0, 1, 1], [], []>} : vector<2x16xf32>, vector<16x16xf32>, vector<2x16xf32> -> vector<2x16xf32>
    %31 = arith.addf %29, %30 : vector<2x16xf32>
    %cst_20 = arith.constant 0.000000e+00 : f32
    %32 = vector.broadcast %cst_20 : f32 to vector<2x16xf32>
    %33 = arith.subf %32, %22 : vector<2x16xf32>
    %34 = math.exp %33 : vector<2x16xf32>
    %cst_21 = arith.constant 1.000000e+00 : f32
    %35 = vector.broadcast %cst_21 : f32 to vector<2x16xf32>
    %36 = arith.addf %35, %34 : vector<2x16xf32>
    %cst_22 = arith.constant 1.000000e+00 : f32
    %37 = vector.broadcast %cst_22 : f32 to vector<2x16xf32>
    %38 = arith.divf %37, %36 : vector<2x16xf32>
    %cst_23 = arith.constant 0.000000e+00 : f32
    %39 = vector.broadcast %cst_23 : f32 to vector<2x16xf32>
    %40 = arith.subf %39, %25 : vector<2x16xf32>
    %41 = math.exp %40 : vector<2x16xf32>
    %cst_24 = arith.constant 1.000000e+00 : f32
    %42 = vector.broadcast %cst_24 : f32 to vector<2x16xf32>
    %43 = arith.addf %42, %41 : vector<2x16xf32>
    %cst_25 = arith.constant 1.000000e+00 : f32
    %44 = vector.broadcast %cst_25 : f32 to vector<2x16xf32>
    %45 = arith.divf %44, %43 : vector<2x16xf32>
    %46 = math.tanh %28 : vector<2x16xf32>
    %cst_26 = arith.constant 0.000000e+00 : f32
    %47 = vector.broadcast %cst_26 : f32 to vector<2x16xf32>
    %48 = arith.subf %47, %31 : vector<2x16xf32>
    %49 = math.exp %48 : vector<2x16xf32>
    %cst_27 = arith.constant 1.000000e+00 : f32
    %50 = vector.broadcast %cst_27 : f32 to vector<2x16xf32>
    %51 = arith.addf %50, %49 : vector<2x16xf32>
    %cst_28 = arith.constant 1.000000e+00 : f32
    %52 = vector.broadcast %cst_28 : f32 to vector<2x16xf32>
    %53 = arith.divf %52, %51 : vector<2x16xf32>
    %54 = arith.mulf %45, %19 : vector<2x16xf32>
    %55 = arith.mulf %38, %46 : vector<2x16xf32>
    %56 = arith.addf %54, %55 : vector<2x16xf32>
    %57 = math.tanh %56 : vector<2x16xf32>
    %58 = arith.mulf %53, %57 : vector<2x16xf32>
    %59 = vector.extract_strided_slice %6 {offsets = [2, 0], sizes = [2, 16], strides = [1, 1]} : vector<16x16xf32> to vector<2x16xf32>
    %cst_29 = arith.constant dense<0.000000e+00> : vector<2x16xf32>
    %60 = tpu.matmul %58, %11, %cst_29 {dimension_numbers = #tpu.dot_dimension_numbers<[1], [0], [0], [1], [0, 0, 1, 1], [], []>} : vector<2x16xf32>, vector<16x16xf32>, vector<2x16xf32> -> vector<2x16xf32>
    %61 = arith.addf %59, %60 : vector<2x16xf32>
    %62 = vector.extract_strided_slice %7 {offsets = [2, 0], sizes = [2, 16], strides = [1, 1]} : vector<16x16xf32> to vector<2x16xf32>
    %cst_30 = arith.constant dense<0.000000e+00> : vector<2x16xf32>
    %63 = tpu.matmul %58, %13, %cst_30 {dimension_numbers = #tpu.dot_dimension_numbers<[1], [0], [0], [1], [0, 0, 1, 1], [], []>} : vector<2x16xf32>, vector<16x16xf32>, vector<2x16xf32> -> vector<2x16xf32>
    %64 = arith.addf %62, %63 : vector<2x16xf32>
    %65 = vector.extract_strided_slice %8 {offsets = [2, 0], sizes = [2, 16], strides = [1, 1]} : vector<16x16xf32> to vector<2x16xf32>
    %cst_31 = arith.constant dense<0.000000e+00> : vector<2x16xf32>
    %66 = tpu.matmul %58, %15, %cst_31 {dimension_numbers = #tpu.dot_dimension_numbers<[1], [0], [0], [1], [0, 0, 1, 1], [], []>} : vector<2x16xf32>, vector<16x16xf32>, vector<2x16xf32> -> vector<2x16xf32>
    %67 = arith.addf %65, %66 : vector<2x16xf32>
    %68 = vector.extract_strided_slice %9 {offsets = [2, 0], sizes = [2, 16], strides = [1, 1]} : vector<16x16xf32> to vector<2x16xf32>
    %cst_32 = arith.constant dense<0.000000e+00> : vector<2x16xf32>
    %69 = tpu.matmul %58, %17, %cst_32 {dimension_numbers = #tpu.dot_dimension_numbers<[1], [0], [0], [1], [0, 0, 1, 1], [], []>} : vector<2x16xf32>, vector<16x16xf32>, vector<2x16xf32> -> vector<2x16xf32>
    %70 = arith.addf %68, %69 : vector<2x16xf32>
    %cst_33 = arith.constant 0.000000e+00 : f32
    %71 = vector.broadcast %cst_33 : f32 to vector<2x16xf32>
    %72 = arith.subf %71, %61 : vector<2x16xf32>
    %73 = math.exp %72 : vector<2x16xf32>
    %cst_34 = arith.constant 1.000000e+00 : f32
    %74 = vector.broadcast %cst_34 : f32 to vector<2x16xf32>
    %75 = arith.addf %74, %73 : vector<2x16xf32>
    %cst_35 = arith.constant 1.000000e+00 : f32
    %76 = vector.broadcast %cst_35 : f32 to vector<2x16xf32>
    %77 = arith.divf %76, %75 : vector<2x16xf32>
    %cst_36 = arith.constant 0.000000e+00 : f32
    %78 = vector.broadcast %cst_36 : f32 to vector<2x16xf32>
    %79 = arith.subf %78, %64 : vector<2x16xf32>
    %80 = math.exp %79 : vector<2x16xf32>
    %cst_37 = arith.constant 1.000000e+00 : f32
    %81 = vector.broadcast %cst_37 : f32 to vector<2x16xf32>
    %82 = arith.addf %81, %80 : vector<2x16xf32>
    %cst_38 = arith.constant 1.000000e+00 : f32
    %83 = vector.broadcast %cst_38 : f32 to vector<2x16xf32>
    %84 = arith.divf %83, %82 : vector<2x16xf32>
    %85 = math.tanh %67 : vector<2x16xf32>
    %cst_39 = arith.constant 0.000000e+00 : f32
    %86 = vector.broadcast %cst_39 : f32 to vector<2x16xf32>
    %87 = arith.subf %86, %70 : vector<2x16xf32>
    %88 = math.exp %87 : vector<2x16xf32>
    %cst_40 = arith.constant 1.000000e+00 : f32
    %89 = vector.broadcast %cst_40 : f32 to vector<2x16xf32>
    %90 = arith.addf %89, %88 : vector<2x16xf32>
    %cst_41 = arith.constant 1.000000e+00 : f32
    %91 = vector.broadcast %cst_41 : f32 to vector<2x16xf32>
    %92 = arith.divf %91, %90 : vector<2x16xf32>
    %93 = arith.mulf %84, %56 : vector<2x16xf32>
    %94 = arith.mulf %77, %85 : vector<2x16xf32>
    %95 = arith.addf %93, %94 : vector<2x16xf32>
    %96 = math.tanh %95 : vector<2x16xf32>
    %97 = arith.mulf %92, %96 : vector<2x16xf32>
    %98 = vector.extract_strided_slice %6 {offsets = [4, 0], sizes = [2, 16], strides = [1, 1]} : vector<16x16xf32> to vector<2x16xf32>
    %cst_42 = arith.constant dense<0.000000e+00> : vector<2x16xf32>
    %99 = tpu.matmul %97, %11, %cst_42 {dimension_numbers = #tpu.dot_dimension_numbers<[1], [0], [0], [1], [0, 0, 1, 1], [], []>} : vector<2x16xf32>, vector<16x16xf32>, vector<2x16xf32> -> vector<2x16xf32>
    %100 = arith.addf %98, %99 : vector<2x16xf32>
    %101 = vector.extract_strided_slice %7 {offsets = [4, 0], sizes = [2, 16], strides = [1, 1]} : vector<16x16xf32> to vector<2x16xf32>
    %cst_43 = arith.constant dense<0.000000e+00> : vector<2x16xf32>
    %102 = tpu.matmul %97, %13, %cst_43 {dimension_numbers = #tpu.dot_dimension_numbers<[1], [0], [0], [1], [0, 0, 1, 1], [], []>} : vector<2x16xf32>, vector<16x16xf32>, vector<2x16xf32> -> vector<2x16xf32>
    %103 = arith.addf %101, %102 : vector<2x16xf32>
    %104 = vector.extract_strided_slice %8 {offsets = [4, 0], sizes = [2, 16], strides = [1, 1]} : vector<16x16xf32> to vector<2x16xf32>
    %cst_44 = arith.constant dense<0.000000e+00> : vector<2x16xf32>
    %105 = tpu.matmul %97, %15, %cst_44 {dimension_numbers = #tpu.dot_dimension_numbers<[1], [0], [0], [1], [0, 0, 1, 1], [], []>} : vector<2x16xf32>, vector<16x16xf32>, vector<2x16xf32> -> vector<2x16xf32>
    %106 = arith.addf %104, %105 : vector<2x16xf32>
    %107 = vector.extract_strided_slice %9 {offsets = [4, 0], sizes = [2, 16], strides = [1, 1]} : vector<16x16xf32> to vector<2x16xf32>
    %cst_45 = arith.constant dense<0.000000e+00> : vector<2x16xf32>
    %108 = tpu.matmul %97, %17, %cst_45 {dimension_numbers = #tpu.dot_dimension_numbers<[1], [0], [0], [1], [0, 0, 1, 1], [], []>} : vector<2x16xf32>, vector<16x16xf32>, vector<2x16xf32> -> vector<2x16xf32>
    %109 = arith.addf %107, %108 : vector<2x16xf32>
    %cst_46 = arith.constant 0.000000e+00 : f32
    %110 = vector.broadcast %cst_46 : f32 to vector<2x16xf32>
    %111 = arith.subf %110, %100 : vector<2x16xf32>
    %112 = math.exp %111 : vector<2x16xf32>
    %cst_47 = arith.constant 1.000000e+00 : f32
    %113 = vector.broadcast %cst_47 : f32 to vector<2x16xf32>
    %114 = arith.addf %113, %112 : vector<2x16xf32>
    %cst_48 = arith.constant 1.000000e+00 : f32
    %115 = vector.broadcast %cst_48 : f32 to vector<2x16xf32>
    %116 = arith.divf %115, %114 : vector<2x16xf32>
    %cst_49 = arith.constant 0.000000e+00 : f32
    %117 = vector.broadcast %cst_49 : f32 to vector<2x16xf32>
    %118 = arith.subf %117, %103 : vector<2x16xf32>
    %119 = math.exp %118 : vector<2x16xf32>
    %cst_50 = arith.constant 1.000000e+00 : f32
    %120 = vector.broadcast %cst_50 : f32 to vector<2x16xf32>
    %121 = arith.addf %120, %119 : vector<2x16xf32>
    %cst_51 = arith.constant 1.000000e+00 : f32
    %122 = vector.broadcast %cst_51 : f32 to vector<2x16xf32>
    %123 = arith.divf %122, %121 : vector<2x16xf32>
    %124 = math.tanh %106 : vector<2x16xf32>
    %cst_52 = arith.constant 0.000000e+00 : f32
    %125 = vector.broadcast %cst_52 : f32 to vector<2x16xf32>
    %126 = arith.subf %125, %109 : vector<2x16xf32>
    %127 = math.exp %126 : vector<2x16xf32>
    %cst_53 = arith.constant 1.000000e+00 : f32
    %128 = vector.broadcast %cst_53 : f32 to vector<2x16xf32>
    %129 = arith.addf %128, %127 : vector<2x16xf32>
    %cst_54 = arith.constant 1.000000e+00 : f32
    %130 = vector.broadcast %cst_54 : f32 to vector<2x16xf32>
    %131 = arith.divf %130, %129 : vector<2x16xf32>
    %132 = arith.mulf %123, %95 : vector<2x16xf32>
    %133 = arith.mulf %116, %124 : vector<2x16xf32>
    %134 = arith.addf %132, %133 : vector<2x16xf32>
    %135 = math.tanh %134 : vector<2x16xf32>
    %136 = arith.mulf %131, %135 : vector<2x16xf32>
    %137 = vector.extract_strided_slice %6 {offsets = [6, 0], sizes = [2, 16], strides = [1, 1]} : vector<16x16xf32> to vector<2x16xf32>
    %cst_55 = arith.constant dense<0.000000e+00> : vector<2x16xf32>
    %138 = tpu.matmul %136, %11, %cst_55 {dimension_numbers = #tpu.dot_dimension_numbers<[1], [0], [0], [1], [0, 0, 1, 1], [], []>} : vector<2x16xf32>, vector<16x16xf32>, vector<2x16xf32> -> vector<2x16xf32>
    %139 = arith.addf %137, %138 : vector<2x16xf32>
    %140 = vector.extract_strided_slice %7 {offsets = [6, 0], sizes = [2, 16], strides = [1, 1]} : vector<16x16xf32> to vector<2x16xf32>
    %cst_56 = arith.constant dense<0.000000e+00> : vector<2x16xf32>
    %141 = tpu.matmul %136, %13, %cst_56 {dimension_numbers = #tpu.dot_dimension_numbers<[1], [0], [0], [1], [0, 0, 1, 1], [], []>} : vector<2x16xf32>, vector<16x16xf32>, vector<2x16xf32> -> vector<2x16xf32>
    %142 = arith.addf %140, %141 : vector<2x16xf32>
    %143 = vector.extract_strided_slice %8 {offsets = [6, 0], sizes = [2, 16], strides = [1, 1]} : vector<16x16xf32> to vector<2x16xf32>
    %cst_57 = arith.constant dense<0.000000e+00> : vector<2x16xf32>
    %144 = tpu.matmul %136, %15, %cst_57 {dimension_numbers = #tpu.dot_dimension_numbers<[1], [0], [0], [1], [0, 0, 1, 1], [], []>} : vector<2x16xf32>, vector<16x16xf32>, vector<2x16xf32> -> vector<2x16xf32>
    %145 = arith.addf %143, %144 : vector<2x16xf32>
    %146 = vector.extract_strided_slice %9 {offsets = [6, 0], sizes = [2, 16], strides = [1, 1]} : vector<16x16xf32> to vector<2x16xf32>
    %cst_58 = arith.constant dense<0.000000e+00> : vector<2x16xf32>
    %147 = tpu.matmul %136, %17, %cst_58 {dimension_numbers = #tpu.dot_dimension_numbers<[1], [0], [0], [1], [0, 0, 1, 1], [], []>} : vector<2x16xf32>, vector<16x16xf32>, vector<2x16xf32> -> vector<2x16xf32>
    %148 = arith.addf %146, %147 : vector<2x16xf32>
    %cst_59 = arith.constant 0.000000e+00 : f32
    %149 = vector.broadcast %cst_59 : f32 to vector<2x16xf32>
    %150 = arith.subf %149, %139 : vector<2x16xf32>
    %151 = math.exp %150 : vector<2x16xf32>
    %cst_60 = arith.constant 1.000000e+00 : f32
    %152 = vector.broadcast %cst_60 : f32 to vector<2x16xf32>
    %153 = arith.addf %152, %151 : vector<2x16xf32>
    %cst_61 = arith.constant 1.000000e+00 : f32
    %154 = vector.broadcast %cst_61 : f32 to vector<2x16xf32>
    %155 = arith.divf %154, %153 : vector<2x16xf32>
    %cst_62 = arith.constant 0.000000e+00 : f32
    %156 = vector.broadcast %cst_62 : f32 to vector<2x16xf32>
    %157 = arith.subf %156, %142 : vector<2x16xf32>
    %158 = math.exp %157 : vector<2x16xf32>
    %cst_63 = arith.constant 1.000000e+00 : f32
    %159 = vector.broadcast %cst_63 : f32 to vector<2x16xf32>
    %160 = arith.addf %159, %158 : vector<2x16xf32>
    %cst_64 = arith.constant 1.000000e+00 : f32
    %161 = vector.broadcast %cst_64 : f32 to vector<2x16xf32>
    %162 = arith.divf %161, %160 : vector<2x16xf32>
    %163 = math.tanh %145 : vector<2x16xf32>
    %cst_65 = arith.constant 0.000000e+00 : f32
    %164 = vector.broadcast %cst_65 : f32 to vector<2x16xf32>
    %165 = arith.subf %164, %148 : vector<2x16xf32>
    %166 = math.exp %165 : vector<2x16xf32>
    %cst_66 = arith.constant 1.000000e+00 : f32
    %167 = vector.broadcast %cst_66 : f32 to vector<2x16xf32>
    %168 = arith.addf %167, %166 : vector<2x16xf32>
    %cst_67 = arith.constant 1.000000e+00 : f32
    %169 = vector.broadcast %cst_67 : f32 to vector<2x16xf32>
    %170 = arith.divf %169, %168 : vector<2x16xf32>
    %171 = arith.mulf %162, %134 : vector<2x16xf32>
    %172 = arith.mulf %155, %163 : vector<2x16xf32>
    %173 = arith.addf %171, %172 : vector<2x16xf32>
    %174 = math.tanh %173 : vector<2x16xf32>
    %175 = arith.mulf %170, %174 : vector<2x16xf32>
    %176 = vector.extract_strided_slice %6 {offsets = [8, 0], sizes = [2, 16], strides = [1, 1]} : vector<16x16xf32> to vector<2x16xf32>
    %cst_68 = arith.constant dense<0.000000e+00> : vector<2x16xf32>
    %177 = tpu.matmul %175, %11, %cst_68 {dimension_numbers = #tpu.dot_dimension_numbers<[1], [0], [0], [1], [0, 0, 1, 1], [], []>} : vector<2x16xf32>, vector<16x16xf32>, vector<2x16xf32> -> vector<2x16xf32>
    %178 = arith.addf %176, %177 : vector<2x16xf32>
    %179 = vector.extract_strided_slice %7 {offsets = [8, 0], sizes = [2, 16], strides = [1, 1]} : vector<16x16xf32> to vector<2x16xf32>
    %cst_69 = arith.constant dense<0.000000e+00> : vector<2x16xf32>
    %180 = tpu.matmul %175, %13, %cst_69 {dimension_numbers = #tpu.dot_dimension_numbers<[1], [0], [0], [1], [0, 0, 1, 1], [], []>} : vector<2x16xf32>, vector<16x16xf32>, vector<2x16xf32> -> vector<2x16xf32>
    %181 = arith.addf %179, %180 : vector<2x16xf32>
    %182 = vector.extract_strided_slice %8 {offsets = [8, 0], sizes = [2, 16], strides = [1, 1]} : vector<16x16xf32> to vector<2x16xf32>
    %cst_70 = arith.constant dense<0.000000e+00> : vector<2x16xf32>
    %183 = tpu.matmul %175, %15, %cst_70 {dimension_numbers = #tpu.dot_dimension_numbers<[1], [0], [0], [1], [0, 0, 1, 1], [], []>} : vector<2x16xf32>, vector<16x16xf32>, vector<2x16xf32> -> vector<2x16xf32>
    %184 = arith.addf %182, %183 : vector<2x16xf32>
    %185 = vector.extract_strided_slice %9 {offsets = [8, 0], sizes = [2, 16], strides = [1, 1]} : vector<16x16xf32> to vector<2x16xf32>
    %cst_71 = arith.constant dense<0.000000e+00> : vector<2x16xf32>
    %186 = tpu.matmul %175, %17, %cst_71 {dimension_numbers = #tpu.dot_dimension_numbers<[1], [0], [0], [1], [0, 0, 1, 1], [], []>} : vector<2x16xf32>, vector<16x16xf32>, vector<2x16xf32> -> vector<2x16xf32>
    %187 = arith.addf %185, %186 : vector<2x16xf32>
    %cst_72 = arith.constant 0.000000e+00 : f32
    %188 = vector.broadcast %cst_72 : f32 to vector<2x16xf32>
    %189 = arith.subf %188, %178 : vector<2x16xf32>
    %190 = math.exp %189 : vector<2x16xf32>
    %cst_73 = arith.constant 1.000000e+00 : f32
    %191 = vector.broadcast %cst_73 : f32 to vector<2x16xf32>
    %192 = arith.addf %191, %190 : vector<2x16xf32>
    %cst_74 = arith.constant 1.000000e+00 : f32
    %193 = vector.broadcast %cst_74 : f32 to vector<2x16xf32>
    %194 = arith.divf %193, %192 : vector<2x16xf32>
    %cst_75 = arith.constant 0.000000e+00 : f32
    %195 = vector.broadcast %cst_75 : f32 to vector<2x16xf32>
    %196 = arith.subf %195, %181 : vector<2x16xf32>
    %197 = math.exp %196 : vector<2x16xf32>
    %cst_76 = arith.constant 1.000000e+00 : f32
    %198 = vector.broadcast %cst_76 : f32 to vector<2x16xf32>
    %199 = arith.addf %198, %197 : vector<2x16xf32>
    %cst_77 = arith.constant 1.000000e+00 : f32
    %200 = vector.broadcast %cst_77 : f32 to vector<2x16xf32>
    %201 = arith.divf %200, %199 : vector<2x16xf32>
    %202 = math.tanh %184 : vector<2x16xf32>
    %cst_78 = arith.constant 0.000000e+00 : f32
    %203 = vector.broadcast %cst_78 : f32 to vector<2x16xf32>
    %204 = arith.subf %203, %187 : vector<2x16xf32>
    %205 = math.exp %204 : vector<2x16xf32>
    %cst_79 = arith.constant 1.000000e+00 : f32
    %206 = vector.broadcast %cst_79 : f32 to vector<2x16xf32>
    %207 = arith.addf %206, %205 : vector<2x16xf32>
    %cst_80 = arith.constant 1.000000e+00 : f32
    %208 = vector.broadcast %cst_80 : f32 to vector<2x16xf32>
    %209 = arith.divf %208, %207 : vector<2x16xf32>
    %210 = arith.mulf %201, %173 : vector<2x16xf32>
    %211 = arith.mulf %194, %202 : vector<2x16xf32>
    %212 = arith.addf %210, %211 : vector<2x16xf32>
    %213 = math.tanh %212 : vector<2x16xf32>
    %214 = arith.mulf %209, %213 : vector<2x16xf32>
    %215 = vector.extract_strided_slice %6 {offsets = [10, 0], sizes = [2, 16], strides = [1, 1]} : vector<16x16xf32> to vector<2x16xf32>
    %cst_81 = arith.constant dense<0.000000e+00> : vector<2x16xf32>
    %216 = tpu.matmul %214, %11, %cst_81 {dimension_numbers = #tpu.dot_dimension_numbers<[1], [0], [0], [1], [0, 0, 1, 1], [], []>} : vector<2x16xf32>, vector<16x16xf32>, vector<2x16xf32> -> vector<2x16xf32>
    %217 = arith.addf %215, %216 : vector<2x16xf32>
    %218 = vector.extract_strided_slice %7 {offsets = [10, 0], sizes = [2, 16], strides = [1, 1]} : vector<16x16xf32> to vector<2x16xf32>
    %cst_82 = arith.constant dense<0.000000e+00> : vector<2x16xf32>
    %219 = tpu.matmul %214, %13, %cst_82 {dimension_numbers = #tpu.dot_dimension_numbers<[1], [0], [0], [1], [0, 0, 1, 1], [], []>} : vector<2x16xf32>, vector<16x16xf32>, vector<2x16xf32> -> vector<2x16xf32>
    %220 = arith.addf %218, %219 : vector<2x16xf32>
    %221 = vector.extract_strided_slice %8 {offsets = [10, 0], sizes = [2, 16], strides = [1, 1]} : vector<16x16xf32> to vector<2x16xf32>
    %cst_83 = arith.constant dense<0.000000e+00> : vector<2x16xf32>
    %222 = tpu.matmul %214, %15, %cst_83 {dimension_numbers = #tpu.dot_dimension_numbers<[1], [0], [0], [1], [0, 0, 1, 1], [], []>} : vector<2x16xf32>, vector<16x16xf32>, vector<2x16xf32> -> vector<2x16xf32>
    %223 = arith.addf %221, %222 : vector<2x16xf32>
    %224 = vector.extract_strided_slice %9 {offsets = [10, 0], sizes = [2, 16], strides = [1, 1]} : vector<16x16xf32> to vector<2x16xf32>
    %cst_84 = arith.constant dense<0.000000e+00> : vector<2x16xf32>
    %225 = tpu.matmul %214, %17, %cst_84 {dimension_numbers = #tpu.dot_dimension_numbers<[1], [0], [0], [1], [0, 0, 1, 1], [], []>} : vector<2x16xf32>, vector<16x16xf32>, vector<2x16xf32> -> vector<2x16xf32>
    %226 = arith.addf %224, %225 : vector<2x16xf32>
    %cst_85 = arith.constant 0.000000e+00 : f32
    %227 = vector.broadcast %cst_85 : f32 to vector<2x16xf32>
    %228 = arith.subf %227, %217 : vector<2x16xf32>
    %229 = math.exp %228 : vector<2x16xf32>
    %cst_86 = arith.constant 1.000000e+00 : f32
    %230 = vector.broadcast %cst_86 : f32 to vector<2x16xf32>
    %231 = arith.addf %230, %229 : vector<2x16xf32>
    %cst_87 = arith.constant 1.000000e+00 : f32
    %232 = vector.broadcast %cst_87 : f32 to vector<2x16xf32>
    %233 = arith.divf %232, %231 : vector<2x16xf32>
    %cst_88 = arith.constant 0.000000e+00 : f32
    %234 = vector.broadcast %cst_88 : f32 to vector<2x16xf32>
    %235 = arith.subf %234, %220 : vector<2x16xf32>
    %236 = math.exp %235 : vector<2x16xf32>
    %cst_89 = arith.constant 1.000000e+00 : f32
    %237 = vector.broadcast %cst_89 : f32 to vector<2x16xf32>
    %238 = arith.addf %237, %236 : vector<2x16xf32>
    %cst_90 = arith.constant 1.000000e+00 : f32
    %239 = vector.broadcast %cst_90 : f32 to vector<2x16xf32>
    %240 = arith.divf %239, %238 : vector<2x16xf32>
    %241 = math.tanh %223 : vector<2x16xf32>
    %cst_91 = arith.constant 0.000000e+00 : f32
    %242 = vector.broadcast %cst_91 : f32 to vector<2x16xf32>
    %243 = arith.subf %242, %226 : vector<2x16xf32>
    %244 = math.exp %243 : vector<2x16xf32>
    %cst_92 = arith.constant 1.000000e+00 : f32
    %245 = vector.broadcast %cst_92 : f32 to vector<2x16xf32>
    %246 = arith.addf %245, %244 : vector<2x16xf32>
    %cst_93 = arith.constant 1.000000e+00 : f32
    %247 = vector.broadcast %cst_93 : f32 to vector<2x16xf32>
    %248 = arith.divf %247, %246 : vector<2x16xf32>
    %249 = arith.mulf %240, %212 : vector<2x16xf32>
    %250 = arith.mulf %233, %241 : vector<2x16xf32>
    %251 = arith.addf %249, %250 : vector<2x16xf32>
    %252 = math.tanh %251 : vector<2x16xf32>
    %253 = arith.mulf %248, %252 : vector<2x16xf32>
    %254 = vector.extract_strided_slice %6 {offsets = [12, 0], sizes = [2, 16], strides = [1, 1]} : vector<16x16xf32> to vector<2x16xf32>
    %cst_94 = arith.constant dense<0.000000e+00> : vector<2x16xf32>
    %255 = tpu.matmul %253, %11, %cst_94 {dimension_numbers = #tpu.dot_dimension_numbers<[1], [0], [0], [1], [0, 0, 1, 1], [], []>} : vector<2x16xf32>, vector<16x16xf32>, vector<2x16xf32> -> vector<2x16xf32>
    %256 = arith.addf %254, %255 : vector<2x16xf32>
    %257 = vector.extract_strided_slice %7 {offsets = [12, 0], sizes = [2, 16], strides = [1, 1]} : vector<16x16xf32> to vector<2x16xf32>
    %cst_95 = arith.constant dense<0.000000e+00> : vector<2x16xf32>
    %258 = tpu.matmul %253, %13, %cst_95 {dimension_numbers = #tpu.dot_dimension_numbers<[1], [0], [0], [1], [0, 0, 1, 1], [], []>} : vector<2x16xf32>, vector<16x16xf32>, vector<2x16xf32> -> vector<2x16xf32>
    %259 = arith.addf %257, %258 : vector<2x16xf32>
    %260 = vector.extract_strided_slice %8 {offsets = [12, 0], sizes = [2, 16], strides = [1, 1]} : vector<16x16xf32> to vector<2x16xf32>
    %cst_96 = arith.constant dense<0.000000e+00> : vector<2x16xf32>
    %261 = tpu.matmul %253, %15, %cst_96 {dimension_numbers = #tpu.dot_dimension_numbers<[1], [0], [0], [1], [0, 0, 1, 1], [], []>} : vector<2x16xf32>, vector<16x16xf32>, vector<2x16xf32> -> vector<2x16xf32>
    %262 = arith.addf %260, %261 : vector<2x16xf32>
    %263 = vector.extract_strided_slice %9 {offsets = [12, 0], sizes = [2, 16], strides = [1, 1]} : vector<16x16xf32> to vector<2x16xf32>
    %cst_97 = arith.constant dense<0.000000e+00> : vector<2x16xf32>
    %264 = tpu.matmul %253, %17, %cst_97 {dimension_numbers = #tpu.dot_dimension_numbers<[1], [0], [0], [1], [0, 0, 1, 1], [], []>} : vector<2x16xf32>, vector<16x16xf32>, vector<2x16xf32> -> vector<2x16xf32>
    %265 = arith.addf %263, %264 : vector<2x16xf32>
    %cst_98 = arith.constant 0.000000e+00 : f32
    %266 = vector.broadcast %cst_98 : f32 to vector<2x16xf32>
    %267 = arith.subf %266, %256 : vector<2x16xf32>
    %268 = math.exp %267 : vector<2x16xf32>
    %cst_99 = arith.constant 1.000000e+00 : f32
    %269 = vector.broadcast %cst_99 : f32 to vector<2x16xf32>
    %270 = arith.addf %269, %268 : vector<2x16xf32>
    %cst_100 = arith.constant 1.000000e+00 : f32
    %271 = vector.broadcast %cst_100 : f32 to vector<2x16xf32>
    %272 = arith.divf %271, %270 : vector<2x16xf32>
    %cst_101 = arith.constant 0.000000e+00 : f32
    %273 = vector.broadcast %cst_101 : f32 to vector<2x16xf32>
    %274 = arith.subf %273, %259 : vector<2x16xf32>
    %275 = math.exp %274 : vector<2x16xf32>
    %cst_102 = arith.constant 1.000000e+00 : f32
    %276 = vector.broadcast %cst_102 : f32 to vector<2x16xf32>
    %277 = arith.addf %276, %275 : vector<2x16xf32>
    %cst_103 = arith.constant 1.000000e+00 : f32
    %278 = vector.broadcast %cst_103 : f32 to vector<2x16xf32>
    %279 = arith.divf %278, %277 : vector<2x16xf32>
    %280 = math.tanh %262 : vector<2x16xf32>
    %cst_104 = arith.constant 0.000000e+00 : f32
    %281 = vector.broadcast %cst_104 : f32 to vector<2x16xf32>
    %282 = arith.subf %281, %265 : vector<2x16xf32>
    %283 = math.exp %282 : vector<2x16xf32>
    %cst_105 = arith.constant 1.000000e+00 : f32
    %284 = vector.broadcast %cst_105 : f32 to vector<2x16xf32>
    %285 = arith.addf %284, %283 : vector<2x16xf32>
    %cst_106 = arith.constant 1.000000e+00 : f32
    %286 = vector.broadcast %cst_106 : f32 to vector<2x16xf32>
    %287 = arith.divf %286, %285 : vector<2x16xf32>
    %288 = arith.mulf %279, %251 : vector<2x16xf32>
    %289 = arith.mulf %272, %280 : vector<2x16xf32>
    %290 = arith.addf %288, %289 : vector<2x16xf32>
    %291 = math.tanh %290 : vector<2x16xf32>
    %292 = arith.mulf %287, %291 : vector<2x16xf32>
    %293 = vector.extract_strided_slice %6 {offsets = [14, 0], sizes = [2, 16], strides = [1, 1]} : vector<16x16xf32> to vector<2x16xf32>
    %cst_107 = arith.constant dense<0.000000e+00> : vector<2x16xf32>
    %294 = tpu.matmul %292, %11, %cst_107 {dimension_numbers = #tpu.dot_dimension_numbers<[1], [0], [0], [1], [0, 0, 1, 1], [], []>} : vector<2x16xf32>, vector<16x16xf32>, vector<2x16xf32> -> vector<2x16xf32>
    %295 = arith.addf %293, %294 : vector<2x16xf32>
    %296 = vector.extract_strided_slice %7 {offsets = [14, 0], sizes = [2, 16], strides = [1, 1]} : vector<16x16xf32> to vector<2x16xf32>
    %cst_108 = arith.constant dense<0.000000e+00> : vector<2x16xf32>
    %297 = tpu.matmul %292, %13, %cst_108 {dimension_numbers = #tpu.dot_dimension_numbers<[1], [0], [0], [1], [0, 0, 1, 1], [], []>} : vector<2x16xf32>, vector<16x16xf32>, vector<2x16xf32> -> vector<2x16xf32>
    %298 = arith.addf %296, %297 : vector<2x16xf32>
    %299 = vector.extract_strided_slice %8 {offsets = [14, 0], sizes = [2, 16], strides = [1, 1]} : vector<16x16xf32> to vector<2x16xf32>
    %cst_109 = arith.constant dense<0.000000e+00> : vector<2x16xf32>
    %300 = tpu.matmul %292, %15, %cst_109 {dimension_numbers = #tpu.dot_dimension_numbers<[1], [0], [0], [1], [0, 0, 1, 1], [], []>} : vector<2x16xf32>, vector<16x16xf32>, vector<2x16xf32> -> vector<2x16xf32>
    %301 = arith.addf %299, %300 : vector<2x16xf32>
    %302 = vector.extract_strided_slice %9 {offsets = [14, 0], sizes = [2, 16], strides = [1, 1]} : vector<16x16xf32> to vector<2x16xf32>
    %cst_110 = arith.constant dense<0.000000e+00> : vector<2x16xf32>
    %303 = tpu.matmul %292, %17, %cst_110 {dimension_numbers = #tpu.dot_dimension_numbers<[1], [0], [0], [1], [0, 0, 1, 1], [], []>} : vector<2x16xf32>, vector<16x16xf32>, vector<2x16xf32> -> vector<2x16xf32>
    %304 = arith.addf %302, %303 : vector<2x16xf32>
    %cst_111 = arith.constant 0.000000e+00 : f32
    %305 = vector.broadcast %cst_111 : f32 to vector<2x16xf32>
    %306 = arith.subf %305, %295 : vector<2x16xf32>
    %307 = math.exp %306 : vector<2x16xf32>
    %cst_112 = arith.constant 1.000000e+00 : f32
    %308 = vector.broadcast %cst_112 : f32 to vector<2x16xf32>
    %309 = arith.addf %308, %307 : vector<2x16xf32>
    %cst_113 = arith.constant 1.000000e+00 : f32
    %310 = vector.broadcast %cst_113 : f32 to vector<2x16xf32>
    %311 = arith.divf %310, %309 : vector<2x16xf32>
    %cst_114 = arith.constant 0.000000e+00 : f32
    %312 = vector.broadcast %cst_114 : f32 to vector<2x16xf32>
    %313 = arith.subf %312, %298 : vector<2x16xf32>
    %314 = math.exp %313 : vector<2x16xf32>
    %cst_115 = arith.constant 1.000000e+00 : f32
    %315 = vector.broadcast %cst_115 : f32 to vector<2x16xf32>
    %316 = arith.addf %315, %314 : vector<2x16xf32>
    %cst_116 = arith.constant 1.000000e+00 : f32
    %317 = vector.broadcast %cst_116 : f32 to vector<2x16xf32>
    %318 = arith.divf %317, %316 : vector<2x16xf32>
    %319 = math.tanh %301 : vector<2x16xf32>
    %cst_117 = arith.constant 0.000000e+00 : f32
    %320 = vector.broadcast %cst_117 : f32 to vector<2x16xf32>
    %321 = arith.subf %320, %304 : vector<2x16xf32>
    %322 = math.exp %321 : vector<2x16xf32>
    %cst_118 = arith.constant 1.000000e+00 : f32
    %323 = vector.broadcast %cst_118 : f32 to vector<2x16xf32>
    %324 = arith.addf %323, %322 : vector<2x16xf32>
    %cst_119 = arith.constant 1.000000e+00 : f32
    %325 = vector.broadcast %cst_119 : f32 to vector<2x16xf32>
    %326 = arith.divf %325, %324 : vector<2x16xf32>
    %327 = arith.mulf %318, %290 : vector<2x16xf32>
    %328 = arith.mulf %311, %319 : vector<2x16xf32>
    %329 = arith.addf %327, %328 : vector<2x16xf32>
    %330 = math.tanh %329 : vector<2x16xf32>
    %331 = arith.mulf %326, %330 : vector<2x16xf32>
    %c0_120 = arith.constant 0 : index
    %c0_121 = arith.constant 0 : index
    %332 = vector.load %arg4[%c0_120, %c0_121] : memref<32x64xf32, #tpu.memory_space<vmem>>, vector<32x64xf32>
    %cst_122 = arith.constant dense<0.000000e+00> : vector<16x64xf32>
    %333 = tpu.matmul %0, %332, %cst_122 {dimension_numbers = #tpu.dot_dimension_numbers<[1], [0], [0], [1], [0, 0, 1, 1], [], []>} : vector<16x32xf32>, vector<32x64xf32>, vector<16x64xf32> -> vector<16x64xf32>
    %c0_123 = arith.constant 0 : index
    %c0_124 = arith.constant 0 : index
    %334 = vector.load %arg6[%c0_123, %c0_124] : memref<1x64xf32, #tpu.memory_space<vmem>>, vector<1x64xf32>
    %335 = vector.broadcast %334 : vector<1x64xf32> to vector<16x64xf32>
    %336 = arith.addf %333, %335 : vector<16x64xf32>
    %337 = vector.extract_strided_slice %336 {offsets = [0, 0], sizes = [16, 16], strides = [1, 1]} : vector<16x64xf32> to vector<16x16xf32>
    %338 = vector.extract_strided_slice %336 {offsets = [0, 16], sizes = [16, 16], strides = [1, 1]} : vector<16x64xf32> to vector<16x16xf32>
    %339 = vector.extract_strided_slice %336 {offsets = [0, 32], sizes = [16, 16], strides = [1, 1]} : vector<16x64xf32> to vector<16x16xf32>
    %340 = vector.extract_strided_slice %336 {offsets = [0, 48], sizes = [16, 16], strides = [1, 1]} : vector<16x64xf32> to vector<16x16xf32>
    %c0_125 = arith.constant 0 : index
    %c0_126 = arith.constant 0 : index
    %c0_127 = arith.constant 0 : index
    %341 = vector.load %arg5[%c0_125, %c0_126, %c0_127] : memref<4x16x16xf32, #tpu.memory_space<vmem>>, vector<1x16x16xf32>
    %342 = vector.shape_cast %341 : vector<1x16x16xf32> to vector<16x16xf32>
    %c1_128 = arith.constant 1 : index
    %c0_129 = arith.constant 0 : index
    %c0_130 = arith.constant 0 : index
    %343 = vector.load %arg5[%c1_128, %c0_129, %c0_130] : memref<4x16x16xf32, #tpu.memory_space<vmem>>, vector<1x16x16xf32>
    %344 = vector.shape_cast %343 : vector<1x16x16xf32> to vector<16x16xf32>
    %c2_131 = arith.constant 2 : index
    %c0_132 = arith.constant 0 : index
    %c0_133 = arith.constant 0 : index
    %345 = vector.load %arg5[%c2_131, %c0_132, %c0_133] : memref<4x16x16xf32, #tpu.memory_space<vmem>>, vector<1x16x16xf32>
    %346 = vector.shape_cast %345 : vector<1x16x16xf32> to vector<16x16xf32>
    %c3_134 = arith.constant 3 : index
    %c0_135 = arith.constant 0 : index
    %c0_136 = arith.constant 0 : index
    %347 = vector.load %arg5[%c3_134, %c0_135, %c0_136] : memref<4x16x16xf32, #tpu.memory_space<vmem>>, vector<1x16x16xf32>
    %348 = vector.shape_cast %347 : vector<1x16x16xf32> to vector<16x16xf32>
    %cst_137 = arith.constant 0.000000e+00 : f32
    %349 = vector.broadcast %cst_137 : f32 to vector<2x16xf32>
    %cst_138 = arith.constant 0.000000e+00 : f32
    %350 = vector.broadcast %cst_138 : f32 to vector<2x16xf32>
    %351 = vector.extract_strided_slice %337 {offsets = [14, 0], sizes = [2, 16], strides = [1, 1]} : vector<16x16xf32> to vector<2x16xf32>
    %cst_139 = arith.constant dense<0.000000e+00> : vector<2x16xf32>
    %352 = tpu.matmul %349, %342, %cst_139 {dimension_numbers = #tpu.dot_dimension_numbers<[1], [0], [0], [1], [0, 0, 1, 1], [], []>} : vector<2x16xf32>, vector<16x16xf32>, vector<2x16xf32> -> vector<2x16xf32>
    %353 = arith.addf %351, %352 : vector<2x16xf32>
    %354 = vector.extract_strided_slice %338 {offsets = [14, 0], sizes = [2, 16], strides = [1, 1]} : vector<16x16xf32> to vector<2x16xf32>
    %cst_140 = arith.constant dense<0.000000e+00> : vector<2x16xf32>
    %355 = tpu.matmul %349, %344, %cst_140 {dimension_numbers = #tpu.dot_dimension_numbers<[1], [0], [0], [1], [0, 0, 1, 1], [], []>} : vector<2x16xf32>, vector<16x16xf32>, vector<2x16xf32> -> vector<2x16xf32>
    %356 = arith.addf %354, %355 : vector<2x16xf32>
    %357 = vector.extract_strided_slice %339 {offsets = [14, 0], sizes = [2, 16], strides = [1, 1]} : vector<16x16xf32> to vector<2x16xf32>
    %cst_141 = arith.constant dense<0.000000e+00> : vector<2x16xf32>
    %358 = tpu.matmul %349, %346, %cst_141 {dimension_numbers = #tpu.dot_dimension_numbers<[1], [0], [0], [1], [0, 0, 1, 1], [], []>} : vector<2x16xf32>, vector<16x16xf32>, vector<2x16xf32> -> vector<2x16xf32>
    %359 = arith.addf %357, %358 : vector<2x16xf32>
    %360 = vector.extract_strided_slice %340 {offsets = [14, 0], sizes = [2, 16], strides = [1, 1]} : vector<16x16xf32> to vector<2x16xf32>
    %cst_142 = arith.constant dense<0.000000e+00> : vector<2x16xf32>
    %361 = tpu.matmul %349, %348, %cst_142 {dimension_numbers = #tpu.dot_dimension_numbers<[1], [0], [0], [1], [0, 0, 1, 1], [], []>} : vector<2x16xf32>, vector<16x16xf32>, vector<2x16xf32> -> vector<2x16xf32>
    %362 = arith.addf %360, %361 : vector<2x16xf32>
    %cst_143 = arith.constant 0.000000e+00 : f32
    %363 = vector.broadcast %cst_143 : f32 to vector<2x16xf32>
    %364 = arith.subf %363, %353 : vector<2x16xf32>
    %365 = math.exp %364 : vector<2x16xf32>
    %cst_144 = arith.constant 1.000000e+00 : f32
    %366 = vector.broadcast %cst_144 : f32 to vector<2x16xf32>
    %367 = arith.addf %366, %365 : vector<2x16xf32>
    %cst_145 = arith.constant 1.000000e+00 : f32
    %368 = vector.broadcast %cst_145 : f32 to vector<2x16xf32>
    %369 = arith.divf %368, %367 : vector<2x16xf32>
    %cst_146 = arith.constant 0.000000e+00 : f32
    %370 = vector.broadcast %cst_146 : f32 to vector<2x16xf32>
    %371 = arith.subf %370, %356 : vector<2x16xf32>
    %372 = math.exp %371 : vector<2x16xf32>
    %cst_147 = arith.constant 1.000000e+00 : f32
    %373 = vector.broadcast %cst_147 : f32 to vector<2x16xf32>
    %374 = arith.addf %373, %372 : vector<2x16xf32>
    %cst_148 = arith.constant 1.000000e+00 : f32
    %375 = vector.broadcast %cst_148 : f32 to vector<2x16xf32>
    %376 = arith.divf %375, %374 : vector<2x16xf32>
    %377 = math.tanh %359 : vector<2x16xf32>
    %cst_149 = arith.constant 0.000000e+00 : f32
    %378 = vector.broadcast %cst_149 : f32 to vector<2x16xf32>
    %379 = arith.subf %378, %362 : vector<2x16xf32>
    %380 = math.exp %379 : vector<2x16xf32>
    %cst_150 = arith.constant 1.000000e+00 : f32
    %381 = vector.broadcast %cst_150 : f32 to vector<2x16xf32>
    %382 = arith.addf %381, %380 : vector<2x16xf32>
    %cst_151 = arith.constant 1.000000e+00 : f32
    %383 = vector.broadcast %cst_151 : f32 to vector<2x16xf32>
    %384 = arith.divf %383, %382 : vector<2x16xf32>
    %385 = arith.mulf %376, %350 : vector<2x16xf32>
    %386 = arith.mulf %369, %377 : vector<2x16xf32>
    %387 = arith.addf %385, %386 : vector<2x16xf32>
    %388 = math.tanh %387 : vector<2x16xf32>
    %389 = arith.mulf %384, %388 : vector<2x16xf32>
    %390 = vector.extract_strided_slice %337 {offsets = [12, 0], sizes = [2, 16], strides = [1, 1]} : vector<16x16xf32> to vector<2x16xf32>
    %cst_152 = arith.constant dense<0.000000e+00> : vector<2x16xf32>
    %391 = tpu.matmul %389, %342, %cst_152 {dimension_numbers = #tpu.dot_dimension_numbers<[1], [0], [0], [1], [0, 0, 1, 1], [], []>} : vector<2x16xf32>, vector<16x16xf32>, vector<2x16xf32> -> vector<2x16xf32>
    %392 = arith.addf %390, %391 : vector<2x16xf32>
    %393 = vector.extract_strided_slice %338 {offsets = [12, 0], sizes = [2, 16], strides = [1, 1]} : vector<16x16xf32> to vector<2x16xf32>
    %cst_153 = arith.constant dense<0.000000e+00> : vector<2x16xf32>
    %394 = tpu.matmul %389, %344, %cst_153 {dimension_numbers = #tpu.dot_dimension_numbers<[1], [0], [0], [1], [0, 0, 1, 1], [], []>} : vector<2x16xf32>, vector<16x16xf32>, vector<2x16xf32> -> vector<2x16xf32>
    %395 = arith.addf %393, %394 : vector<2x16xf32>
    %396 = vector.extract_strided_slice %339 {offsets = [12, 0], sizes = [2, 16], strides = [1, 1]} : vector<16x16xf32> to vector<2x16xf32>
    %cst_154 = arith.constant dense<0.000000e+00> : vector<2x16xf32>
    %397 = tpu.matmul %389, %346, %cst_154 {dimension_numbers = #tpu.dot_dimension_numbers<[1], [0], [0], [1], [0, 0, 1, 1], [], []>} : vector<2x16xf32>, vector<16x16xf32>, vector<2x16xf32> -> vector<2x16xf32>
    %398 = arith.addf %396, %397 : vector<2x16xf32>
    %399 = vector.extract_strided_slice %340 {offsets = [12, 0], sizes = [2, 16], strides = [1, 1]} : vector<16x16xf32> to vector<2x16xf32>
    %cst_155 = arith.constant dense<0.000000e+00> : vector<2x16xf32>
    %400 = tpu.matmul %389, %348, %cst_155 {dimension_numbers = #tpu.dot_dimension_numbers<[1], [0], [0], [1], [0, 0, 1, 1], [], []>} : vector<2x16xf32>, vector<16x16xf32>, vector<2x16xf32> -> vector<2x16xf32>
    %401 = arith.addf %399, %400 : vector<2x16xf32>
    %cst_156 = arith.constant 0.000000e+00 : f32
    %402 = vector.broadcast %cst_156 : f32 to vector<2x16xf32>
    %403 = arith.subf %402, %392 : vector<2x16xf32>
    %404 = math.exp %403 : vector<2x16xf32>
    %cst_157 = arith.constant 1.000000e+00 : f32
    %405 = vector.broadcast %cst_157 : f32 to vector<2x16xf32>
    %406 = arith.addf %405, %404 : vector<2x16xf32>
    %cst_158 = arith.constant 1.000000e+00 : f32
    %407 = vector.broadcast %cst_158 : f32 to vector<2x16xf32>
    %408 = arith.divf %407, %406 : vector<2x16xf32>
    %cst_159 = arith.constant 0.000000e+00 : f32
    %409 = vector.broadcast %cst_159 : f32 to vector<2x16xf32>
    %410 = arith.subf %409, %395 : vector<2x16xf32>
    %411 = math.exp %410 : vector<2x16xf32>
    %cst_160 = arith.constant 1.000000e+00 : f32
    %412 = vector.broadcast %cst_160 : f32 to vector<2x16xf32>
    %413 = arith.addf %412, %411 : vector<2x16xf32>
    %cst_161 = arith.constant 1.000000e+00 : f32
    %414 = vector.broadcast %cst_161 : f32 to vector<2x16xf32>
    %415 = arith.divf %414, %413 : vector<2x16xf32>
    %416 = math.tanh %398 : vector<2x16xf32>
    %cst_162 = arith.constant 0.000000e+00 : f32
    %417 = vector.broadcast %cst_162 : f32 to vector<2x16xf32>
    %418 = arith.subf %417, %401 : vector<2x16xf32>
    %419 = math.exp %418 : vector<2x16xf32>
    %cst_163 = arith.constant 1.000000e+00 : f32
    %420 = vector.broadcast %cst_163 : f32 to vector<2x16xf32>
    %421 = arith.addf %420, %419 : vector<2x16xf32>
    %cst_164 = arith.constant 1.000000e+00 : f32
    %422 = vector.broadcast %cst_164 : f32 to vector<2x16xf32>
    %423 = arith.divf %422, %421 : vector<2x16xf32>
    %424 = arith.mulf %415, %387 : vector<2x16xf32>
    %425 = arith.mulf %408, %416 : vector<2x16xf32>
    %426 = arith.addf %424, %425 : vector<2x16xf32>
    %427 = math.tanh %426 : vector<2x16xf32>
    %428 = arith.mulf %423, %427 : vector<2x16xf32>
    %429 = vector.extract_strided_slice %337 {offsets = [10, 0], sizes = [2, 16], strides = [1, 1]} : vector<16x16xf32> to vector<2x16xf32>
    %cst_165 = arith.constant dense<0.000000e+00> : vector<2x16xf32>
    %430 = tpu.matmul %428, %342, %cst_165 {dimension_numbers = #tpu.dot_dimension_numbers<[1], [0], [0], [1], [0, 0, 1, 1], [], []>} : vector<2x16xf32>, vector<16x16xf32>, vector<2x16xf32> -> vector<2x16xf32>
    %431 = arith.addf %429, %430 : vector<2x16xf32>
    %432 = vector.extract_strided_slice %338 {offsets = [10, 0], sizes = [2, 16], strides = [1, 1]} : vector<16x16xf32> to vector<2x16xf32>
    %cst_166 = arith.constant dense<0.000000e+00> : vector<2x16xf32>
    %433 = tpu.matmul %428, %344, %cst_166 {dimension_numbers = #tpu.dot_dimension_numbers<[1], [0], [0], [1], [0, 0, 1, 1], [], []>} : vector<2x16xf32>, vector<16x16xf32>, vector<2x16xf32> -> vector<2x16xf32>
    %434 = arith.addf %432, %433 : vector<2x16xf32>
    %435 = vector.extract_strided_slice %339 {offsets = [10, 0], sizes = [2, 16], strides = [1, 1]} : vector<16x16xf32> to vector<2x16xf32>
    %cst_167 = arith.constant dense<0.000000e+00> : vector<2x16xf32>
    %436 = tpu.matmul %428, %346, %cst_167 {dimension_numbers = #tpu.dot_dimension_numbers<[1], [0], [0], [1], [0, 0, 1, 1], [], []>} : vector<2x16xf32>, vector<16x16xf32>, vector<2x16xf32> -> vector<2x16xf32>
    %437 = arith.addf %435, %436 : vector<2x16xf32>
    %438 = vector.extract_strided_slice %340 {offsets = [10, 0], sizes = [2, 16], strides = [1, 1]} : vector<16x16xf32> to vector<2x16xf32>
    %cst_168 = arith.constant dense<0.000000e+00> : vector<2x16xf32>
    %439 = tpu.matmul %428, %348, %cst_168 {dimension_numbers = #tpu.dot_dimension_numbers<[1], [0], [0], [1], [0, 0, 1, 1], [], []>} : vector<2x16xf32>, vector<16x16xf32>, vector<2x16xf32> -> vector<2x16xf32>
    %440 = arith.addf %438, %439 : vector<2x16xf32>
    %cst_169 = arith.constant 0.000000e+00 : f32
    %441 = vector.broadcast %cst_169 : f32 to vector<2x16xf32>
    %442 = arith.subf %441, %431 : vector<2x16xf32>
    %443 = math.exp %442 : vector<2x16xf32>
    %cst_170 = arith.constant 1.000000e+00 : f32
    %444 = vector.broadcast %cst_170 : f32 to vector<2x16xf32>
    %445 = arith.addf %444, %443 : vector<2x16xf32>
    %cst_171 = arith.constant 1.000000e+00 : f32
    %446 = vector.broadcast %cst_171 : f32 to vector<2x16xf32>
    %447 = arith.divf %446, %445 : vector<2x16xf32>
    %cst_172 = arith.constant 0.000000e+00 : f32
    %448 = vector.broadcast %cst_172 : f32 to vector<2x16xf32>
    %449 = arith.subf %448, %434 : vector<2x16xf32>
    %450 = math.exp %449 : vector<2x16xf32>
    %cst_173 = arith.constant 1.000000e+00 : f32
    %451 = vector.broadcast %cst_173 : f32 to vector<2x16xf32>
    %452 = arith.addf %451, %450 : vector<2x16xf32>
    %cst_174 = arith.constant 1.000000e+00 : f32
    %453 = vector.broadcast %cst_174 : f32 to vector<2x16xf32>
    %454 = arith.divf %453, %452 : vector<2x16xf32>
    %455 = math.tanh %437 : vector<2x16xf32>
    %cst_175 = arith.constant 0.000000e+00 : f32
    %456 = vector.broadcast %cst_175 : f32 to vector<2x16xf32>
    %457 = arith.subf %456, %440 : vector<2x16xf32>
    %458 = math.exp %457 : vector<2x16xf32>
    %cst_176 = arith.constant 1.000000e+00 : f32
    %459 = vector.broadcast %cst_176 : f32 to vector<2x16xf32>
    %460 = arith.addf %459, %458 : vector<2x16xf32>
    %cst_177 = arith.constant 1.000000e+00 : f32
    %461 = vector.broadcast %cst_177 : f32 to vector<2x16xf32>
    %462 = arith.divf %461, %460 : vector<2x16xf32>
    %463 = arith.mulf %454, %426 : vector<2x16xf32>
    %464 = arith.mulf %447, %455 : vector<2x16xf32>
    %465 = arith.addf %463, %464 : vector<2x16xf32>
    %466 = math.tanh %465 : vector<2x16xf32>
    %467 = arith.mulf %462, %466 : vector<2x16xf32>
    %468 = vector.extract_strided_slice %337 {offsets = [8, 0], sizes = [2, 16], strides = [1, 1]} : vector<16x16xf32> to vector<2x16xf32>
    %cst_178 = arith.constant dense<0.000000e+00> : vector<2x16xf32>
    %469 = tpu.matmul %467, %342, %cst_178 {dimension_numbers = #tpu.dot_dimension_numbers<[1], [0], [0], [1], [0, 0, 1, 1], [], []>} : vector<2x16xf32>, vector<16x16xf32>, vector<2x16xf32> -> vector<2x16xf32>
    %470 = arith.addf %468, %469 : vector<2x16xf32>
    %471 = vector.extract_strided_slice %338 {offsets = [8, 0], sizes = [2, 16], strides = [1, 1]} : vector<16x16xf32> to vector<2x16xf32>
    %cst_179 = arith.constant dense<0.000000e+00> : vector<2x16xf32>
    %472 = tpu.matmul %467, %344, %cst_179 {dimension_numbers = #tpu.dot_dimension_numbers<[1], [0], [0], [1], [0, 0, 1, 1], [], []>} : vector<2x16xf32>, vector<16x16xf32>, vector<2x16xf32> -> vector<2x16xf32>
    %473 = arith.addf %471, %472 : vector<2x16xf32>
    %474 = vector.extract_strided_slice %339 {offsets = [8, 0], sizes = [2, 16], strides = [1, 1]} : vector<16x16xf32> to vector<2x16xf32>
    %cst_180 = arith.constant dense<0.000000e+00> : vector<2x16xf32>
    %475 = tpu.matmul %467, %346, %cst_180 {dimension_numbers = #tpu.dot_dimension_numbers<[1], [0], [0], [1], [0, 0, 1, 1], [], []>} : vector<2x16xf32>, vector<16x16xf32>, vector<2x16xf32> -> vector<2x16xf32>
    %476 = arith.addf %474, %475 : vector<2x16xf32>
    %477 = vector.extract_strided_slice %340 {offsets = [8, 0], sizes = [2, 16], strides = [1, 1]} : vector<16x16xf32> to vector<2x16xf32>
    %cst_181 = arith.constant dense<0.000000e+00> : vector<2x16xf32>
    %478 = tpu.matmul %467, %348, %cst_181 {dimension_numbers = #tpu.dot_dimension_numbers<[1], [0], [0], [1], [0, 0, 1, 1], [], []>} : vector<2x16xf32>, vector<16x16xf32>, vector<2x16xf32> -> vector<2x16xf32>
    %479 = arith.addf %477, %478 : vector<2x16xf32>
    %cst_182 = arith.constant 0.000000e+00 : f32
    %480 = vector.broadcast %cst_182 : f32 to vector<2x16xf32>
    %481 = arith.subf %480, %470 : vector<2x16xf32>
    %482 = math.exp %481 : vector<2x16xf32>
    %cst_183 = arith.constant 1.000000e+00 : f32
    %483 = vector.broadcast %cst_183 : f32 to vector<2x16xf32>
    %484 = arith.addf %483, %482 : vector<2x16xf32>
    %cst_184 = arith.constant 1.000000e+00 : f32
    %485 = vector.broadcast %cst_184 : f32 to vector<2x16xf32>
    %486 = arith.divf %485, %484 : vector<2x16xf32>
    %cst_185 = arith.constant 0.000000e+00 : f32
    %487 = vector.broadcast %cst_185 : f32 to vector<2x16xf32>
    %488 = arith.subf %487, %473 : vector<2x16xf32>
    %489 = math.exp %488 : vector<2x16xf32>
    %cst_186 = arith.constant 1.000000e+00 : f32
    %490 = vector.broadcast %cst_186 : f32 to vector<2x16xf32>
    %491 = arith.addf %490, %489 : vector<2x16xf32>
    %cst_187 = arith.constant 1.000000e+00 : f32
    %492 = vector.broadcast %cst_187 : f32 to vector<2x16xf32>
    %493 = arith.divf %492, %491 : vector<2x16xf32>
    %494 = math.tanh %476 : vector<2x16xf32>
    %cst_188 = arith.constant 0.000000e+00 : f32
    %495 = vector.broadcast %cst_188 : f32 to vector<2x16xf32>
    %496 = arith.subf %495, %479 : vector<2x16xf32>
    %497 = math.exp %496 : vector<2x16xf32>
    %cst_189 = arith.constant 1.000000e+00 : f32
    %498 = vector.broadcast %cst_189 : f32 to vector<2x16xf32>
    %499 = arith.addf %498, %497 : vector<2x16xf32>
    %cst_190 = arith.constant 1.000000e+00 : f32
    %500 = vector.broadcast %cst_190 : f32 to vector<2x16xf32>
    %501 = arith.divf %500, %499 : vector<2x16xf32>
    %502 = arith.mulf %493, %465 : vector<2x16xf32>
    %503 = arith.mulf %486, %494 : vector<2x16xf32>
    %504 = arith.addf %502, %503 : vector<2x16xf32>
    %505 = math.tanh %504 : vector<2x16xf32>
    %506 = arith.mulf %501, %505 : vector<2x16xf32>
    %507 = vector.extract_strided_slice %337 {offsets = [6, 0], sizes = [2, 16], strides = [1, 1]} : vector<16x16xf32> to vector<2x16xf32>
    %cst_191 = arith.constant dense<0.000000e+00> : vector<2x16xf32>
    %508 = tpu.matmul %506, %342, %cst_191 {dimension_numbers = #tpu.dot_dimension_numbers<[1], [0], [0], [1], [0, 0, 1, 1], [], []>} : vector<2x16xf32>, vector<16x16xf32>, vector<2x16xf32> -> vector<2x16xf32>
    %509 = arith.addf %507, %508 : vector<2x16xf32>
    %510 = vector.extract_strided_slice %338 {offsets = [6, 0], sizes = [2, 16], strides = [1, 1]} : vector<16x16xf32> to vector<2x16xf32>
    %cst_192 = arith.constant dense<0.000000e+00> : vector<2x16xf32>
    %511 = tpu.matmul %506, %344, %cst_192 {dimension_numbers = #tpu.dot_dimension_numbers<[1], [0], [0], [1], [0, 0, 1, 1], [], []>} : vector<2x16xf32>, vector<16x16xf32>, vector<2x16xf32> -> vector<2x16xf32>
    %512 = arith.addf %510, %511 : vector<2x16xf32>
    %513 = vector.extract_strided_slice %339 {offsets = [6, 0], sizes = [2, 16], strides = [1, 1]} : vector<16x16xf32> to vector<2x16xf32>
    %cst_193 = arith.constant dense<0.000000e+00> : vector<2x16xf32>
    %514 = tpu.matmul %506, %346, %cst_193 {dimension_numbers = #tpu.dot_dimension_numbers<[1], [0], [0], [1], [0, 0, 1, 1], [], []>} : vector<2x16xf32>, vector<16x16xf32>, vector<2x16xf32> -> vector<2x16xf32>
    %515 = arith.addf %513, %514 : vector<2x16xf32>
    %516 = vector.extract_strided_slice %340 {offsets = [6, 0], sizes = [2, 16], strides = [1, 1]} : vector<16x16xf32> to vector<2x16xf32>
    %cst_194 = arith.constant dense<0.000000e+00> : vector<2x16xf32>
    %517 = tpu.matmul %506, %348, %cst_194 {dimension_numbers = #tpu.dot_dimension_numbers<[1], [0], [0], [1], [0, 0, 1, 1], [], []>} : vector<2x16xf32>, vector<16x16xf32>, vector<2x16xf32> -> vector<2x16xf32>
    %518 = arith.addf %516, %517 : vector<2x16xf32>
    %cst_195 = arith.constant 0.000000e+00 : f32
    %519 = vector.broadcast %cst_195 : f32 to vector<2x16xf32>
    %520 = arith.subf %519, %509 : vector<2x16xf32>
    %521 = math.exp %520 : vector<2x16xf32>
    %cst_196 = arith.constant 1.000000e+00 : f32
    %522 = vector.broadcast %cst_196 : f32 to vector<2x16xf32>
    %523 = arith.addf %522, %521 : vector<2x16xf32>
    %cst_197 = arith.constant 1.000000e+00 : f32
    %524 = vector.broadcast %cst_197 : f32 to vector<2x16xf32>
    %525 = arith.divf %524, %523 : vector<2x16xf32>
    %cst_198 = arith.constant 0.000000e+00 : f32
    %526 = vector.broadcast %cst_198 : f32 to vector<2x16xf32>
    %527 = arith.subf %526, %512 : vector<2x16xf32>
    %528 = math.exp %527 : vector<2x16xf32>
    %cst_199 = arith.constant 1.000000e+00 : f32
    %529 = vector.broadcast %cst_199 : f32 to vector<2x16xf32>
    %530 = arith.addf %529, %528 : vector<2x16xf32>
    %cst_200 = arith.constant 1.000000e+00 : f32
    %531 = vector.broadcast %cst_200 : f32 to vector<2x16xf32>
    %532 = arith.divf %531, %530 : vector<2x16xf32>
    %533 = math.tanh %515 : vector<2x16xf32>
    %cst_201 = arith.constant 0.000000e+00 : f32
    %534 = vector.broadcast %cst_201 : f32 to vector<2x16xf32>
    %535 = arith.subf %534, %518 : vector<2x16xf32>
    %536 = math.exp %535 : vector<2x16xf32>
    %cst_202 = arith.constant 1.000000e+00 : f32
    %537 = vector.broadcast %cst_202 : f32 to vector<2x16xf32>
    %538 = arith.addf %537, %536 : vector<2x16xf32>
    %cst_203 = arith.constant 1.000000e+00 : f32
    %539 = vector.broadcast %cst_203 : f32 to vector<2x16xf32>
    %540 = arith.divf %539, %538 : vector<2x16xf32>
    %541 = arith.mulf %532, %504 : vector<2x16xf32>
    %542 = arith.mulf %525, %533 : vector<2x16xf32>
    %543 = arith.addf %541, %542 : vector<2x16xf32>
    %544 = math.tanh %543 : vector<2x16xf32>
    %545 = arith.mulf %540, %544 : vector<2x16xf32>
    %546 = vector.extract_strided_slice %337 {offsets = [4, 0], sizes = [2, 16], strides = [1, 1]} : vector<16x16xf32> to vector<2x16xf32>
    %cst_204 = arith.constant dense<0.000000e+00> : vector<2x16xf32>
    %547 = tpu.matmul %545, %342, %cst_204 {dimension_numbers = #tpu.dot_dimension_numbers<[1], [0], [0], [1], [0, 0, 1, 1], [], []>} : vector<2x16xf32>, vector<16x16xf32>, vector<2x16xf32> -> vector<2x16xf32>
    %548 = arith.addf %546, %547 : vector<2x16xf32>
    %549 = vector.extract_strided_slice %338 {offsets = [4, 0], sizes = [2, 16], strides = [1, 1]} : vector<16x16xf32> to vector<2x16xf32>
    %cst_205 = arith.constant dense<0.000000e+00> : vector<2x16xf32>
    %550 = tpu.matmul %545, %344, %cst_205 {dimension_numbers = #tpu.dot_dimension_numbers<[1], [0], [0], [1], [0, 0, 1, 1], [], []>} : vector<2x16xf32>, vector<16x16xf32>, vector<2x16xf32> -> vector<2x16xf32>
    %551 = arith.addf %549, %550 : vector<2x16xf32>
    %552 = vector.extract_strided_slice %339 {offsets = [4, 0], sizes = [2, 16], strides = [1, 1]} : vector<16x16xf32> to vector<2x16xf32>
    %cst_206 = arith.constant dense<0.000000e+00> : vector<2x16xf32>
    %553 = tpu.matmul %545, %346, %cst_206 {dimension_numbers = #tpu.dot_dimension_numbers<[1], [0], [0], [1], [0, 0, 1, 1], [], []>} : vector<2x16xf32>, vector<16x16xf32>, vector<2x16xf32> -> vector<2x16xf32>
    %554 = arith.addf %552, %553 : vector<2x16xf32>
    %555 = vector.extract_strided_slice %340 {offsets = [4, 0], sizes = [2, 16], strides = [1, 1]} : vector<16x16xf32> to vector<2x16xf32>
    %cst_207 = arith.constant dense<0.000000e+00> : vector<2x16xf32>
    %556 = tpu.matmul %545, %348, %cst_207 {dimension_numbers = #tpu.dot_dimension_numbers<[1], [0], [0], [1], [0, 0, 1, 1], [], []>} : vector<2x16xf32>, vector<16x16xf32>, vector<2x16xf32> -> vector<2x16xf32>
    %557 = arith.addf %555, %556 : vector<2x16xf32>
    %cst_208 = arith.constant 0.000000e+00 : f32
    %558 = vector.broadcast %cst_208 : f32 to vector<2x16xf32>
    %559 = arith.subf %558, %548 : vector<2x16xf32>
    %560 = math.exp %559 : vector<2x16xf32>
    %cst_209 = arith.constant 1.000000e+00 : f32
    %561 = vector.broadcast %cst_209 : f32 to vector<2x16xf32>
    %562 = arith.addf %561, %560 : vector<2x16xf32>
    %cst_210 = arith.constant 1.000000e+00 : f32
    %563 = vector.broadcast %cst_210 : f32 to vector<2x16xf32>
    %564 = arith.divf %563, %562 : vector<2x16xf32>
    %cst_211 = arith.constant 0.000000e+00 : f32
    %565 = vector.broadcast %cst_211 : f32 to vector<2x16xf32>
    %566 = arith.subf %565, %551 : vector<2x16xf32>
    %567 = math.exp %566 : vector<2x16xf32>
    %cst_212 = arith.constant 1.000000e+00 : f32
    %568 = vector.broadcast %cst_212 : f32 to vector<2x16xf32>
    %569 = arith.addf %568, %567 : vector<2x16xf32>
    %cst_213 = arith.constant 1.000000e+00 : f32
    %570 = vector.broadcast %cst_213 : f32 to vector<2x16xf32>
    %571 = arith.divf %570, %569 : vector<2x16xf32>
    %572 = math.tanh %554 : vector<2x16xf32>
    %cst_214 = arith.constant 0.000000e+00 : f32
    %573 = vector.broadcast %cst_214 : f32 to vector<2x16xf32>
    %574 = arith.subf %573, %557 : vector<2x16xf32>
    %575 = math.exp %574 : vector<2x16xf32>
    %cst_215 = arith.constant 1.000000e+00 : f32
    %576 = vector.broadcast %cst_215 : f32 to vector<2x16xf32>
    %577 = arith.addf %576, %575 : vector<2x16xf32>
    %cst_216 = arith.constant 1.000000e+00 : f32
    %578 = vector.broadcast %cst_216 : f32 to vector<2x16xf32>
    %579 = arith.divf %578, %577 : vector<2x16xf32>
    %580 = arith.mulf %571, %543 : vector<2x16xf32>
    %581 = arith.mulf %564, %572 : vector<2x16xf32>
    %582 = arith.addf %580, %581 : vector<2x16xf32>
    %583 = math.tanh %582 : vector<2x16xf32>
    %584 = arith.mulf %579, %583 : vector<2x16xf32>
    %585 = vector.extract_strided_slice %337 {offsets = [2, 0], sizes = [2, 16], strides = [1, 1]} : vector<16x16xf32> to vector<2x16xf32>
    %cst_217 = arith.constant dense<0.000000e+00> : vector<2x16xf32>
    %586 = tpu.matmul %584, %342, %cst_217 {dimension_numbers = #tpu.dot_dimension_numbers<[1], [0], [0], [1], [0, 0, 1, 1], [], []>} : vector<2x16xf32>, vector<16x16xf32>, vector<2x16xf32> -> vector<2x16xf32>
    %587 = arith.addf %585, %586 : vector<2x16xf32>
    %588 = vector.extract_strided_slice %338 {offsets = [2, 0], sizes = [2, 16], strides = [1, 1]} : vector<16x16xf32> to vector<2x16xf32>
    %cst_218 = arith.constant dense<0.000000e+00> : vector<2x16xf32>
    %589 = tpu.matmul %584, %344, %cst_218 {dimension_numbers = #tpu.dot_dimension_numbers<[1], [0], [0], [1], [0, 0, 1, 1], [], []>} : vector<2x16xf32>, vector<16x16xf32>, vector<2x16xf32> -> vector<2x16xf32>
    %590 = arith.addf %588, %589 : vector<2x16xf32>
    %591 = vector.extract_strided_slice %339 {offsets = [2, 0], sizes = [2, 16], strides = [1, 1]} : vector<16x16xf32> to vector<2x16xf32>
    %cst_219 = arith.constant dense<0.000000e+00> : vector<2x16xf32>
    %592 = tpu.matmul %584, %346, %cst_219 {dimension_numbers = #tpu.dot_dimension_numbers<[1], [0], [0], [1], [0, 0, 1, 1], [], []>} : vector<2x16xf32>, vector<16x16xf32>, vector<2x16xf32> -> vector<2x16xf32>
    %593 = arith.addf %591, %592 : vector<2x16xf32>
    %594 = vector.extract_strided_slice %340 {offsets = [2, 0], sizes = [2, 16], strides = [1, 1]} : vector<16x16xf32> to vector<2x16xf32>
    %cst_220 = arith.constant dense<0.000000e+00> : vector<2x16xf32>
    %595 = tpu.matmul %584, %348, %cst_220 {dimension_numbers = #tpu.dot_dimension_numbers<[1], [0], [0], [1], [0, 0, 1, 1], [], []>} : vector<2x16xf32>, vector<16x16xf32>, vector<2x16xf32> -> vector<2x16xf32>
    %596 = arith.addf %594, %595 : vector<2x16xf32>
    %cst_221 = arith.constant 0.000000e+00 : f32
    %597 = vector.broadcast %cst_221 : f32 to vector<2x16xf32>
    %598 = arith.subf %597, %587 : vector<2x16xf32>
    %599 = math.exp %598 : vector<2x16xf32>
    %cst_222 = arith.constant 1.000000e+00 : f32
    %600 = vector.broadcast %cst_222 : f32 to vector<2x16xf32>
    %601 = arith.addf %600, %599 : vector<2x16xf32>
    %cst_223 = arith.constant 1.000000e+00 : f32
    %602 = vector.broadcast %cst_223 : f32 to vector<2x16xf32>
    %603 = arith.divf %602, %601 : vector<2x16xf32>
    %cst_224 = arith.constant 0.000000e+00 : f32
    %604 = vector.broadcast %cst_224 : f32 to vector<2x16xf32>
    %605 = arith.subf %604, %590 : vector<2x16xf32>
    %606 = math.exp %605 : vector<2x16xf32>
    %cst_225 = arith.constant 1.000000e+00 : f32
    %607 = vector.broadcast %cst_225 : f32 to vector<2x16xf32>
    %608 = arith.addf %607, %606 : vector<2x16xf32>
    %cst_226 = arith.constant 1.000000e+00 : f32
    %609 = vector.broadcast %cst_226 : f32 to vector<2x16xf32>
    %610 = arith.divf %609, %608 : vector<2x16xf32>
    %611 = math.tanh %593 : vector<2x16xf32>
    %cst_227 = arith.constant 0.000000e+00 : f32
    %612 = vector.broadcast %cst_227 : f32 to vector<2x16xf32>
    %613 = arith.subf %612, %596 : vector<2x16xf32>
    %614 = math.exp %613 : vector<2x16xf32>
    %cst_228 = arith.constant 1.000000e+00 : f32
    %615 = vector.broadcast %cst_228 : f32 to vector<2x16xf32>
    %616 = arith.addf %615, %614 : vector<2x16xf32>
    %cst_229 = arith.constant 1.000000e+00 : f32
    %617 = vector.broadcast %cst_229 : f32 to vector<2x16xf32>
    %618 = arith.divf %617, %616 : vector<2x16xf32>
    %619 = arith.mulf %610, %582 : vector<2x16xf32>
    %620 = arith.mulf %603, %611 : vector<2x16xf32>
    %621 = arith.addf %619, %620 : vector<2x16xf32>
    %622 = math.tanh %621 : vector<2x16xf32>
    %623 = arith.mulf %618, %622 : vector<2x16xf32>
    %624 = vector.extract_strided_slice %337 {offsets = [0, 0], sizes = [2, 16], strides = [1, 1]} : vector<16x16xf32> to vector<2x16xf32>
    %cst_230 = arith.constant dense<0.000000e+00> : vector<2x16xf32>
    %625 = tpu.matmul %623, %342, %cst_230 {dimension_numbers = #tpu.dot_dimension_numbers<[1], [0], [0], [1], [0, 0, 1, 1], [], []>} : vector<2x16xf32>, vector<16x16xf32>, vector<2x16xf32> -> vector<2x16xf32>
    %626 = arith.addf %624, %625 : vector<2x16xf32>
    %627 = vector.extract_strided_slice %338 {offsets = [0, 0], sizes = [2, 16], strides = [1, 1]} : vector<16x16xf32> to vector<2x16xf32>
    %cst_231 = arith.constant dense<0.000000e+00> : vector<2x16xf32>
    %628 = tpu.matmul %623, %344, %cst_231 {dimension_numbers = #tpu.dot_dimension_numbers<[1], [0], [0], [1], [0, 0, 1, 1], [], []>} : vector<2x16xf32>, vector<16x16xf32>, vector<2x16xf32> -> vector<2x16xf32>
    %629 = arith.addf %627, %628 : vector<2x16xf32>
    %630 = vector.extract_strided_slice %339 {offsets = [0, 0], sizes = [2, 16], strides = [1, 1]} : vector<16x16xf32> to vector<2x16xf32>
    %cst_232 = arith.constant dense<0.000000e+00> : vector<2x16xf32>
    %631 = tpu.matmul %623, %346, %cst_232 {dimension_numbers = #tpu.dot_dimension_numbers<[1], [0], [0], [1], [0, 0, 1, 1], [], []>} : vector<2x16xf32>, vector<16x16xf32>, vector<2x16xf32> -> vector<2x16xf32>
    %632 = arith.addf %630, %631 : vector<2x16xf32>
    %633 = vector.extract_strided_slice %340 {offsets = [0, 0], sizes = [2, 16], strides = [1, 1]} : vector<16x16xf32> to vector<2x16xf32>
    %cst_233 = arith.constant dense<0.000000e+00> : vector<2x16xf32>
    %634 = tpu.matmul %623, %348, %cst_233 {dimension_numbers = #tpu.dot_dimension_numbers<[1], [0], [0], [1], [0, 0, 1, 1], [], []>} : vector<2x16xf32>, vector<16x16xf32>, vector<2x16xf32> -> vector<2x16xf32>
    %635 = arith.addf %633, %634 : vector<2x16xf32>
    %cst_234 = arith.constant 0.000000e+00 : f32
    %636 = vector.broadcast %cst_234 : f32 to vector<2x16xf32>
    %637 = arith.subf %636, %626 : vector<2x16xf32>
    %638 = math.exp %637 : vector<2x16xf32>
    %cst_235 = arith.constant 1.000000e+00 : f32
    %639 = vector.broadcast %cst_235 : f32 to vector<2x16xf32>
    %640 = arith.addf %639, %638 : vector<2x16xf32>
    %cst_236 = arith.constant 1.000000e+00 : f32
    %641 = vector.broadcast %cst_236 : f32 to vector<2x16xf32>
    %642 = arith.divf %641, %640 : vector<2x16xf32>
    %cst_237 = arith.constant 0.000000e+00 : f32
    %643 = vector.broadcast %cst_237 : f32 to vector<2x16xf32>
    %644 = arith.subf %643, %629 : vector<2x16xf32>
    %645 = math.exp %644 : vector<2x16xf32>
    %cst_238 = arith.constant 1.000000e+00 : f32
    %646 = vector.broadcast %cst_238 : f32 to vector<2x16xf32>
    %647 = arith.addf %646, %645 : vector<2x16xf32>
    %cst_239 = arith.constant 1.000000e+00 : f32
    %648 = vector.broadcast %cst_239 : f32 to vector<2x16xf32>
    %649 = arith.divf %648, %647 : vector<2x16xf32>
    %650 = math.tanh %632 : vector<2x16xf32>
    %cst_240 = arith.constant 0.000000e+00 : f32
    %651 = vector.broadcast %cst_240 : f32 to vector<2x16xf32>
    %652 = arith.subf %651, %635 : vector<2x16xf32>
    %653 = math.exp %652 : vector<2x16xf32>
    %cst_241 = arith.constant 1.000000e+00 : f32
    %654 = vector.broadcast %cst_241 : f32 to vector<2x16xf32>
    %655 = arith.addf %654, %653 : vector<2x16xf32>
    %cst_242 = arith.constant 1.000000e+00 : f32
    %656 = vector.broadcast %cst_242 : f32 to vector<2x16xf32>
    %657 = arith.divf %656, %655 : vector<2x16xf32>
    %658 = arith.mulf %649, %621 : vector<2x16xf32>
    %659 = arith.mulf %642, %650 : vector<2x16xf32>
    %660 = arith.addf %658, %659 : vector<2x16xf32>
    %661 = math.tanh %660 : vector<2x16xf32>
    %662 = arith.mulf %657, %661 : vector<2x16xf32>
    %c0_243 = arith.constant 0 : index
    %c0_244 = arith.constant 0 : index
    %663 = vector.load %arg7[%c0_243, %c0_244] : memref<16x1xf32, #tpu.memory_space<vmem>>, vector<16x1xf32>
    %c0_245 = arith.constant 0 : index
    %c0_246 = arith.constant 0 : index
    %664 = vector.load %arg8[%c0_245, %c0_246] : memref<16x1xf32, #tpu.memory_space<vmem>>, vector<16x1xf32>
    %c0_247 = arith.constant 0 : index
    %c0_248 = arith.constant 0 : index
    %665 = vector.load %arg9[%c0_247, %c0_248] : memref<1x1xf32, #tpu.memory_space<vmem>>, vector<1x1xf32>
    %cst_249 = arith.constant dense<0.000000e+00> : vector<2x1xf32>
    %666 = tpu.matmul %58, %663, %cst_249 {dimension_numbers = #tpu.dot_dimension_numbers<[1], [0], [0], [1], [0, 0, 1, 1], [], []>} : vector<2x16xf32>, vector<16x1xf32>, vector<2x1xf32> -> vector<2x1xf32>
    %cst_250 = arith.constant dense<0.000000e+00> : vector<2x1xf32>
    %667 = tpu.matmul %662, %664, %cst_250 {dimension_numbers = #tpu.dot_dimension_numbers<[1], [0], [0], [1], [0, 0, 1, 1], [], []>} : vector<2x16xf32>, vector<16x1xf32>, vector<2x1xf32> -> vector<2x1xf32>
    %668 = arith.addf %666, %667 : vector<2x1xf32>
    %669 = vector.broadcast %665 : vector<1x1xf32> to vector<2x1xf32>
    %670 = arith.addf %668, %669 : vector<2x1xf32>
    %cst_251 = arith.constant dense<0.000000e+00> : vector<2x1xf32>
    %671 = tpu.matmul %97, %663, %cst_251 {dimension_numbers = #tpu.dot_dimension_numbers<[1], [0], [0], [1], [0, 0, 1, 1], [], []>} : vector<2x16xf32>, vector<16x1xf32>, vector<2x1xf32> -> vector<2x1xf32>
    %cst_252 = arith.constant dense<0.000000e+00> : vector<2x1xf32>
    %672 = tpu.matmul %623, %664, %cst_252 {dimension_numbers = #tpu.dot_dimension_numbers<[1], [0], [0], [1], [0, 0, 1, 1], [], []>} : vector<2x16xf32>, vector<16x1xf32>, vector<2x1xf32> -> vector<2x1xf32>
    %673 = arith.addf %671, %672 : vector<2x1xf32>
    %674 = vector.broadcast %665 : vector<1x1xf32> to vector<2x1xf32>
    %675 = arith.addf %673, %674 : vector<2x1xf32>
    %cst_253 = arith.constant dense<0.000000e+00> : vector<2x1xf32>
    %676 = tpu.matmul %136, %663, %cst_253 {dimension_numbers = #tpu.dot_dimension_numbers<[1], [0], [0], [1], [0, 0, 1, 1], [], []>} : vector<2x16xf32>, vector<16x1xf32>, vector<2x1xf32> -> vector<2x1xf32>
    %cst_254 = arith.constant dense<0.000000e+00> : vector<2x1xf32>
    %677 = tpu.matmul %584, %664, %cst_254 {dimension_numbers = #tpu.dot_dimension_numbers<[1], [0], [0], [1], [0, 0, 1, 1], [], []>} : vector<2x16xf32>, vector<16x1xf32>, vector<2x1xf32> -> vector<2x1xf32>
    %678 = arith.addf %676, %677 : vector<2x1xf32>
    %679 = vector.broadcast %665 : vector<1x1xf32> to vector<2x1xf32>
    %680 = arith.addf %678, %679 : vector<2x1xf32>
    %cst_255 = arith.constant dense<0.000000e+00> : vector<2x1xf32>
    %681 = tpu.matmul %175, %663, %cst_255 {dimension_numbers = #tpu.dot_dimension_numbers<[1], [0], [0], [1], [0, 0, 1, 1], [], []>} : vector<2x16xf32>, vector<16x1xf32>, vector<2x1xf32> -> vector<2x1xf32>
    %cst_256 = arith.constant dense<0.000000e+00> : vector<2x1xf32>
    %682 = tpu.matmul %545, %664, %cst_256 {dimension_numbers = #tpu.dot_dimension_numbers<[1], [0], [0], [1], [0, 0, 1, 1], [], []>} : vector<2x16xf32>, vector<16x1xf32>, vector<2x1xf32> -> vector<2x1xf32>
    %683 = arith.addf %681, %682 : vector<2x1xf32>
    %684 = vector.broadcast %665 : vector<1x1xf32> to vector<2x1xf32>
    %685 = arith.addf %683, %684 : vector<2x1xf32>
    %cst_257 = arith.constant dense<0.000000e+00> : vector<2x1xf32>
    %686 = tpu.matmul %214, %663, %cst_257 {dimension_numbers = #tpu.dot_dimension_numbers<[1], [0], [0], [1], [0, 0, 1, 1], [], []>} : vector<2x16xf32>, vector<16x1xf32>, vector<2x1xf32> -> vector<2x1xf32>
    %cst_258 = arith.constant dense<0.000000e+00> : vector<2x1xf32>
    %687 = tpu.matmul %506, %664, %cst_258 {dimension_numbers = #tpu.dot_dimension_numbers<[1], [0], [0], [1], [0, 0, 1, 1], [], []>} : vector<2x16xf32>, vector<16x1xf32>, vector<2x1xf32> -> vector<2x1xf32>
    %688 = arith.addf %686, %687 : vector<2x1xf32>
    %689 = vector.broadcast %665 : vector<1x1xf32> to vector<2x1xf32>
    %690 = arith.addf %688, %689 : vector<2x1xf32>
    %cst_259 = arith.constant dense<0.000000e+00> : vector<2x1xf32>
    %691 = tpu.matmul %253, %663, %cst_259 {dimension_numbers = #tpu.dot_dimension_numbers<[1], [0], [0], [1], [0, 0, 1, 1], [], []>} : vector<2x16xf32>, vector<16x1xf32>, vector<2x1xf32> -> vector<2x1xf32>
    %cst_260 = arith.constant dense<0.000000e+00> : vector<2x1xf32>
    %692 = tpu.matmul %467, %664, %cst_260 {dimension_numbers = #tpu.dot_dimension_numbers<[1], [0], [0], [1], [0, 0, 1, 1], [], []>} : vector<2x16xf32>, vector<16x1xf32>, vector<2x1xf32> -> vector<2x1xf32>
    %693 = arith.addf %691, %692 : vector<2x1xf32>
    %694 = vector.broadcast %665 : vector<1x1xf32> to vector<2x1xf32>
    %695 = arith.addf %693, %694 : vector<2x1xf32>
    %cst_261 = arith.constant dense<0.000000e+00> : vector<2x1xf32>
    %696 = tpu.matmul %292, %663, %cst_261 {dimension_numbers = #tpu.dot_dimension_numbers<[1], [0], [0], [1], [0, 0, 1, 1], [], []>} : vector<2x16xf32>, vector<16x1xf32>, vector<2x1xf32> -> vector<2x1xf32>
    %cst_262 = arith.constant dense<0.000000e+00> : vector<2x1xf32>
    %697 = tpu.matmul %428, %664, %cst_262 {dimension_numbers = #tpu.dot_dimension_numbers<[1], [0], [0], [1], [0, 0, 1, 1], [], []>} : vector<2x16xf32>, vector<16x1xf32>, vector<2x1xf32> -> vector<2x1xf32>
    %698 = arith.addf %696, %697 : vector<2x1xf32>
    %699 = vector.broadcast %665 : vector<1x1xf32> to vector<2x1xf32>
    %700 = arith.addf %698, %699 : vector<2x1xf32>
    %cst_263 = arith.constant dense<0.000000e+00> : vector<2x1xf32>
    %701 = tpu.matmul %331, %663, %cst_263 {dimension_numbers = #tpu.dot_dimension_numbers<[1], [0], [0], [1], [0, 0, 1, 1], [], []>} : vector<2x16xf32>, vector<16x1xf32>, vector<2x1xf32> -> vector<2x1xf32>
    %cst_264 = arith.constant dense<0.000000e+00> : vector<2x1xf32>
    %702 = tpu.matmul %389, %664, %cst_264 {dimension_numbers = #tpu.dot_dimension_numbers<[1], [0], [0], [1], [0, 0, 1, 1], [], []>} : vector<2x16xf32>, vector<16x1xf32>, vector<2x1xf32> -> vector<2x1xf32>
    %703 = arith.addf %701, %702 : vector<2x1xf32>
    %704 = vector.broadcast %665 : vector<1x1xf32> to vector<2x1xf32>
    %705 = arith.addf %703, %704 : vector<2x1xf32>
    %706 = arith.maximumf %670, %675 : vector<2x1xf32>
    %707 = arith.maximumf %706, %680 : vector<2x1xf32>
    %708 = arith.maximumf %707, %685 : vector<2x1xf32>
    %709 = arith.maximumf %708, %690 : vector<2x1xf32>
    %710 = arith.maximumf %709, %695 : vector<2x1xf32>
    %711 = arith.maximumf %710, %700 : vector<2x1xf32>
    %712 = arith.maximumf %711, %705 : vector<2x1xf32>
    %713 = arith.subf %670, %712 : vector<2x1xf32>
    %714 = math.exp %713 : vector<2x1xf32>
    %715 = arith.subf %675, %712 : vector<2x1xf32>
    %716 = math.exp %715 : vector<2x1xf32>
    %717 = arith.subf %680, %712 : vector<2x1xf32>
    %718 = math.exp %717 : vector<2x1xf32>
    %719 = arith.subf %685, %712 : vector<2x1xf32>
    %720 = math.exp %719 : vector<2x1xf32>
    %721 = arith.subf %690, %712 : vector<2x1xf32>
    %722 = math.exp %721 : vector<2x1xf32>
    %723 = arith.subf %695, %712 : vector<2x1xf32>
    %724 = math.exp %723 : vector<2x1xf32>
    %725 = arith.subf %700, %712 : vector<2x1xf32>
    %726 = math.exp %725 : vector<2x1xf32>
    %727 = arith.subf %705, %712 : vector<2x1xf32>
    %728 = math.exp %727 : vector<2x1xf32>
    %729 = arith.addf %714, %716 : vector<2x1xf32>
    %730 = arith.addf %729, %718 : vector<2x1xf32>
    %731 = arith.addf %730, %720 : vector<2x1xf32>
    %732 = arith.addf %731, %722 : vector<2x1xf32>
    %733 = arith.addf %732, %724 : vector<2x1xf32>
    %734 = arith.addf %733, %726 : vector<2x1xf32>
    %735 = arith.addf %734, %728 : vector<2x1xf32>
    %cst_265 = arith.constant 1.000000e+00 : f32
    %736 = vector.broadcast %cst_265 : f32 to vector<2x1xf32>
    %737 = arith.divf %736, %735 : vector<2x1xf32>
    %cst_266 = arith.constant 0.000000e+00 : f32
    %738 = vector.broadcast %cst_266 : f32 to vector<2x16xf32>
    %cst_267 = arith.constant 0.000000e+00 : f32
    %739 = vector.broadcast %cst_267 : f32 to vector<2x16xf32>
    %740 = arith.mulf %714, %737 : vector<2x1xf32>
    %741 = vector.broadcast %740 : vector<2x1xf32> to vector<2x16xf32>
    %742 = arith.mulf %741, %58 : vector<2x16xf32>
    %743 = arith.addf %738, %742 : vector<2x16xf32>
    %744 = vector.broadcast %740 : vector<2x1xf32> to vector<2x16xf32>
    %745 = arith.mulf %744, %662 : vector<2x16xf32>
    %746 = arith.addf %739, %745 : vector<2x16xf32>
    %747 = arith.mulf %716, %737 : vector<2x1xf32>
    %748 = vector.broadcast %747 : vector<2x1xf32> to vector<2x16xf32>
    %749 = arith.mulf %748, %97 : vector<2x16xf32>
    %750 = arith.addf %743, %749 : vector<2x16xf32>
    %751 = vector.broadcast %747 : vector<2x1xf32> to vector<2x16xf32>
    %752 = arith.mulf %751, %623 : vector<2x16xf32>
    %753 = arith.addf %746, %752 : vector<2x16xf32>
    %754 = arith.mulf %718, %737 : vector<2x1xf32>
    %755 = vector.broadcast %754 : vector<2x1xf32> to vector<2x16xf32>
    %756 = arith.mulf %755, %136 : vector<2x16xf32>
    %757 = arith.addf %750, %756 : vector<2x16xf32>
    %758 = vector.broadcast %754 : vector<2x1xf32> to vector<2x16xf32>
    %759 = arith.mulf %758, %584 : vector<2x16xf32>
    %760 = arith.addf %753, %759 : vector<2x16xf32>
    %761 = arith.mulf %720, %737 : vector<2x1xf32>
    %762 = vector.broadcast %761 : vector<2x1xf32> to vector<2x16xf32>
    %763 = arith.mulf %762, %175 : vector<2x16xf32>
    %764 = arith.addf %757, %763 : vector<2x16xf32>
    %765 = vector.broadcast %761 : vector<2x1xf32> to vector<2x16xf32>
    %766 = arith.mulf %765, %545 : vector<2x16xf32>
    %767 = arith.addf %760, %766 : vector<2x16xf32>
    %768 = arith.mulf %722, %737 : vector<2x1xf32>
    %769 = vector.broadcast %768 : vector<2x1xf32> to vector<2x16xf32>
    %770 = arith.mulf %769, %214 : vector<2x16xf32>
    %771 = arith.addf %764, %770 : vector<2x16xf32>
    %772 = vector.broadcast %768 : vector<2x1xf32> to vector<2x16xf32>
    %773 = arith.mulf %772, %506 : vector<2x16xf32>
    %774 = arith.addf %767, %773 : vector<2x16xf32>
    %775 = arith.mulf %724, %737 : vector<2x1xf32>
    %776 = vector.broadcast %775 : vector<2x1xf32> to vector<2x16xf32>
    %777 = arith.mulf %776, %253 : vector<2x16xf32>
    %778 = arith.addf %771, %777 : vector<2x16xf32>
    %779 = vector.broadcast %775 : vector<2x1xf32> to vector<2x16xf32>
    %780 = arith.mulf %779, %467 : vector<2x16xf32>
    %781 = arith.addf %774, %780 : vector<2x16xf32>
    %782 = arith.mulf %726, %737 : vector<2x1xf32>
    %783 = vector.broadcast %782 : vector<2x1xf32> to vector<2x16xf32>
    %784 = arith.mulf %783, %292 : vector<2x16xf32>
    %785 = arith.addf %778, %784 : vector<2x16xf32>
    %786 = vector.broadcast %782 : vector<2x1xf32> to vector<2x16xf32>
    %787 = arith.mulf %786, %428 : vector<2x16xf32>
    %788 = arith.addf %781, %787 : vector<2x16xf32>
    %789 = arith.mulf %728, %737 : vector<2x1xf32>
    %790 = vector.broadcast %789 : vector<2x1xf32> to vector<2x16xf32>
    %791 = arith.mulf %790, %331 : vector<2x16xf32>
    %792 = arith.addf %785, %791 : vector<2x16xf32>
    %793 = vector.broadcast %789 : vector<2x1xf32> to vector<2x16xf32>
    %794 = arith.mulf %793, %389 : vector<2x16xf32>
    %795 = arith.addf %788, %794 : vector<2x16xf32>
    %cst_268 = arith.constant 0.000000e+00 : f32
    %796 = vector.broadcast %cst_268 : f32 to vector<40x8xf32>
    %c0_269 = arith.constant 0 : index
    %c0_270 = arith.constant 0 : index
    %797 = vector.load %arg31[%c0_269, %c0_270] : memref<40x8xf32, #tpu.memory_space<vmem>>, vector<40x8xf32>
    tpu.vector_store %arg31[%c0_269, %c0_270], %796 {strides = array<i32>} : memref<40x8xf32, #tpu.memory_space<vmem>>, vector<40x8xf32>,
    %c0_271 = arith.constant 0 : index
    %c0_272 = arith.constant 0 : index
    %798 = vector.load %arg10[%c0_271, %c0_272] : memref<32x4xf32, #tpu.memory_space<vmem>>, vector<32x4xf32>
    %c1_273 = arith.constant 1 : index
    %c0_274 = arith.constant 0 : index
    %c0_275 = arith.constant 0 : index
    %799 = vector.load %arg11[%c1_273, %c0_274, %c0_275] : memref<2x4x8xf32, #tpu.memory_space<vmem>>, vector<1x4x8xf32>
    %800 = vector.shape_cast %799 : vector<1x4x8xf32> to vector<4x8xf32>
    %cst_276 = arith.constant dense<0.000000e+00> : vector<32x8xf32>
    %801 = tpu.matmul %798, %800, %cst_276 {dimension_numbers = #tpu.dot_dimension_numbers<[1], [0], [0], [1], [0, 0, 1, 1], [], []>} : vector<32x4xf32>, vector<4x8xf32>, vector<32x8xf32> -> vector<32x8xf32>
    %c8 = arith.constant 8 : index
    %c0_277 = arith.constant 0 : index
    %802 = vector.load %arg31[%c8, %c0_277] : memref<40x8xf32, #tpu.memory_space<vmem>>, vector<32x4xf32>
    tpu.vector_store %arg31[%c8, %c0_277], %798 {strides = array<i32>} : memref<40x8xf32, #tpu.memory_space<vmem>>, vector<32x4xf32>,
    %c0_278 = arith.constant 0 : index
    %c0_279 = arith.constant 0 : index
    %803 = vector.load %arg31[%c0_278, %c0_279] : memref<40x8xf32, #tpu.memory_space<vmem>>, vector<40x8xf32>
    %804 = vector.extract_strided_slice %803 {offsets = [6, 0], sizes = [32, 4], strides = [1, 1]} : vector<40x8xf32> to vector<32x4xf32>
    %c0_280 = arith.constant 0 : index
    %c0_281 = arith.constant 0 : index
    %c0_282 = arith.constant 0 : index
    %805 = vector.load %arg11[%c0_280, %c0_281, %c0_282] : memref<2x4x8xf32, #tpu.memory_space<vmem>>, vector<1x4x8xf32>
    %806 = vector.shape_cast %805 : vector<1x4x8xf32> to vector<4x8xf32>
    %cst_283 = arith.constant dense<0.000000e+00> : vector<32x8xf32>
    %807 = tpu.matmul %804, %806, %cst_283 {dimension_numbers = #tpu.dot_dimension_numbers<[1], [0], [0], [1], [0, 0, 1, 1], [], []>} : vector<32x4xf32>, vector<4x8xf32>, vector<32x8xf32> -> vector<32x8xf32>
    %808 = arith.addf %801, %807 : vector<32x8xf32>
    %c0_284 = arith.constant 0 : index
    %c0_285 = arith.constant 0 : index
    %809 = vector.load %arg12[%c0_284, %c0_285] : memref<1x8xf32, #tpu.memory_space<vmem>>, vector<1x8xf32>
    %810 = vector.broadcast %809 : vector<1x8xf32> to vector<32x8xf32>
    %811 = arith.addf %808, %810 : vector<32x8xf32>
    %cst_286 = arith.constant 0.000000e+00 : f32
    %812 = vector.broadcast %cst_286 : f32 to vector<32x8xf32>
    %813 = arith.maximumf %811, %812 : vector<32x8xf32>
    %c1_287 = arith.constant 1 : index
    %c0_288 = arith.constant 0 : index
    %c0_289 = arith.constant 0 : index
    %814 = vector.load %arg13[%c1_287, %c0_288, %c0_289] : memref<2x8x8xf32, #tpu.memory_space<vmem>>, vector<1x8x8xf32>
    %815 = vector.shape_cast %814 : vector<1x8x8xf32> to vector<8x8xf32>
    %cst_290 = arith.constant dense<0.000000e+00> : vector<32x8xf32>
    %816 = tpu.matmul %813, %815, %cst_290 {dimension_numbers = #tpu.dot_dimension_numbers<[1], [0], [0], [1], [0, 0, 1, 1], [], []>} : vector<32x8xf32>, vector<8x8xf32>, vector<32x8xf32> -> vector<32x8xf32>
    %c8_291 = arith.constant 8 : index
    %c0_292 = arith.constant 0 : index
    %817 = vector.load %arg31[%c8_291, %c0_292] : memref<40x8xf32, #tpu.memory_space<vmem>>, vector<32x8xf32>
    tpu.vector_store %arg31[%c8_291, %c0_292], %813 {strides = array<i32>} : memref<40x8xf32, #tpu.memory_space<vmem>>, vector<32x8xf32>,
    %c0_293 = arith.constant 0 : index
    %c0_294 = arith.constant 0 : index
    %818 = vector.load %arg31[%c0_293, %c0_294] : memref<40x8xf32, #tpu.memory_space<vmem>>, vector<40x8xf32>
    %819 = vector.extract_strided_slice %818 {offsets = [6, 0], sizes = [32, 8], strides = [1, 1]} : vector<40x8xf32> to vector<32x8xf32>
    %c0_295 = arith.constant 0 : index
    %c0_296 = arith.constant 0 : index
    %c0_297 = arith.constant 0 : index
    %820 = vector.load %arg13[%c0_295, %c0_296, %c0_297] : memref<2x8x8xf32, #tpu.memory_space<vmem>>, vector<1x8x8xf32>
    %821 = vector.shape_cast %820 : vector<1x8x8xf32> to vector<8x8xf32>
    %cst_298 = arith.constant dense<0.000000e+00> : vector<32x8xf32>
    %822 = tpu.matmul %819, %821, %cst_298 {dimension_numbers = #tpu.dot_dimension_numbers<[1], [0], [0], [1], [0, 0, 1, 1], [], []>} : vector<32x8xf32>, vector<8x8xf32>, vector<32x8xf32> -> vector<32x8xf32>
    %823 = arith.addf %816, %822 : vector<32x8xf32>
    %c0_299 = arith.constant 0 : index
    %c0_300 = arith.constant 0 : index
    %824 = vector.load %arg14[%c0_299, %c0_300] : memref<1x8xf32, #tpu.memory_space<vmem>>, vector<1x8xf32>
    %825 = vector.broadcast %824 : vector<1x8xf32> to vector<32x8xf32>
    %826 = arith.addf %823, %825 : vector<32x8xf32>
    %cst_301 = arith.constant 0.000000e+00 : f32
    %827 = vector.broadcast %cst_301 : f32 to vector<32x8xf32>
    %828 = arith.maximumf %826, %827 : vector<32x8xf32>
    %c0_302 = arith.constant 0 : index
    %c0_303 = arith.constant 0 : index
    %829 = vector.load %arg15[%c0_302, %c0_303] : memref<4x8xf32, #tpu.memory_space<vmem>>, vector<4x8xf32>
    %cst_304 = arith.constant dense<0.000000e+00> : vector<32x8xf32>
    %830 = tpu.matmul %798, %829, %cst_304 {dimension_numbers = #tpu.dot_dimension_numbers<[1], [0], [0], [1], [0, 0, 1, 1], [], []>} : vector<32x4xf32>, vector<4x8xf32>, vector<32x8xf32> -> vector<32x8xf32>
    %c0_305 = arith.constant 0 : index
    %c0_306 = arith.constant 0 : index
    %831 = vector.load %arg16[%c0_305, %c0_306] : memref<1x8xf32, #tpu.memory_space<vmem>>, vector<1x8xf32>
    %832 = vector.broadcast %831 : vector<1x8xf32> to vector<32x8xf32>
    %833 = arith.addf %830, %832 : vector<32x8xf32>
    %834 = arith.addf %828, %833 : vector<32x8xf32>
    %cst_307 = arith.constant 0.000000e+00 : f32
    %835 = vector.broadcast %cst_307 : f32 to vector<32x8xf32>
    %836 = arith.maximumf %834, %835 : vector<32x8xf32>
    %c1_308 = arith.constant 1 : index
    %c0_309 = arith.constant 0 : index
    %c0_310 = arith.constant 0 : index
    %837 = vector.load %arg17[%c1_308, %c0_309, %c0_310] : memref<2x8x8xf32, #tpu.memory_space<vmem>>, vector<1x8x8xf32>
    %838 = vector.shape_cast %837 : vector<1x8x8xf32> to vector<8x8xf32>
    %cst_311 = arith.constant dense<0.000000e+00> : vector<32x8xf32>
    %839 = tpu.matmul %836, %838, %cst_311 {dimension_numbers = #tpu.dot_dimension_numbers<[1], [0], [0], [1], [0, 0, 1, 1], [], []>} : vector<32x8xf32>, vector<8x8xf32>, vector<32x8xf32> -> vector<32x8xf32>
    %c8_312 = arith.constant 8 : index
    %c0_313 = arith.constant 0 : index
    %840 = vector.load %arg31[%c8_312, %c0_313] : memref<40x8xf32, #tpu.memory_space<vmem>>, vector<32x8xf32>
    tpu.vector_store %arg31[%c8_312, %c0_313], %836 {strides = array<i32>} : memref<40x8xf32, #tpu.memory_space<vmem>>, vector<32x8xf32>,
    %c0_314 = arith.constant 0 : index
    %c0_315 = arith.constant 0 : index
    %841 = vector.load %arg31[%c0_314, %c0_315] : memref<40x8xf32, #tpu.memory_space<vmem>>, vector<40x8xf32>
    %842 = vector.extract_strided_slice %841 {offsets = [4, 0], sizes = [32, 8], strides = [1, 1]} : vector<40x8xf32> to vector<32x8xf32>
    %c0_316 = arith.constant 0 : index
    %c0_317 = arith.constant 0 : index
    %c0_318 = arith.constant 0 : index
    %843 = vector.load %arg17[%c0_316, %c0_317, %c0_318] : memref<2x8x8xf32, #tpu.memory_space<vmem>>, vector<1x8x8xf32>
    %844 = vector.shape_cast %843 : vector<1x8x8xf32> to vector<8x8xf32>
    %cst_319 = arith.constant dense<0.000000e+00> : vector<32x8xf32>
    %845 = tpu.matmul %842, %844, %cst_319 {dimension_numbers = #tpu.dot_dimension_numbers<[1], [0], [0], [1], [0, 0, 1, 1], [], []>} : vector<32x8xf32>, vector<8x8xf32>, vector<32x8xf32> -> vector<32x8xf32>
    %846 = arith.addf %839, %845 : vector<32x8xf32>
    %c0_320 = arith.constant 0 : index
    %c0_321 = arith.constant 0 : index
    %847 = vector.load %arg18[%c0_320, %c0_321] : memref<1x8xf32, #tpu.memory_space<vmem>>, vector<1x8xf32>
    %848 = vector.broadcast %847 : vector<1x8xf32> to vector<32x8xf32>
    %849 = arith.addf %846, %848 : vector<32x8xf32>
    %cst_322 = arith.constant 0.000000e+00 : f32
    %850 = vector.broadcast %cst_322 : f32 to vector<32x8xf32>
    %851 = arith.maximumf %849, %850 : vector<32x8xf32>
    %c1_323 = arith.constant 1 : index
    %c0_324 = arith.constant 0 : index
    %c0_325 = arith.constant 0 : index
    %852 = vector.load %arg19[%c1_323, %c0_324, %c0_325] : memref<2x8x8xf32, #tpu.memory_space<vmem>>, vector<1x8x8xf32>
    %853 = vector.shape_cast %852 : vector<1x8x8xf32> to vector<8x8xf32>
    %cst_326 = arith.constant dense<0.000000e+00> : vector<32x8xf32>
    %854 = tpu.matmul %851, %853, %cst_326 {dimension_numbers = #tpu.dot_dimension_numbers<[1], [0], [0], [1], [0, 0, 1, 1], [], []>} : vector<32x8xf32>, vector<8x8xf32>, vector<32x8xf32> -> vector<32x8xf32>
    %c8_327 = arith.constant 8 : index
    %c0_328 = arith.constant 0 : index
    %855 = vector.load %arg31[%c8_327, %c0_328] : memref<40x8xf32, #tpu.memory_space<vmem>>, vector<32x8xf32>
    tpu.vector_store %arg31[%c8_327, %c0_328], %851 {strides = array<i32>} : memref<40x8xf32, #tpu.memory_space<vmem>>, vector<32x8xf32>,
    %c0_329 = arith.constant 0 : index
    %c0_330 = arith.constant 0 : index
    %856 = vector.load %arg31[%c0_329, %c0_330] : memref<40x8xf32, #tpu.memory_space<vmem>>, vector<40x8xf32>
    %857 = vector.extract_strided_slice %856 {offsets = [4, 0], sizes = [32, 8], strides = [1, 1]} : vector<40x8xf32> to vector<32x8xf32>
    %c0_331 = arith.constant 0 : index
    %c0_332 = arith.constant 0 : index
    %c0_333 = arith.constant 0 : index
    %858 = vector.load %arg19[%c0_331, %c0_332, %c0_333] : memref<2x8x8xf32, #tpu.memory_space<vmem>>, vector<1x8x8xf32>
    %859 = vector.shape_cast %858 : vector<1x8x8xf32> to vector<8x8xf32>
    %cst_334 = arith.constant dense<0.000000e+00> : vector<32x8xf32>
    %860 = tpu.matmul %857, %859, %cst_334 {dimension_numbers = #tpu.dot_dimension_numbers<[1], [0], [0], [1], [0, 0, 1, 1], [], []>} : vector<32x8xf32>, vector<8x8xf32>, vector<32x8xf32> -> vector<32x8xf32>
    %861 = arith.addf %854, %860 : vector<32x8xf32>
    %c0_335 = arith.constant 0 : index
    %c0_336 = arith.constant 0 : index
    %862 = vector.load %arg20[%c0_335, %c0_336] : memref<1x8xf32, #tpu.memory_space<vmem>>, vector<1x8xf32>
    %863 = vector.broadcast %862 : vector<1x8xf32> to vector<32x8xf32>
    %864 = arith.addf %861, %863 : vector<32x8xf32>
    %cst_337 = arith.constant 0.000000e+00 : f32
    %865 = vector.broadcast %cst_337 : f32 to vector<32x8xf32>
    %866 = arith.maximumf %864, %865 : vector<32x8xf32>
    %867 = arith.addf %866, %836 : vector<32x8xf32>
    %cst_338 = arith.constant 0.000000e+00 : f32
    %868 = vector.broadcast %cst_338 : f32 to vector<32x8xf32>
    %869 = arith.maximumf %867, %868 : vector<32x8xf32>
    %c0_339 = arith.constant 0 : index
    %c0_340 = arith.constant 0 : index
    %870 = vector.load %arg21[%c0_339, %c0_340] : memref<2x32xf32, #tpu.memory_space<vmem>>, vector<2x32xf32>
    %cst_341 = arith.constant dense<0.000000e+00> : vector<2x8xf32>
    %871 = tpu.matmul %870, %869, %cst_341 {dimension_numbers = #tpu.dot_dimension_numbers<[1], [0], [0], [1], [0, 0, 1, 1], [], []>} : vector<2x32xf32>, vector<32x8xf32>, vector<2x8xf32> -> vector<2x8xf32>
    %c0_342 = arith.constant 0 : index
    %c0_343 = arith.constant 0 : index
    %872 = vector.load %arg22[%c0_342, %c0_343] : memref<8x64xf32, #tpu.memory_space<vmem>>, vector<8x64xf32>
    %cst_344 = arith.constant dense<0.000000e+00> : vector<2x64xf32>
    %873 = tpu.matmul %871, %872, %cst_344 {dimension_numbers = #tpu.dot_dimension_numbers<[1], [0], [0], [1], [0, 0, 1, 1], [], []>} : vector<2x8xf32>, vector<8x64xf32>, vector<2x64xf32> -> vector<2x64xf32>
    %c0_345 = arith.constant 0 : index
    %c0_346 = arith.constant 0 : index
    %874 = vector.load %arg23[%c0_345, %c0_346] : memref<1x64xf32, #tpu.memory_space<vmem>>, vector<1x64xf32>
    %875 = vector.broadcast %874 : vector<1x64xf32> to vector<2x64xf32>
    %876 = arith.addf %873, %875 : vector<2x64xf32>
    %cst_347 = arith.constant 0.000000e+00 : f32
    %877 = vector.broadcast %cst_347 : f32 to vector<2x64xf32>
    %878 = arith.maximumf %876, %877 : vector<2x64xf32>
    %c0_348 = arith.constant 0 : index
    %c0_349 = arith.constant 0 : index
    %879 = vector.load %arg24[%c0_348, %c0_349] : memref<16x32xf32, #tpu.memory_space<vmem>>, vector<16x32xf32>
    %cst_350 = arith.constant dense<0.000000e+00> : vector<2x32xf32>
    %880 = tpu.matmul %792, %879, %cst_350 {dimension_numbers = #tpu.dot_dimension_numbers<[1], [0], [0], [1], [0, 0, 1, 1], [], []>} : vector<2x16xf32>, vector<16x32xf32>, vector<2x32xf32> -> vector<2x32xf32>
    %c0_351 = arith.constant 0 : index
    %c0_352 = arith.constant 0 : index
    %881 = vector.load %arg25[%c0_351, %c0_352] : memref<16x32xf32, #tpu.memory_space<vmem>>, vector<16x32xf32>
    %cst_353 = arith.constant dense<0.000000e+00> : vector<2x32xf32>
    %882 = tpu.matmul %795, %881, %cst_353 {dimension_numbers = #tpu.dot_dimension_numbers<[1], [0], [0], [1], [0, 0, 1, 1], [], []>} : vector<2x16xf32>, vector<16x32xf32>, vector<2x32xf32> -> vector<2x32xf32>
    %883 = arith.addf %880, %882 : vector<2x32xf32>
    %c0_354 = arith.constant 0 : index
    %c0_355 = arith.constant 0 : index
    %884 = vector.load %arg26[%c0_354, %c0_355] : memref<64x32xf32, #tpu.memory_space<vmem>>, vector<64x32xf32>
    %cst_356 = arith.constant dense<0.000000e+00> : vector<2x32xf32>
    %885 = tpu.matmul %878, %884, %cst_356 {dimension_numbers = #tpu.dot_dimension_numbers<[1], [0], [0], [1], [0, 0, 1, 1], [], []>} : vector<2x64xf32>, vector<64x32xf32>, vector<2x32xf32> -> vector<2x32xf32>
    %886 = arith.addf %883, %885 : vector<2x32xf32>
    %c0_357 = arith.constant 0 : index
    %c0_358 = arith.constant 0 : index
    %887 = vector.load %arg27[%c0_357, %c0_358] : memref<1x32xf32, #tpu.memory_space<vmem>>, vector<1x32xf32>
    %888 = vector.broadcast %887 : vector<1x32xf32> to vector<2x32xf32>
    %889 = arith.addf %886, %888 : vector<2x32xf32>
    %cst_359 = arith.constant 0.000000e+00 : f32
    %890 = vector.broadcast %cst_359 : f32 to vector<2x32xf32>
    %891 = arith.maximumf %889, %890 : vector<2x32xf32>
    %c0_360 = arith.constant 0 : index
    %c0_361 = arith.constant 0 : index
    %892 = vector.load %arg28[%c0_360, %c0_361] : memref<32x1xf32, #tpu.memory_space<vmem>>, vector<32x1xf32>
    %cst_362 = arith.constant dense<0.000000e+00> : vector<2x1xf32>
    %893 = tpu.matmul %891, %892, %cst_362 {dimension_numbers = #tpu.dot_dimension_numbers<[1], [0], [0], [1], [0, 0, 1, 1], [], []>} : vector<2x32xf32>, vector<32x1xf32>, vector<2x1xf32> -> vector<2x1xf32>
    %c0_363 = arith.constant 0 : index
    %c0_364 = arith.constant 0 : index
    %894 = vector.load %arg29[%c0_363, %c0_364] : memref<1x1xf32, #tpu.memory_space<vmem>>, vector<1x1xf32>
    %895 = vector.broadcast %894 : vector<1x1xf32> to vector<2x1xf32>
    %896 = arith.addf %893, %895 : vector<2x1xf32>
    %c0_365 = arith.constant 0 : index
    %c0_366 = arith.constant 0 : index
    %897 = vector.load %arg30[%c0_365, %c0_366] : memref<2x1xf32, #tpu.memory_space<vmem>>, vector<2x1xf32>
    tpu.vector_store %arg30[%c0_365, %c0_366], %896 {strides = array<i32>} : memref<2x1xf32, #tpu.memory_space<vmem>>, vector<2x1xf32>,
    return
  }
}

</mosaic_0001>

<bundles_post_ra>
// kernel: forward.1
= control target key start
LH: loop header
LB: loop body
LE: loop exit
PB: predicated region body
PF: predicated region fallthrough
CT: control target
= control target key end

     0   :  { %s5669_s6 = smov 1   ;;  %s5670_s10 = smov 2   ;;  %s6909_s0 = inlined_call_operand.smem [shape: u32[31], index: -1, kind: input, shape index: {}] }
   0x1   :  { %s5736_s5 = sld [smem:[%s6909_s0]]   ;;  %s5671_s14 = smov 3  }
   0x2   :  { %s5741_s9 = sld [smem:[%s6909_s0 + %s5669_s6]]   ;;  %s5672_s18 = smov 4  }
   0x3   :  { %s5746_s13 = sld [smem:[%s6909_s0 + %s5670_s10]]   ;;  %s5673_s22 = smov 5  }
   0x4   :  { %s5751_s17 = sld [smem:[%s6909_s0 + %s5671_s14]]   ;;  %s5674_s26 = smov 6  }
   0x5   :  { %s5756_s21 = sld [smem:[%s6909_s0 + %s5672_s18]]   ;;  %s5675_s30 = smov 7  }
   0x6   :  { %s5761_s25 = sld [smem:[%s6909_s0 + %s5673_s22]]   ;;  %s5676_s4 = smov 8  }
   0x7   :  { %6920 = sst [smem:[#allocation43_spill]] %s5736_s5  ;;  %s5677_s10 = smov 9  }
   0x8   :  { %s5766_s29 = sld [smem:[%s6909_s0 + %s5674_s26]]   ;;  %s5678_s15 = smov 10  }
   0x9   :  { %6921 = sst [smem:[#allocation44_spill]] %s5746_s13  ;;  %s5679_s20 = smov 11  }
   0xa   :  { %s5771_s3 = sld [smem:[%s6909_s0 + %s5675_s30]]   ;;  %s5680_s26 = smov 12  }
   0xb   :  { %s5776_s8 = sld [smem:[%s6909_s0 + %s5676_s4]]   ;;  %s5681_s1 = smov 13  }
   0xc   :  { %6922 = sst [smem:[#allocation45_spill]] %s5761_s25  ;;  %s5682_s7 = smov 14  }
   0xd   :  { %s4697_s14 = sld [smem:[%s6909_s0 + %s5677_s10]]   ;;  %s5684_s22 = smov 16  }
   0xe   :  { %s5784_s19 = sld [smem:[%s6909_s0 + %s5678_s15]]   ;;  %s5683_s15 = smov 15  }
   0xf   :  { %s5789_s24 = sld [smem:[%s6909_s0 + %s5679_s20]]   ;;  %s5685_s28 = smov 17  }
  0x10   :  { %s5794_s30 = sld [smem:[%s6909_s0 + %s5680_s26]]  }
  0x11   :  { %s5799_s6 = sld [smem:[%s6909_s0 + %s5681_s1]]  }
  0x12   :  { %s5804_s12 = sld [smem:[%s6909_s0 + %s5682_s7]]   ;;  %s5686_s7 = smov 18  }
  0x13   :  { %s5809_s20 = sld [smem:[%s6909_s0 + %s5683_s15]]   ;;  %v66_v0 = vstv %s4697_s14  ;;  %s5687_s14 = smov 19  }
  0x14   :  { %6923 = sst [smem:[#allocation46_spill]] %s5784_s19  ;;  %67 = vst [vmem:[#allocation3] sm:$0x1] %v66_v0  ;;  %s5692_s19 = smov 24  }
  0x15   :  { %s5814_s27 = sld [smem:[%s6909_s0 + %s5684_s22]]   ;;  %s5688_s22 = smov 20  }
  0x16   :  { %s5819_s4 = sld [smem:[%s6909_s0 + %s5685_s28]]   ;;  %s5689_s28 = smov 21  }
  0x17   :  { %s5824_s15 = sld [smem:[%s6909_s0 + %s5686_s7]]   ;;  %s5690_s7 = smov 22  }
  0x18   :  { %s5829_s23 = sld [smem:[%s6909_s0 + %s5687_s14]]   ;;  %s5691_s14 = smov 23  }
  0x19   :  { %s5834_s25 = sld [smem:[%s6909_s0 + %s5688_s22]]  }
  0x1a   :  { %s5839_s5 = sld [smem:[%s6909_s0 + %s5689_s28]]   ;;  %s5693_s28 = smov 25  }
  0x1b   :  { %s5844_s13 = sld [smem:[%s6909_s0 + %s5690_s7]]   ;;  %s5694_s7 = smov 26  }
  0x1c   :  { %6924 = sst [smem:[#allocation47_spill]] %s5819_s4 }
  0x1d   :  { %s5854_s4 = sld [smem:[%s6909_s0 + %s5692_s19]]   ;;  %s5696_s19 = smov 28  }
  0x1e   :  { %6925 = sst [smem:[#allocation48_spill]] %s5829_s23 }
  0x1f   :  { %s5849_s23 = sld [smem:[%s6909_s0 + %s5691_s14]]   ;;  %s5695_s14 = smov 27  }
  0x20   :  { %6926 = sst [smem:[#allocation49_spill]] %s5839_s5 }
  0x21   :  { %6927 = sst [smem:[#allocation50_spill]] %s5844_s13 }
  0x22   :  { %s5859_s5 = sld [smem:[%s6909_s0 + %s5693_s28]]   ;;  %s5697_s28 = smov 30  }
  0x23   :  { %6929 = sst [smem:[#allocation52_spill]] %s5854_s4 }
  0x24   :  { %s5864_s13 = sld [smem:[%s6909_s0 + %s5694_s7]]   ;;  %s5698_s7 = smov 29  }
  0x25   :  { %6928 = sst [smem:[#allocation51_spill]] %s5849_s23 }
  0x26   :  { %s5869_s23 = sld [smem:[%s6909_s0 + %s5695_s14]]  }
  0x27   :  { %s5874_s4 = sld [smem:[%s6909_s0 + %s5696_s19]]  }
  0x28   :  { %6930 = sst [smem:[#allocation53_spill]] %s5859_s5 }
  0x29   :  { %s5879_s5 = sld [smem:[%s6909_s0 + %s5697_s28]]  }
  0x2a   :  { %6931 = sst [smem:[#allocation54_spill]] %s5864_s13 }
  0x2b   :  { %s4717_s13 = sld [smem:[%s6909_s0 + %s5698_s7]]  }
  0x31   :  { %v68_v1 = vstv %s4717_s13 }
  0x32   :  { %69 = vst [vmem:[#allocation4] sm:$0x1] %v68_v1 }
  0x33   :  { %70 = vsyncpa [#allocation6], 0 }
  0x34   :  { %71 = vsyncpa [#allocation8], 0 }
  0x35   :  { %72 = vsyncpa [#allocation11], 0 }
  0x36   :  { %73 = vsyncpa [#allocation14], 0 }
  0x37   :  { %74 = vsyncpa [#allocation17], 0 }
  0x38   :  { %75 = vsyncpa [#allocation20], 0 }
  0x39   :  { %76 = vsyncpa [#allocation23], 0 }
  0x3a   :  { %77 = vsyncpa [#allocation26], 0 }
  0x3b   :  { %78 = vsyncpa [#allocation29], 0  ;;  %s102_s14 = sshll.u32 %s5751_s17, 4  ;;  %s103_s14 = int_to_ptr.hbm [resolvable:$true] %s102_s14 }
  0x3c   :  { %79 = vsyncpa [#allocation32], 0  ;;  %s5699_s16 = smov [#allocation7]   ;;  %s128_s13 = sshll.u32 %s5766_s29, 4  ;;  %s129_s13 = int_to_ptr.hbm [resolvable:$true] %s128_s13 }
  0x3d   :  { %s104_s0 = sshll.u32 %s5699_s16, 4  ;;  %s5217_s18 = sshra.s32 %s103_s14, 4  ;;  %s105_s0 = int_to_ptr.vmem [resolvable:$true] %s104_s0  ;;  %s5218_s18 = int_to_ptr.hbm [resolvable:$true] %s5217_s18 }
  0x3e   :  { %s5219_s19 = scalar_lea.hbm %s5218_s18, 1  ;;  %s5221_s22 = scalar_lea.hbm %s5751_s17, 1 }
  0x3f   :  { %p5220_p0 = scmp.ne.s32.totalorder %s5218_s18, %s5219_s19  ;;  %p5222_p1 = scmp.lt.s32.totalorder %s5218_s18, %s5751_s17 }
  0x40   :  { %p5223_p2 = scmp.lt.s32.totalorder %s5221_s22, %s5219_s19 }
  0x42   :  { %p5224_p3 = por %p5223_p2, %p5222_p1 }
  0x44   :  { %p5225_p4 = pnand %p5224_p3, %p5220_p0 }
  0x46   :  { %5228 = shalt.err (!%p5225_p4)
}
  0x47   :  { %107 = dma.hbm_to_vmem [thread:$0]  %s103_s14, 16, %s105_s0, [#allocation8]  }
  0x48   :  { %s5700_s26 = smov [#allocation10]   ;;  %s5241_s1 = sshra.s32 %s129_s13, 4  ;;  %s5242_s1 = int_to_ptr.hbm [resolvable:$true] %s5241_s1 }
  0x49   :  { %s130_s28 = sshll.u32 %s5700_s26, 4  ;;  %s5243_s2 = scalar_lea.hbm %s5242_s1, 1  ;;  %s131_s28 = int_to_ptr.vmem [resolvable:$true] %s130_s28 }
  0x4a   :  { %p5244_p5 = scmp.ne.s32.totalorder %s5242_s1, %s5243_s2  ;;  %s5245_s7 = scalar_lea.hbm %s5766_s29, 1 }
  0x4b   :  { %p5246_p6 = scmp.lt.s32.totalorder %s5242_s1, %s5766_s29  ;;  %p5247_p7 = scmp.lt.s32.totalorder %s5245_s7, %s5243_s2 }
  0x4d   :  { %p5248_p8 = por %p5247_p7, %p5246_p6 }
  0x4f   :  { %p5249_p9 = pnand %p5248_p8, %p5244_p5 }
  0x51   :  { %5252 = shalt.err (!%p5249_p9)
}
  0x52   :  { %133 = dma.hbm_to_vmem [thread:$0]  %s129_s13, 16, %s131_s28, [#allocation11]  }
  0x53   :  { %s151_s17 = sshll.u32 %s5776_s8, 4  ;;  %s5701_s10 = smov [#allocation13]   ;;  %s152_s17 = int_to_ptr.hbm [resolvable:$true] %s151_s17 }
  0x54   :  { %s153_s11 = sshll.u32 %s5701_s10, 4  ;;  %s182_s14 = sshll.u32 %s5794_s30, 4  ;;  %s154_s11 = int_to_ptr.vmem [resolvable:$true] %s153_s11  ;;  %s183_s14 = int_to_ptr.hbm [resolvable:$true] %s182_s14 }
  0x55   :  { %s5265_s16 = sshra.s32 %s152_s17, 4  ;;  %s5269_s29 = scalar_lea.hbm %s5776_s8, 16  ;;  %s5266_s16 = int_to_ptr.hbm [resolvable:$true] %s5265_s16 }
  0x56   :  { %s5267_s0 = scalar_lea.hbm %s5266_s16, 16  ;;  %p5270_p11 = scmp.lt.s32.totalorder %s5266_s16, %s5776_s8 }
  0x57   :  { %p5268_p10 = scmp.ne.s32.totalorder %s5266_s16, %s5267_s0  ;;  %p5271_p12 = scmp.lt.s32.totalorder %s5269_s29, %s5267_s0 }
  0x59   :  { %p5272_p13 = por %p5271_p12, %p5270_p11 }
  0x5b   :  { %p5273_p0 = pnand %p5272_p13, %p5268_p10 }
  0x5d   :  { %5276 = shalt.err (!%p5273_p0)
}
  0x5e   :  { %s5702_s13 = smov 128   ;;  %s5703_s18 = smov 8  }
  0x5f   :  { %159 = dma.hbm_to_vmem [thread:$0]  %s152_s17, 256, %s154_s11, [#allocation14], %s5702_s13, %s5702_s13, %s5703_s18  }
  0x60   :  { %s5704_s19 = smov [#allocation16]   ;;  %s206_s26 = sshll.u32 %s5804_s12, 4  ;;  %s207_s26 = int_to_ptr.hbm [resolvable:$true] %s206_s26 }
  0x61   :  { %s184_s22 = sshll.u32 %s5704_s19, 4  ;;  %s5289_s8 = sshra.s32 %s183_s14, 4  ;;  %s185_s22 = int_to_ptr.vmem [resolvable:$true] %s184_s22  ;;  %s5290_s8 = int_to_ptr.hbm [resolvable:$true] %s5289_s8 }
  0x62   :  { %s5291_s28 = scalar_lea.hbm %s5290_s8, 1  ;;  %s5293_s1 = scalar_lea.hbm %s5794_s30, 1 }
  0x63   :  { %p5292_p1 = scmp.ne.s32.totalorder %s5290_s8, %s5291_s28  ;;  %p5294_p2 = scmp.lt.s32.totalorder %s5290_s8, %s5794_s30 }
  0x64   :  { %p5295_p3 = scmp.lt.s32.totalorder %s5293_s1, %s5291_s28 }
  0x66   :  { %p5296_p4 = por %p5295_p3, %p5294_p2 }
  0x68   :  { %p5297_p5 = pnand %p5296_p4, %p5292_p1 }
  0x6a   :  { %5300 = shalt.err (!%p5297_p5)
}
  0x6b   :  { %187 = dma.hbm_to_vmem [thread:$0]  %s183_s14, 16, %s185_s22, [#allocation17]  }
  0x6c   :  { %s228_s2 = sshll.u32 %s5814_s27, 4  ;;  %s5705_s7 = smov [#allocation19]   ;;  %s229_s2 = int_to_ptr.hbm [resolvable:$true] %s228_s2 }
  0x6d   :  { %s208_s17 = sshll.u32 %s5705_s7, 4  ;;  %s5313_s10 = sshra.s32 %s207_s26, 4  ;;  %s209_s17 = int_to_ptr.vmem [resolvable:$true] %s208_s17  ;;  %s5314_s10 = int_to_ptr.hbm [resolvable:$true] %s5313_s10 }
  0x6e   :  { %s5315_s11 = scalar_lea.hbm %s5314_s10, 1  ;;  %s5317_s16 = scalar_lea.hbm %s5804_s12, 1 }
  0x6f   :  { %p5316_p6 = scmp.ne.s32.totalorder %s5314_s10, %s5315_s11  ;;  %p5318_p7 = scmp.lt.s32.totalorder %s5314_s10, %s5804_s12 }
  0x70   :  { %p5319_p8 = scmp.lt.s32.totalorder %s5317_s16, %s5315_s11 }
  0x72   :  { %p5320_p9 = por %p5319_p8, %p5318_p7 }
  0x74   :  { %p5321_p10 = pnand %p5320_p9, %p5316_p6 }
  0x76   :  { %5324 = shalt.err (!%p5321_p10)
}
  0x77   :  { %211 = dma.hbm_to_vmem [thread:$0]  %s207_s26, 16, %s209_s17, [#allocation20]  }
  0x78   :  { %s5706_s30 = smov [#allocation22]   ;;  %s252_s0 = sshll.u32 %s5824_s15, 4  ;;  %s253_s0 = int_to_ptr.hbm [resolvable:$true] %s252_s0 }
  0x79   :  { %s230_s14 = sshll.u32 %s5706_s30, 4  ;;  %s5337_s29 = sshra.s32 %s229_s2, 4  ;;  %s231_s14 = int_to_ptr.vmem [resolvable:$true] %s230_s14  ;;  %s5338_s29 = int_to_ptr.hbm [resolvable:$true] %s5337_s29 }
  0x7a   :  { %s5339_s19 = scalar_lea.hbm %s5338_s29, 1  ;;  %s5341_s22 = scalar_lea.hbm %s5814_s27, 1 }
  0x7b   :  { %p5340_p11 = scmp.ne.s32.totalorder %s5338_s29, %s5339_s19  ;;  %p5342_p12 = scmp.lt.s32.totalorder %s5338_s29, %s5814_s27 }
  0x7c   :  { %p5343_p13 = scmp.lt.s32.totalorder %s5341_s22, %s5339_s19 }
  0x7e   :  { %p5344_p0 = por %p5343_p13, %p5342_p12 }
  0x80   :  { %p5345_p1 = pnand %p5344_p0, %p5340_p11 }
  0x82   :  { %5348 = shalt.err (!%p5345_p1)
}
  0x83   :  { %233 = dma.hbm_to_vmem [thread:$0]  %s229_s2, 16, %s231_s14, [#allocation23]  }
  0x84   :  { %s276_s12 = sshll.u32 %s5834_s25, 4  ;;  %s5707_s26 = smov [#allocation25]   ;;  %s277_s12 = int_to_ptr.hbm [resolvable:$true] %s276_s12 }
  0x85   :  { %s254_s8 = sshll.u32 %s5707_s26, 4  ;;  %s5361_s28 = sshra.s32 %s253_s0, 4  ;;  %s255_s8 = int_to_ptr.vmem [resolvable:$true] %s254_s8  ;;  %s5362_s28 = int_to_ptr.hbm [resolvable:$true] %s5361_s28 }
  0x86   :  { %s5363_s1 = scalar_lea.hbm %s5362_s28, 1  ;;  %s5365_s7 = scalar_lea.hbm %s5824_s15, 1 }
  0x87   :  { %p5364_p2 = scmp.ne.s32.totalorder %s5362_s28, %s5363_s1  ;;  %p5366_p3 = scmp.lt.s32.totalorder %s5362_s28, %s5824_s15 }
  0x88   :  { %p5367_p4 = scmp.lt.s32.totalorder %s5365_s7, %s5363_s1 }
  0x8a   :  { %p5368_p5 = por %p5367_p4, %p5366_p3 }
  0x8c   :  { %p5369_p6 = pnand %p5368_p5, %p5364_p2 }
  0x8e   :  { %5372 = shalt.err (!%p5369_p6)
}
  0x8f   :  { %257 = dma.hbm_to_vmem [thread:$0]  %s253_s0, 16, %s255_s8, [#allocation26]  }
  0x90   :  { %s5708_s27 = smov [#allocation28]   ;;  %s86_s17 = sshll.u32 %s5741_s9, 4  ;;  %s5910_s17 = int_to_ptr.hbm [resolvable:$true] %s86_s17 }
  0x91   :  { %s278_s2 = sshll.u32 %s5708_s27, 4  ;;  %s5385_s10 = sshra.s32 %s277_s12, 4  ;;  %s279_s2 = int_to_ptr.vmem [resolvable:$true] %s278_s2  ;;  %s5386_s10 = int_to_ptr.hbm [resolvable:$true] %s5385_s10 }
  0x92   :  { %s5387_s11 = scalar_lea.hbm %s5386_s10, 1  ;;  %s5389_s16 = scalar_lea.hbm %s5834_s25, 1 }
  0x93   :  { %p5388_p7 = scmp.ne.s32.totalorder %s5386_s10, %s5387_s11  ;;  %p5390_p8 = scmp.lt.s32.totalorder %s5386_s10, %s5834_s25 }
  0x94   :  { %p5391_p9 = scmp.lt.s32.totalorder %s5389_s16, %s5387_s11 }
  0x96   :  { %p5392_p10 = por %p5391_p9, %p5390_p8 }
  0x98   :  { %p5393_p11 = pnand %p5392_p10, %p5388_p7 }
  0x9a   :  { %5396 = shalt.err (!%p5393_p11)
}
  0x9b   :  { %281 = dma.hbm_to_vmem [thread:$0]  %s277_s12, 16, %s279_s2, [#allocation29]  }
  0x9c   :  { %s112_s15 = sshll.u32 %s5756_s21, 4  ;;  %s5709_s30 = smov [#allocation5]   ;;  %s5915_s15 = int_to_ptr.hbm [resolvable:$true] %s112_s15 }
  0x9d   :  { %s88_s14 = sshll.u32 %s5709_s30, 4  ;;  %s5409_s0 = sshra.s32 %s5910_s17, 4  ;;  %s89_s14 = int_to_ptr.vmem [resolvable:$true] %s88_s14  ;;  %s5410_s0 = int_to_ptr.hbm [resolvable:$true] %s5409_s0 }
  0x9e   :  { %s5411_s29 = scalar_lea.hbm %s5410_s0, 32  ;;  %s5413_s25 = scalar_lea.hbm %s5741_s9, 32 }
  0x9f   :  { %p5412_p12 = scmp.ne.s32.totalorder %s5410_s0, %s5411_s29  ;;  %p5414_p13 = scmp.lt.s32.totalorder %s5410_s0, %s5741_s9 }
  0xa0   :  { %p5415_p0 = scmp.lt.s32.totalorder %s5413_s25, %s5411_s29 }
  0xa2   :  { %p5416_p1 = por %p5415_p0, %p5414_p13 }
  0xa4   :  { %p5417_p2 = pnand %p5416_p1, %p5412_p12 }
  0xa6   :  { %5420 = shalt.err (!%p5417_p2)
}
  0xa7   :  { %94 = dma.hbm_to_vmem [thread:$0]  %s5910_s17, 512, %s89_s14, [#allocation6], %s5702_s13, %s5702_s13, %s5703_s18  }
  0xa8   :  { %s5710_s19 = smov [#allocation9]   ;;  %s138_s12 = sshll.u32 %s5771_s3, 4  ;;  %s5925_s12 = int_to_ptr.hbm [resolvable:$true] %s138_s12 }
  0xa9   :  { %s114_s22 = sshll.u32 %s5710_s19, 4  ;;  %s5433_s9 = sshra.s32 %s5915_s15, 4  ;;  %s115_s22 = int_to_ptr.vmem [resolvable:$true] %s114_s22  ;;  %s5434_s9 = int_to_ptr.hbm [resolvable:$true] %s5433_s9 }
  0xaa   :  { %s5435_s26 = scalar_lea.hbm %s5434_s9, 32  ;;  %s5437_s8 = scalar_lea.hbm %s5756_s21, 32 }
  0xab   :  { %p5436_p3 = scmp.ne.s32.totalorder %s5434_s9, %s5435_s26  ;;  %p5438_p4 = scmp.lt.s32.totalorder %s5434_s9, %s5756_s21 }
  0xac   :  { %p5439_p5 = scmp.lt.s32.totalorder %s5437_s8, %s5435_s26 }
  0xae   :  { %p5440_p6 = por %p5439_p5, %p5438_p4 }
  0xb0   :  { %p5441_p7 = pnand %p5440_p6, %p5436_p3 }
  0xb2   :  { %5444 = shalt.err (!%p5441_p7)
}
  0xb3   :  { %120 = dma.hbm_to_vmem [thread:$0]  %s5915_s15, 512, %s115_s22, [#allocation8], %s5702_s13, %s5702_s13, %s5703_s18  }
  0xb4   :  { %s168_s28 = sshll.u32 %s5789_s24, 4  ;;  %s5711_s1 = smov [#allocation12]   ;;  %s5935_s28 = int_to_ptr.hbm [resolvable:$true] %s168_s28 }
  0xb5   :  { %s140_s7 = sshll.u32 %s5711_s1, 4  ;;  %s5457_s21 = sshra.s32 %s5925_s12, 4  ;;  %s141_s7 = int_to_ptr.vmem [resolvable:$true] %s140_s7  ;;  %s5458_s21 = int_to_ptr.hbm [resolvable:$true] %s5457_s21 }
  0xb6   :  { %s5459_s27 = scalar_lea.hbm %s5458_s21, 16  ;;  %s5461_s2 = scalar_lea.hbm %s5771_s3, 16 }
  0xb7   :  { %p5460_p8 = scmp.ne.s32.totalorder %s5458_s21, %s5459_s27  ;;  %p5462_p9 = scmp.lt.s32.totalorder %s5458_s21, %s5771_s3 }
  0xb8   :  { %p5463_p10 = scmp.lt.s32.totalorder %s5461_s2, %s5459_s27 }
  0xba   :  { %p5464_p11 = por %p5463_p10, %p5462_p9 }
  0xbc   :  { %p5465_p12 = pnand %p5464_p11, %p5460_p8 }
  0xbe   :  { %5468 = shalt.err (!%p5465_p12)
}
  0xbf   :  { %146 = dma.hbm_to_vmem [thread:$0]  %s5925_s12, 256, %s141_s7, [#allocation11], %s5702_s13, %s5702_s13, %s5703_s18  }
  0xc0   :  { %s5712_s17 = smov [#allocation15]   ;;  %s5481_s11 = sshra.s32 %s5935_s28, 4  ;;  %s5482_s11 = int_to_ptr.hbm [resolvable:$true] %s5481_s11 }
  0xc1   :  { %s170_s10 = sshll.u32 %s5712_s17, 4  ;;  %s5483_s16 = scalar_lea.hbm %s5482_s11, 8  ;;  %s171_s10 = int_to_ptr.vmem [resolvable:$true] %s170_s10 }
  0xc2   :  { %p5484_p13 = scmp.ne.s32.totalorder %s5482_s11, %s5483_s16  ;;  %s5485_s3 = scalar_lea.hbm %s5789_s24, 8 }
  0xc3   :  { %p5486_p0 = scmp.lt.s32.totalorder %s5482_s11, %s5789_s24  ;;  %p5487_p1 = scmp.lt.s32.totalorder %s5485_s3, %s5483_s16 }
  0xc5   :  { %p5488_p2 = por %p5487_p1, %p5486_p0 }
  0xc7   :  { %p5489_p3 = pnand %p5488_p2, %p5484_p13 }
  0xc9   :  { %5492 = shalt.err (!%p5489_p3)
}
  0xca   :  { %s5713_s15 = smov 64   ;;  %s5714_s30 = smov 4  }
  0xcb   :  { %176 = dma.hbm_to_vmem [thread:$0]  %s5935_s28, 128, %s171_s10, [#allocation14], %s5713_s15, %s5713_s15, %s5714_s30  }
  0xcc   :  { %s192_s14 = sshll.u32 %s5799_s6, 4  ;;  %s5715_s0 = smov [#allocation18]   ;;  %s193_s14 = int_to_ptr.hbm [resolvable:$true] %s192_s14 }
  0xcd   :  { %s194_s29 = sshll.u32 %s5715_s0, 4  ;;  %s217_s25 = sshll.u32 %s5809_s20, 4  ;;  %s195_s29 = int_to_ptr.vmem [resolvable:$true] %s194_s29  ;;  %s218_s25 = int_to_ptr.hbm [resolvable:$true] %s217_s25 }
  0xce   :  { %s5505_s19 = sshra.s32 %s193_s14, 4  ;;  %s5509_s22 = scalar_lea.hbm %s5799_s6, 16  ;;  %s5506_s19 = int_to_ptr.hbm [resolvable:$true] %s5505_s19 }
  0xcf   :  { %s5507_s24 = scalar_lea.hbm %s5506_s19, 16  ;;  %p5510_p5 = scmp.lt.s32.totalorder %s5506_s19, %s5799_s6 }
  0xd0   :  { %p5508_p4 = scmp.ne.s32.totalorder %s5506_s19, %s5507_s24  ;;  %p5511_p6 = scmp.lt.s32.totalorder %s5509_s22, %s5507_s24 }
  0xd2   :  { %p5512_p7 = por %p5511_p6, %p5510_p5 }
  0xd4   :  { %p5513_p8 = pnand %p5512_p7, %p5508_p4 }
  0xd6   :  { %5516 = shalt.err (!%p5513_p8)
}
  0xd7   :  { %s6932_s12 = sld [smem:[#allocation47_spill]]  ;;  %s5716_s9 = smov [#allocation21]  }
  0xd8   :  { %200 = dma.hbm_to_vmem [thread:$0]  %s193_s14, 256, %s195_s29, [#allocation17], %s5702_s13, %s5702_s13, %s5703_s18  }
  0xd9   :  { %s219_s26 = sshll.u32 %s5716_s9, 4  ;;  %s5529_s28 = sshra.s32 %s218_s25, 4  ;;  %s220_s26 = int_to_ptr.vmem [resolvable:$true] %s219_s26  ;;  %s5530_s28 = int_to_ptr.hbm [resolvable:$true] %s5529_s28 }
  0xda   :  { %s5531_s6 = scalar_lea.hbm %s5530_s28, 4  ;;  %s5533_s1 = scalar_lea.hbm %s5809_s20, 4 }
  0xdb   :  { %p5532_p9 = scmp.ne.s32.totalorder %s5530_s28, %s5531_s6  ;;  %p5534_p10 = scmp.lt.s32.totalorder %s5530_s28, %s5809_s20 }
  0xdc   :  { %p5535_p11 = scmp.lt.s32.totalorder %s5533_s1, %s5531_s6 }
  0xdd   :  { %s238_s8 = sshll.u32 %s6932_s12, 4  ;;  %s5956_s8 = int_to_ptr.hbm [resolvable:$true] %s238_s8 }
  0xde   :  { %p5536_p12 = por %p5535_p11, %p5534_p10 }
  0xe0   :  { %p5537_p13 = pnand %p5536_p12, %p5532_p9 }
  0xe2   :  { %5540 = shalt.err (!%p5537_p13)
}
  0xe3   :  { %222 = dma.hbm_to_vmem [thread:$0]  %s218_s25, 64, %s220_s26, [#allocation20]  }
  0xe4   :  { %s6933_s7 = sld [smem:[#allocation48_spill]]  ;;  %s5717_s27 = smov [#allocation24]  }
  0xe5   :  { %s240_s2 = sshll.u32 %s5717_s27, 4  ;;  %s5553_s17 = sshra.s32 %s5956_s8, 4  ;;  %s241_s2 = int_to_ptr.vmem [resolvable:$true] %s240_s2  ;;  %s5554_s17 = int_to_ptr.hbm [resolvable:$true] %s5553_s17 }
  0xe6   :  { %s5555_s10 = scalar_lea.hbm %s5554_s17, 16  ;;  %s5557_s20 = scalar_lea.hbm %s6932_s12, 16 }
  0xe7   :  { %p5556_p0 = scmp.ne.s32.totalorder %s5554_s17, %s5555_s10  ;;  %p5558_p1 = scmp.lt.s32.totalorder %s5554_s17, %s6932_s12 }
  0xe8   :  { %p5559_p2 = scmp.lt.s32.totalorder %s5557_s20, %s5555_s10 }
  0xea   :  { %s262_s21 = sshll.u32 %s6933_s7, 4  ;;  %p5560_p3 = por %p5559_p2, %p5558_p1  ;;  %s5961_s21 = int_to_ptr.hbm [resolvable:$true] %s262_s21 }
  0xec   :  { %p5561_p4 = pnand %p5560_p3, %p5556_p0 }
  0xee   :  { %5564 = shalt.err (!%p5561_p4)
}
  0xef   :  { %s6934_s11 = sld [smem:[#allocation49_spill]]  ;;  %s5718_s16 = smov [#allocation27]  }
  0xf0   :  { %246 = dma.hbm_to_vmem [thread:$0]  %s5956_s8, 256, %s241_s2, [#allocation23], %s5702_s13, %s5702_s13, %s5703_s18  }
  0xf1   :  { %s264_s3 = sshll.u32 %s5718_s16, 4  ;;  %s5577_s30 = sshra.s32 %s5961_s21, 4  ;;  %s265_s3 = int_to_ptr.vmem [resolvable:$true] %s264_s3  ;;  %s5578_s30 = int_to_ptr.hbm [resolvable:$true] %s5577_s30 }
  0xf2   :  { %s5579_s14 = scalar_lea.hbm %s5578_s30, 16  ;;  %s5581_s0 = scalar_lea.hbm %s6933_s7, 16 }
  0xf3   :  { %p5580_p5 = scmp.ne.s32.totalorder %s5578_s30, %s5579_s14  ;;  %p5582_p6 = scmp.lt.s32.totalorder %s5578_s30, %s6933_s7 }
  0xf4   :  { %p5583_p7 = scmp.lt.s32.totalorder %s5581_s0, %s5579_s14 }
  0xf5   :  { %s287_s15 = sshll.u32 %s6934_s11, 4  ;;  %s288_s15 = int_to_ptr.hbm [resolvable:$true] %s287_s15 }
  0xf6   :  { %p5584_p8 = por %p5583_p7, %p5582_p6 }
  0xf8   :  { %p5585_p9 = pnand %p5584_p8, %p5580_p5 }
  0xfa   :  { %5588 = shalt.err (!%p5585_p9)
}
  0xfb   :  { %s6935_s29 = sld [smem:[#allocation52_spill]]  ;;  %s5719_s19 = smov [#allocation30]  }
  0xfc   :  { %270 = dma.hbm_to_vmem [thread:$0]  %s5961_s21, 256, %s265_s3, [#allocation26], %s5702_s13, %s5702_s13, %s5703_s18  }
  0xfd   :  { %s289_s24 = sshll.u32 %s5719_s19, 4  ;;  %s5601_s22 = sshra.s32 %s288_s15, 4  ;;  %s290_s24 = int_to_ptr.vmem [resolvable:$true] %s289_s24  ;;  %s5602_s22 = int_to_ptr.hbm [resolvable:$true] %s5601_s22 }
  0xfe   :  { %s5603_s12 = scalar_lea.hbm %s5602_s22, 2  ;;  %s5605_s9 = scalar_lea.hbm %s6934_s11, 2 }
  0xff   :  { %p5604_p10 = scmp.ne.s32.totalorder %s5602_s22, %s5603_s12  ;;  %p5606_p11 = scmp.lt.s32.totalorder %s5602_s22, %s6934_s11 }
 0x100   :  { %p5607_p12 = scmp.lt.s32.totalorder %s5605_s9, %s5603_s12 }
 0x101   :  { %s301_s25 = sshll.u32 %s6935_s29, 4  ;;  %s5979_s25 = int_to_ptr.hbm [resolvable:$true] %s301_s25 }
 0x102   :  { %p5608_p13 = por %p5607_p12, %p5606_p11 }
 0x104   :  { %p5609_p0 = pnand %p5608_p13, %p5604_p10 }
 0x106   :  { %5612 = shalt.err (!%p5609_p0)
}
 0x107   :  { %292 = dma.hbm_to_vmem [thread:$0]  %s288_s15, 32, %s290_s24, [#allocation29]  }
 0x108   :  { %s5720_s26 = smov [#allocation31]   ;;  %s5625_s28 = sshra.s32 %s5979_s25, 4  ;;  %s5626_s28 = int_to_ptr.hbm [resolvable:$true] %s5625_s28 }
 0x109   :  { %s303_s8 = sshll.u32 %s5720_s26, 4  ;;  %s5627_s6 = scalar_lea.hbm %s5626_s28, 16  ;;  %s304_s8 = int_to_ptr.vmem [resolvable:$true] %s303_s8 }
 0x10a   :  { %p5628_p1 = scmp.ne.s32.totalorder %s5626_s28, %s5627_s6  ;;  %s5629_s1 = scalar_lea.hbm %s6935_s29, 16 }
 0x10b   :  { %p5630_p2 = scmp.lt.s32.totalorder %s5626_s28, %s6935_s29  ;;  %p5631_p3 = scmp.lt.s32.totalorder %s5629_s1, %s5627_s6 }
 0x10d   :  { %p5632_p4 = por %p5631_p3, %p5630_p2 }
 0x10f   :  { %p5633_p5 = pnand %p5632_p4, %p5628_p1 }
 0x111   :  { %5636 = shalt.err (!%p5633_p5)
}
 0x112   :  { %309 = dma.hbm_to_vmem [thread:$0]  %s5979_s25, 256, %s304_s8, [#allocation32], %s5702_s13, %s5702_s13, %s5703_s18  }
 0x113   :  { %5649 = dma.done.wait [#allocation6], 512  }
 0x114   :  { %5650 = vsyncadd [#allocation6], 4294966784 }
 0x115   :  { %5651 = dma.done.wait [#allocation8], 528  }
 0x116   :  { %5652 = vsyncadd [#allocation8], 4294966768 }
 0x117   :  { %5653 = dma.done.wait [#allocation11], 272  }
 0x118   :  { %5654 = vsyncadd [#allocation11], 4294967024 }
 0x119   :  { %5655 = dma.done.wait [#allocation14], 384  }
 0x11a   :  { %5656 = vsyncadd [#allocation14], 4294966912 }
 0x11b   :  { %5657 = dma.done.wait [#allocation17], 272  }
 0x11c   :  { %5658 = vsyncadd [#allocation17], 4294967024 }
 0x11d   :  { %5659 = dma.done.wait [#allocation20], 80  }
 0x11e   :  { %5660 = vsyncadd [#allocation20], 4294967216 }
 0x11f   :  { %5661 = dma.done.wait [#allocation23], 272  }
 0x120   :  { %5662 = vsyncadd [#allocation23], 4294967024 }
 0x121   :  { %5663 = dma.done.wait [#allocation26], 272  }
 0x122   :  { %5664 = vsyncadd [#allocation26], 4294967024 }
 0x123   :  { %5665 = dma.done.wait [#allocation29], 48  }
 0x124   :  { %5666 = vsyncadd [#allocation29], 4294967248 }
 0x125   :  { %5667 = dma.done.wait [#allocation32], 256  }
 0x126   :  { %5668 = vsyncadd [#allocation32], 4294967040  ;;  %s6936_s13 = sld [smem:[#allocation44_spill]]  ;;  %v397_v10 = vld [vmem:[#allocation5 + $0x18] sm:$0xff]  ;;  %v5721_v11 = vmov 0.0   ;;  %v396_v12 = vld [vmem:[#allocation5 + $0x10] sm:$0xff] }
 0x127   :  { %s6937_s18 = sld [smem:[#allocation43_spill]]  ;;  %421 = vmatpush.msra.mxu0 %v397_v10  ;;  %v395_v13 = vld [vmem:[#allocation5 + $0x8] sm:$0xff]  ;;  %v394_v14 = vld [vmem:[#allocation5] sm:$0xff]  ;;  %vm402_vm0 = vcmask 261120   ;;  %s5722_s7 = smov 48   ;;  %vm443_vm13 = vcmask 130048  }
 0x128   :  { %s5723_s21 = smov 32   ;;  %s5724_s27 = smov 16   ;;  %v6047_v20 = vld [vmem:[#allocation7] ss:$0 sm:$0xff] }
 0x129   :  { %422 = vmatpush.msra.mxu0 %v396_v12  ;;  %s5725_s2 = smov 96   ;;  %s5726_s17 = smov 80  }
 0x12a   :  { %s6938_s10 = sld [smem:[#allocation45_spill]] }
 0x12b   :  { %423 = vmatpush.msra.mxu0 %v395_v13  ;;  %s6939_s20 = sld [smem:[#allocation46_spill]] }
 0x12c   :  { %v5991_v2 = vld [vmem:[%s6936_s13 + $0x8] sm:$0xff]  ;;  %v5997_v4 = vld [vmem:[%s6936_s13] sm:$0xff]  ;;  %v6005_v6 = vld [vmem:[%s6936_s13 + $0x18] sm:$0xff]  ;;  %s6940_s11 = sld [smem:[#allocation53_spill]] }
 0x12d   :  { %v5994_v3 = vld [vmem:[%s6936_s13 + $0x28] sm:$0xff]  ;;  %461 = vmatpush.msra.mxu2 %v5991_v2  ;;  %v6002_v5 = vld [vmem:[%s6936_s13 + $0x20] sm:$0xff]  ;;  %v6008_v7 = vld [vmem:[%s6936_s13 + $0x38] sm:$0xff]  ;;  %424 = vmatpush.msra.mxu0 %v394_v14  ;;  %s6941_s16 = sld [smem:[#allocation50_spill]] }
 0x12e   :  { %507 = vmatpush.msra.mxu3 %v5994_v3  ;;  %v6013_v8 = vld [vmem:[%s6936_s13 + $0x10] sm:$0xff]  ;;  %532 = vmatpush.msra.mxu1 %v6008_v7  ;;  %v392_v15 = vld [vmem:[%s6937_s18] sm:$0xff]  ;;  %s6942_s3 = sld [smem:[#allocation54_spill]] }
 0x12f   :  { %462 = vmatpush.msra.mxu2 %v5997_v4  ;;  %v6016_v9 = vld [vmem:[%s6936_s13 + $0x30] sm:$0xff]  ;;  %4719 = vmatmul.msk.f32.vlgmr.msra.gmra.mxu0 %vm402_vm0, %v392_v15  ;;  %s6943_s15 = sld [smem:[#allocation51_spill]] }
 0x130   :  { %508 = vmatpush.msra.mxu3 %v6002_v5  ;;  %463 = vmatmul.f32.vlgmr.msra.gmra.mxu2 %v5721_v11 }
 0x131   :  { %509 = vmatmul.f32.vlgmr.msra.gmra.mxu3 %v5721_v11  ;;  %482 = vmatpush.msrb.mxu2 %v6005_v6 }
 0x132   :  { %661 = vmatpush.msrb.mxu3 %v6005_v6  ;;  %533 = vmatpush.msra.mxu1 %v6016_v9 }
 0x133   :  { %483 = vmatpush.msrb.mxu2 %v6013_v8  ;;  %534 = vmatmul.f32.vlgmr.msra.gmra.mxu1 %v5721_v11 }
 0x134   :  { %687 = vmatpush.msrb.mxu1 %v5994_v3  ;;  %662 = vmatpush.msrb.mxu3 %v6013_v8 }
 0x135   :  { %637 = vmatpush.msra.mxu2 %v5991_v2  ;;  %847 = vmatpush.msrb.mxu0 %v6005_v6 }
 0x136   :  { %688 = vmatpush.msrb.mxu1 %v6002_v5  ;;  %823 = vmatpush.msra.mxu3 %v5991_v2 }
 0x137   :  { %638 = vmatpush.msra.mxu2 %v5997_v4  ;;  %848 = vmatpush.msrb.mxu0 %v6013_v8 }
 0x138   :  { %484 = vmatmul.f32.vlgmr.msrb.gmra.mxu2 %v5721_v11  ;;  %873 = vmatpush.msra.mxu1 %v5994_v3 }
 0x139   :  { %713 = vmatpush.msrb.mxu2 %v6008_v7  ;;  %824 = vmatpush.msra.mxu3 %v5997_v4 }
 0x13a   :  { %874 = vmatpush.msra.mxu1 %v6002_v5  ;;  %1033 = vmatpush.msra.mxu0 %v6005_v6 }
 0x13b   :  { %714 = vmatpush.msrb.mxu2 %v6016_v9 }
 0x13c   :  { %1034 = vmatpush.msra.mxu0 %v6013_v8 }
 0x1ac   :  { %v426_v21 = vpop.f32.mrf.mxu0 }
 0x1ad   :  { %v6050_v22 = vadd.f32 %v6047_v20, %v426_v21 }
 0x1b0   :  { %v535_v16 = vpop.f32.mrf.mxu1 }
 0x1b1   :  { %539 = vrot.lane.b32.xlu2 %v535_v16, %s5722_s7 }
 0x1b3   :  { %v464_v17 = vpop.f32.mrf.mxu2 }
 0x1b4   :  { %v510_v18 = vpop.f32.mrf.mxu3  ;;  %v467_v26 = vadd.f32 %v464_v17, %v6050_v22 }
 0x1b5   :  { %514 = vrot.lane.b32.xlu0 %v510_v18, %s5723_s21 }
 0x1b6   :  { %v543_v27 = vsub.f32 0.0, %v467_v26 }
 0x1b8   :  { %v544_v28 = vmul.f32 1.442695, %v543_v27 }
 0x1bb   :  { %v485_v19 = vpop.f32.mrf.mxu2 }
 0x1bc   :  { %489 = vrot.lane.b32.xlu1 %v485_v19, %s5724_s27 }
 0x20b   :  { %v540_v63 = vpop.permute.xlu2 %539 }
 0x20c   :  { %v542_v0 = vadd.f32 %v540_v63, %v6050_v22 }
 0x20e   :  { %v582_v1 = vsub.f32 0.0, %v542_v0 }
 0x210   :  { %v583_v10 = vmul.f32 1.442695, %v582_v1 }
 0x227   :  { %v515_v23 = vpop.permute.xlu0 %514 }
 0x228   :  { %v517_v24 = vadd.f32 %v515_v23, %v6050_v22 }
 0x22a   :  { %4925 = vtanh.f32 %v517_v24 }
 0x22b   :  { %4927 = vpow2.f32 %v544_v28 }
 0x22e   :  { %v490_v43 = vpop.permute.xlu1 %489 }
 0x22f   :  { %v492_v44 = vadd.f32 %v490_v43, %v6050_v22 }
 0x230   :  { %v4926_v25 = vpop.eup %4925 }
 0x231   :  { %603 = vrot.lane.b32.xlu0 %v4926_v25, %s5725_s2  ;;  %v4928_v29 = vpop.eup %4927  ;;  %v562_v45 = vsub.f32 0.0, %v492_v44 }
 0x232   :  { %v546_v30 = vadd.f32 1.0, %v4928_v29 }
 0x233   :  { %v563_v46 = vmul.f32 1.442695, %v562_v45 }
 0x234   :  { %4929 = vrcp.f32 %v546_v30  ;;  %vm552_vm1 = vweird.f32 %v546_v30  ;;  %v558_v35 = vand.u32 2147483648, %v546_v30  ;;  %v556_v37 = vand.u32 2147483647, %v546_v30 }
 0x235   :  { %4931 = vpow2.f32 %v563_v46 }
 0x236   :  { %v559_v38 = vor.u32 1.1754944e-38, %v558_v35  ;;  %vm557_vm4 = vcmp.eq.f32.partialorder %v556_v37, 8.507059e+37 }
 0x23a   :  { %v4930_v31 = vpop.eup %4929 }
 0x23b   :  { %v548_v32 = vmul.f32 %v4930_v31, %v546_v30  ;;  %vm553_vm2 = vweird.f32 %v4930_v31  ;;  %v4932_v47 = vpop.eup %4931 }
 0x23c   :  { %vm554_vm3 = vmor %vm552_vm1, %vm553_vm2  ;;  %v565_v48 = vadd.f32 1.0, %v4932_v47 }
 0x23d   :  { %v549_v33 = vsub.f32 1.0, %v548_v32 }
 0x23e   :  { %4933 = vrcp.f32 %v565_v48  ;;  %v577_v54 = vand.u32 2147483648, %v565_v48  ;;  %vm571_vm6 = vweird.f32 %v565_v48  ;;  %v575_v55 = vand.u32 2147483647, %v565_v48 }
 0x23f   :  { %v550_v34 = vmul.f32 %v4930_v31, %v549_v33 }
 0x240   :  { %v578_v57 = vor.u32 1.1754944e-38, %v577_v54  ;;  %vm576_vm8 = vcmp.eq.f32.partialorder %v575_v55, 8.507059e+37 }
 0x241   :  { %v551_v36 = vadd.f32 %v4930_v31, %v550_v34 }
 0x243   :  { %v555_v39 = vsel %vm554_vm3, %v4930_v31, %v551_v36 }
 0x244   :  { %v560_v41 = vsel %vm557_vm4, %v559_v38, %v555_v39  ;;  %v4934_v49 = vpop.eup %4933 }
 0x245   :  { %v567_v50 = vmul.f32 %v4934_v49, %v565_v48  ;;  %vm572_vm5 = vweird.f32 %v4934_v49 }
 0x246   :  { %vm573_vm7 = vmor %vm571_vm6, %vm572_vm5 }
 0x247   :  { %v568_v51 = vsub.f32 1.0, %v567_v50 }
 0x249   :  { %v569_v52 = vmul.f32 %v4934_v49, %v568_v51 }
 0x24b   :  { %v570_v53 = vadd.f32 %v4934_v49, %v569_v52 }
 0x24d   :  { %v574_v56 = vsel %vm573_vm7, %v4934_v49, %v570_v53 }
 0x24e   :  { %v579_v58 = vsel %vm576_vm8, %v578_v57, %v574_v56 }
 0x24f   :  { %v601_v59 = vmul.f32 0.0, %v579_v58 }
 0x2a3   :  { %v604_v40 = vpop.permute.xlu0 %603 }
 0x2a4   :  { %v606_v42 = vmul.f32 %v604_v40, %v560_v41 }
 0x2a6   :  { %608 = vrot.lane.b32.xlu1 %v606_v42, %s5724_s27 }
 0x318   :  { %v609_v60 = vpop.permute.xlu1 %608 }
 0x319   :  { %v6057_v61 = vadd.f32 %v609_v60, %v601_v59 }
 0x31b   :  { %4935 = vtanh.f32 %v6057_v61 }
 0x31c   :  { %4937 = vpow2.f32 %v583_v10 }
 0x321   :  { %v4936_v62 = vpop.eup %4935 }
 0x322   :  { %614 = vrot.lane.b32.xlu2 %v4936_v62, %s5723_s21  ;;  %v4938_v12 = vpop.eup %4937 }
 0x323   :  { %v585_v13 = vadd.f32 1.0, %v4938_v12 }
 0x325   :  { %4939 = vrcp.f32 %v585_v13  ;;  %vm591_vm9 = vweird.f32 %v585_v13  ;;  %v597_v18 = vand.u32 2147483648, %v585_v13  ;;  %v595_v21 = vand.u32 2147483647, %v585_v13 }
 0x327   :  { %v598_v23 = vor.u32 1.1754944e-38, %v597_v18  ;;  %vm596_vm12 = vcmp.eq.f32.partialorder %v595_v21, 8.507059e+37 }
 0x32b   :  { %v4940_v14 = vpop.eup %4939 }
 0x32c   :  { %v587_v15 = vmul.f32 %v4940_v14, %v585_v13  ;;  %vm592_vm10 = vweird.f32 %v4940_v14 }
 0x32d   :  { %vm593_vm11 = vmor %vm591_vm9, %vm592_vm10 }
 0x32e   :  { %v588_v16 = vsub.f32 1.0, %v587_v15 }
 0x330   :  { %v589_v17 = vmul.f32 %v4940_v14, %v588_v16 }
 0x332   :  { %v590_v19 = vadd.f32 %v4940_v14, %v589_v17 }
 0x334   :  { %v594_v24 = vsel %vm593_vm11, %v4940_v14, %v590_v19  ;;  %v784_v19 = vrot.slane %v6057_v61, 6 }
 0x335   :  { %v599_v25 = vsel %vm596_vm12, %v598_v23, %v594_v24 }
 0x37c   :  { %v615_v26 = vpop.permute.xlu2 %614 }
 0x37d   :  { %v6062_v27 = vmul.f32 %v615_v26, %v599_v25 }
 0x37f   :  { %619 = vrot.lane.b32.xlu0 %v6062_v27, %s5726_s17 }
 0x3f1   :  { %v6066_v28 = vpop.permute.xlu0 %619 }
 0x3f2   :  { %4727 = vmatmul.msk.f32.vlgmr.msra.gmra.mxu2 %vm443_vm13, %v6066_v28  ;;  %4728 = vmatmul.msk.f32.vlgmr.msrb.gmra.mxu3 %vm443_vm13, %v6066_v28 }
 0x3f3   :  { %4729 = vmatmul.msk.f32.vlgmr.msrb.gmra.mxu1 %vm443_vm13, %v6066_v28  ;;  %899 = vmatpush.msra.mxu2 %v6008_v7 }
 0x3f4   :  { %1009 = vmatpush.msrb.mxu3 %v5991_v2  ;;  %1059 = vmatpush.msrb.mxu1 %v5994_v3 }
 0x3f5   :  { %900 = vmatpush.msra.mxu2 %v6016_v9 }
 0x3f6   :  { %1010 = vmatpush.msrb.mxu3 %v5997_v4  ;;  %1060 = vmatpush.msrb.mxu1 %v6002_v5 }
 0x3fa   :  { %4730 = vmatmul.msk.f32.vlgmr.msrb.gmra.mxu2 %vm443_vm13, %v6066_v28 }
 0x3fb   :  { %1085 = vmatpush.msrb.mxu2 %v6008_v7 }
 0x3fd   :  { %1086 = vmatpush.msrb.mxu2 %v6016_v9 }
 0x470   :  { %v690_v29 = vpop.f32.mrf.mxu1 }
 0x471   :  { %v694_v30 = vrot.slane %v690_v29, 6 }
 0x473   :  { %695 = vrot.lane.b32.xlu1 %v694_v30, %s5723_s21 }
 0x475   :  { %v664_v31 = vpop.f32.mrf.mxu3  ;;  %v640_v35 = vpop.f32.mrf.mxu2 }
 0x476   :  { %v668_v32 = vrot.slane %v664_v31, 6  ;;  %v644_v39 = vrot.slane %v640_v35, 6 }
 0x478   :  { %669 = vrot.lane.b32.xlu0 %v668_v32, %s5724_s27  ;;  %v646_v40 = vadd.f32 %v644_v39, %v6050_v22 }
 0x47a   :  { %v725_v41 = vsub.f32 0.0, %v646_v40 }
 0x47c   :  { %v726_v42 = vmul.f32 1.442695, %v725_v41 }
 0x47d   :  { %v716_v37 = vpop.f32.mrf.mxu2 }
 0x47e   :  { %v720_v38 = vrot.slane %v716_v37, 6 }
 0x4e5   :  { %v696_v33 = vpop.permute.xlu1 %695 }
 0x4e6   :  { %v698_v34 = vadd.f32 %v696_v33, %v6050_v22 }
 0x4e8   :  { %4941 = vtanh.f32 %v698_v34  ;;  %v393_v34 = vld [vmem:[%s6937_s18 + $0x8] sm:$0xff] }
 0x4e9   :  { %4943 = vpow2.f32 %v726_v42  ;;  %4720 = vmatmul.msk.f32.gmra.mxu0 %vm402_vm0, %v393_v34 }
 0x4ea   :  { %v670_v57 = vpop.permute.xlu0 %669 }
 0x4eb   :  { %v672_v58 = vadd.f32 %v670_v57, %v6050_v22 }
 0x4ed   :  { %v744_v59 = vsub.f32 0.0, %v672_v58 }
 0x4ee   :  { %v4942_v36 = vpop.eup %4941 }
 0x4ef   :  { %788 = vrot.lane.b32.xlu2 %v4942_v36, %s5725_s2  ;;  %v4944_v43 = vpop.eup %4943  ;;  %v745_v60 = vmul.f32 1.442695, %v744_v59 }
 0x4f0   :  { %v728_v44 = vadd.f32 1.0, %v4944_v43 }
 0x4f2   :  { %4945 = vrcp.f32 %v728_v44  ;;  %v740_v50 = vand.u32 2147483648, %v728_v44  ;;  %vm734_vm15 = vweird.f32 %v728_v44  ;;  %v738_v51 = vand.u32 2147483647, %v728_v44 }
 0x4f3   :  { %4947 = vpow2.f32 %v745_v60 }
 0x4f4   :  { %v741_v53 = vor.u32 1.1754944e-38, %v740_v50  ;;  %vm739_vm2 = vcmp.eq.f32.partialorder %v738_v51, 8.507059e+37 }
 0x4f7   :  { %721 = vrot.lane.b32.xlu2 %v720_v38, %s5722_s7 }
 0x4f8   :  { %v4946_v45 = vpop.eup %4945 }
 0x4f9   :  { %v730_v46 = vmul.f32 %v4946_v45, %v728_v44  ;;  %vm735_vm14 = vweird.f32 %v4946_v45  ;;  %v4948_v62 = vpop.eup %4947 }
 0x4fa   :  { %vm736_vm1 = vmor %vm734_vm15, %vm735_vm14  ;;  %v747_v63 = vadd.f32 1.0, %v4948_v62 }
 0x4fb   :  { %v731_v47 = vsub.f32 1.0, %v730_v46 }
 0x4fc   :  { %4949 = vrcp.f32 %v747_v63  ;;  %v759_v14 = vand.u32 2147483648, %v747_v63  ;;  %vm753_vm4 = vweird.f32 %v747_v63  ;;  %v757_v15 = vand.u32 2147483647, %v747_v63 }
 0x4fd   :  { %v732_v48 = vmul.f32 %v4946_v45, %v731_v47 }
 0x4fe   :  { %v760_v17 = vor.u32 1.1754944e-38, %v759_v14  ;;  %vm758_vm6 = vcmp.eq.f32.partialorder %v757_v15, 8.507059e+37 }
 0x4ff   :  { %v733_v49 = vadd.f32 %v4946_v45, %v732_v48 }
 0x501   :  { %v737_v52 = vsel %vm736_vm1, %v4946_v45, %v733_v49 }
 0x502   :  { %v742_v55 = vsel %vm739_vm2, %v741_v53, %v737_v52  ;;  %v4950_v0 = vpop.eup %4949 }
 0x503   :  { %v749_v1 = vmul.f32 %v4950_v0, %v747_v63  ;;  %vm754_vm3 = vweird.f32 %v4950_v0 }
 0x504   :  { %vm755_vm5 = vmor %vm753_vm4, %vm754_vm3 }
 0x505   :  { %v750_v10 = vsub.f32 1.0, %v749_v1 }
 0x507   :  { %v751_v12 = vmul.f32 %v4950_v0, %v750_v10 }
 0x509   :  { %v752_v13 = vadd.f32 %v4950_v0, %v751_v12 }
 0x50b   :  { %v756_v16 = vsel %vm755_vm5, %v4950_v0, %v752_v13 }
 0x50c   :  { %v761_v18 = vsel %vm758_vm6, %v760_v17, %v756_v16 }
 0x50d   :  { %v786_v21 = vmul.f32 %v784_v19, %v761_v18 }
 0x549   :  { %v789_v54 = vpop.permute.xlu2 %788 }
 0x54a   :  { %v791_v56 = vmul.f32 %v789_v54, %v742_v55 }
 0x54c   :  { %793 = vrot.lane.b32.xlu1 %v791_v56, %s5724_s27 }
 0x551   :  { %v722_v26 = vpop.permute.xlu2 %721 }
 0x552   :  { %v724_v29 = vadd.f32 %v722_v26, %v6050_v22 }
 0x554   :  { %v764_v30 = vsub.f32 0.0, %v724_v29 }
 0x556   :  { %v765_v31 = vmul.f32 1.442695, %v764_v30 }
 0x566   :  { %v6119_v48 = vpop.f32.mrf.mxu0 }
 0x5be   :  { %v794_v23 = vpop.permute.xlu1 %793 }
 0x5bf   :  { %v6093_v24 = vadd.f32 %v794_v23, %v786_v21 }
 0x5c1   :  { %4951 = vtanh.f32 %v6093_v24 }
 0x5c2   :  { %4953 = vpow2.f32 %v765_v31 }
 0x5c7   :  { %v4952_v25 = vpop.eup %4951 }
 0x5c8   :  { %799 = vrot.lane.b32.xlu0 %v4952_v25, %s5723_s21  ;;  %v4954_v32 = vpop.eup %4953 }
 0x5c9   :  { %v767_v33 = vadd.f32 1.0, %v4954_v32 }
 0x5cb   :  { %4955 = vrcp.f32 %v767_v33  ;;  %v779_v39 = vand.u32 2147483648, %v767_v33  ;;  %vm773_vm8 = vweird.f32 %v767_v33  ;;  %v777_v40 = vand.u32 2147483647, %v767_v33 }
 0x5cd   :  { %v780_v42 = vor.u32 1.1754944e-38, %v779_v39  ;;  %vm778_vm10 = vcmp.eq.f32.partialorder %v777_v40, 8.507059e+37 }
 0x5d1   :  { %v4956_v61 = vpop.eup %4955 }
 0x5d2   :  { %v769_v35 = vmul.f32 %v4956_v61, %v767_v33  ;;  %vm774_vm7 = vweird.f32 %v4956_v61 }
 0x5d3   :  { %vm775_vm9 = vmor %vm773_vm8, %vm774_vm7 }
 0x5d4   :  { %v770_v36 = vsub.f32 1.0, %v769_v35 }
 0x5d6   :  { %v771_v37 = vmul.f32 %v4956_v61, %v770_v36 }
 0x5d8   :  { %v772_v38 = vadd.f32 %v4956_v61, %v771_v37 }
 0x5da   :  { %v776_v41 = vsel %vm775_vm9, %v4956_v61, %v772_v38 }
 0x5db   :  { %v781_v43 = vsel %vm778_vm10, %v780_v42, %v776_v41 }
 0x63a   :  { %v800_v44 = vpop.permute.xlu0 %799 }
 0x63b   :  { %v802_v45 = vmul.f32 %v800_v44, %v781_v43  ;;  %v970_v43 = vrot.slane %v6093_v24, 6 }
 0x63d   :  { %v804_v46 = vrot.slane %v802_v45, 2 }
 0x63f   :  { %805 = vrot.lane.b32.xlu1 %v804_v46, %s5726_s17 }
 0x6b1   :  { %v6101_v47 = vpop.permute.xlu1 %805 }
 0x6b2   :  { %4731 = vmatmul.msk.f32.vlgmr.msra.gmra.mxu3 %vm443_vm13, %v6101_v47  ;;  %4732 = vmatmul.msk.f32.vlgmr.msrb.gmra.mxu0 %vm443_vm13, %v6101_v47 }
 0x6b3   :  { %4733 = vmatmul.msk.f32.vlgmr.msra.gmra.mxu1 %vm443_vm13, %v6101_v47  ;;  %4734 = vmatmul.msk.f32.vlgmr.msra.gmra.mxu2 %vm443_vm13, %v6101_v47 }
 0x6b4   :  { %1195 = vmatpush.msra.mxu3 %v5991_v2  ;;  %1216 = vmatpush.msrb.mxu0 %v6005_v6 }
 0x6b5   :  { %1241 = vmatpush.msra.mxu1 %v5994_v3  ;;  %1266 = vmatpush.msra.mxu2 %v6008_v7 }
 0x6b6   :  { %1196 = vmatpush.msra.mxu3 %v5997_v4  ;;  %1217 = vmatpush.msrb.mxu0 %v6013_v8 }
 0x6b7   :  { %1242 = vmatpush.msra.mxu1 %v6002_v5  ;;  %1267 = vmatpush.msra.mxu2 %v6016_v9 }
 0x72f   :  { %v850_v49 = vpop.f32.mrf.mxu0 }
 0x730   :  { %v854_v50 = vrot.slane %v850_v49, 4  ;;  %v876_v51 = vpop.f32.mrf.mxu1 }
 0x731   :  { %v880_v52 = vrot.slane %v876_v51, 4 }
 0x732   :  { %855 = vrot.lane.b32.xlu1 %v854_v50, %s5724_s27 }
 0x733   :  { %881 = vrot.lane.b32.xlu2 %v880_v52, %s5723_s21 }
 0x735   :  { %v826_v58 = vpop.f32.mrf.mxu3 }
 0x736   :  { %v902_v56 = vpop.f32.mrf.mxu2  ;;  %v830_v59 = vrot.slane %v826_v58, 4 }
 0x737   :  { %v906_v57 = vrot.slane %v902_v56, 4 }
 0x738   :  { %v832_v60 = vadd.f32 %v830_v59, %v6050_v22 }
 0x73a   :  { %v911_v62 = vsub.f32 0.0, %v832_v60 }
 0x73c   :  { %v912_v63 = vmul.f32 1.442695, %v911_v62 }
 0x78d   :  { %v882_v53 = vpop.permute.xlu2 %881 }
 0x78e   :  { %v884_v54 = vadd.f32 %v882_v53, %v6050_v22 }
 0x790   :  { %4957 = vtanh.f32 %v884_v54 }
 0x791   :  { %4959 = vpow2.f32 %v912_v63 }
 0x796   :  { %v4958_v55 = vpop.eup %4957 }
 0x797   :  { %974 = vrot.lane.b32.xlu0 %v4958_v55, %s5725_s2  ;;  %v4960_v0 = vpop.eup %4959 }
 0x798   :  { %v914_v1 = vadd.f32 1.0, %v4960_v0 }
 0x79a   :  { %4961 = vrcp.f32 %v914_v1  ;;  %v926_v16 = vand.u32 2147483648, %v914_v1  ;;  %vm920_vm12 = vweird.f32 %v914_v1  ;;  %v924_v17 = vand.u32 2147483647, %v914_v1 }
 0x79c   :  { %v927_v19 = vor.u32 1.1754944e-38, %v926_v16  ;;  %vm925_vm15 = vcmp.eq.f32.partialorder %v924_v17, 8.507059e+37 }
 0x79f   :  { %907 = vrot.lane.b32.xlu0 %v906_v57, %s5722_s7 }
 0x7a0   :  { %v4962_v10 = vpop.eup %4961 }
 0x7a1   :  { %v916_v12 = vmul.f32 %v4962_v10, %v914_v1  ;;  %vm921_vm11 = vweird.f32 %v4962_v10 }
 0x7a2   :  { %vm922_vm14 = vmor %vm920_vm12, %vm921_vm11 }
 0x7a3   :  { %v917_v13 = vsub.f32 1.0, %v916_v12 }
 0x7a4   :  { %v856_v26 = vpop.permute.xlu1 %855 }
 0x7a5   :  { %v918_v14 = vmul.f32 %v4962_v10, %v917_v13  ;;  %v858_v29 = vadd.f32 %v856_v26, %v6050_v22 }
 0x7a7   :  { %v919_v15 = vadd.f32 %v4962_v10, %v918_v14  ;;  %v930_v30 = vsub.f32 0.0, %v858_v29 }
 0x7a9   :  { %v923_v18 = vsel %vm922_vm14, %v4962_v10, %v919_v15  ;;  %v931_v31 = vmul.f32 1.442695, %v930_v30 }
 0x7aa   :  { %v928_v23 = vsel %vm925_vm15, %v927_v19, %v923_v18 }
 0x7ab   :  { %4963 = vpow2.f32 %v931_v31 }
 0x7b1   :  { %v4964_v32 = vpop.eup %4963 }
 0x7b2   :  { %v933_v33 = vadd.f32 1.0, %v4964_v32 }
 0x7b4   :  { %4965 = vrcp.f32 %v933_v33  ;;  %v945_v38 = vand.u32 2147483648, %v933_v33  ;;  %vm939_vm2 = vweird.f32 %v933_v33  ;;  %v943_v39 = vand.u32 2147483647, %v933_v33 }
 0x7b6   :  { %v946_v41 = vor.u32 1.1754944e-38, %v945_v38  ;;  %vm944_vm4 = vcmp.eq.f32.partialorder %v943_v39, 8.507059e+37 }
 0x7ba   :  { %v4966_v34 = vpop.eup %4965 }
 0x7bb   :  { %v935_v61 = vmul.f32 %v4966_v34, %v933_v33  ;;  %vm940_vm1 = vweird.f32 %v4966_v34 }
 0x7bc   :  { %vm941_vm3 = vmor %vm939_vm2, %vm940_vm1 }
 0x7bd   :  { %v936_v35 = vsub.f32 1.0, %v935_v61 }
 0x7bf   :  { %v937_v36 = vmul.f32 %v4966_v34, %v936_v35 }
 0x7c1   :  { %v938_v37 = vadd.f32 %v4966_v34, %v937_v36 }
 0x7c3   :  { %v942_v40 = vsel %vm941_vm3, %v4966_v34, %v938_v37 }
 0x7c4   :  { %v947_v42 = vsel %vm944_vm4, %v946_v41, %v942_v40 }
 0x7c5   :  { %v972_v44 = vmul.f32 %v970_v43, %v947_v42 }
 0x809   :  { %v975_v21 = vpop.permute.xlu0 %974 }
 0x80a   :  { %v977_v25 = vmul.f32 %v975_v21, %v928_v23 }
 0x80c   :  { %979 = vrot.lane.b32.xlu2 %v977_v25, %s5724_s27 }
 0x811   :  { %v908_v50 = vpop.permute.xlu0 %907 }
 0x812   :  { %v910_v51 = vadd.f32 %v908_v50, %v6050_v22 }
 0x814   :  { %v950_v52 = vsub.f32 0.0, %v910_v51 }
 0x816   :  { %v951_v53 = vmul.f32 1.442695, %v950_v52 }
 0x866   :  { %v980_v45 = vpop.permute.xlu2 %979 }
 0x867   :  { %v6130_v46 = vadd.f32 %v980_v45, %v972_v44 }
 0x869   :  { %4967 = vtanh.f32 %v6130_v46 }
 0x86a   :  { %4969 = vpow2.f32 %v951_v53 }
 0x86f   :  { %v4968_v49 = vpop.eup %4967 }
 0x870   :  { %985 = vrot.lane.b32.xlu1 %v4968_v49, %s5723_s21  ;;  %v4970_v54 = vpop.eup %4969 }
 0x871   :  { %v953_v55 = vadd.f32 1.0, %v4970_v54 }
 0x873   :  { %4971 = vrcp.f32 %v953_v55  ;;  %v965_v60 = vand.u32 2147483648, %v953_v55  ;;  %vm959_vm6 = vweird.f32 %v953_v55  ;;  %v963_v62 = vand.u32 2147483647, %v953_v55 }
 0x875   :  { %v966_v0 = vor.u32 1.1754944e-38, %v965_v60  ;;  %vm964_vm8 = vcmp.eq.f32.partialorder %v963_v62, 8.507059e+37 }
 0x879   :  { %v4972_v56 = vpop.eup %4971 }
 0x87a   :  { %v955_v24 = vmul.f32 %v4972_v56, %v953_v55  ;;  %vm960_vm5 = vweird.f32 %v4972_v56 }
 0x87b   :  { %vm961_vm7 = vmor %vm959_vm6, %vm960_vm5 }
 0x87c   :  { %v956_v57 = vsub.f32 1.0, %v955_v24 }
 0x87e   :  { %v957_v58 = vmul.f32 %v4972_v56, %v956_v57 }
 0x880   :  { %v958_v59 = vadd.f32 %v4972_v56, %v957_v58 }
 0x882   :  { %v962_v63 = vsel %vm961_vm7, %v4972_v56, %v958_v59 }
 0x883   :  { %v967_v1 = vsel %vm964_vm8, %v966_v0, %v962_v63 }
 0x8e2   :  { %v986_v10 = vpop.permute.xlu1 %985 }
 0x8e3   :  { %v988_v12 = vmul.f32 %v986_v10, %v967_v1  ;;  %v1156_v10 = vrot.slane %v6130_v46, 6 }
 0x8e5   :  { %v990_v13 = vrot.slane %v988_v12, 4 }
 0x8e7   :  { %991 = vrot.lane.b32.xlu2 %v990_v13, %s5726_s17 }
 0x941   :  { %v6136_v14 = vpop.permute.xlu2 %991 }
 0x942   :  { %4735 = vmatmul.msk.f32.vlgmr.msrb.gmra.mxu3 %vm443_vm13, %v6136_v14  ;;  %4736 = vmatmul.msk.f32.vlgmr.msra.gmra.mxu0 %vm443_vm13, %v6136_v14 }
 0x943   :  { %4737 = vmatmul.msk.f32.vlgmr.msrb.gmra.mxu1 %vm443_vm13, %v6136_v14  ;;  %4738 = vmatmul.msk.f32.vlgmr.msrb.gmra.mxu2 %vm443_vm13, %v6136_v14 }
 0x944   :  { %1374 = vmatpush.msrb.mxu3 %v5991_v2  ;;  %1398 = vmatpush.msra.mxu0 %v6005_v6 }
 0x945   :  { %1424 = vmatpush.msrb.mxu1 %v5994_v3  ;;  %1450 = vmatpush.msrb.mxu2 %v6008_v7 }
 0x946   :  { %1375 = vmatpush.msrb.mxu3 %v5997_v4  ;;  %1399 = vmatpush.msra.mxu0 %v6013_v8 }
 0x947   :  { %1425 = vmatpush.msrb.mxu1 %v6002_v5  ;;  %1451 = vmatpush.msrb.mxu2 %v6016_v9 }
 0x9bf   :  { %v1036_v15 = vpop.f32.mrf.mxu0 }
 0x9c0   :  { %v1040_v16 = vrot.slane %v1036_v15, 2  ;;  %v1062_v17 = vpop.f32.mrf.mxu1 }
 0x9c1   :  { %v1066_v18 = vrot.slane %v1062_v17, 2 }
 0x9c2   :  { %1041 = vrot.lane.b32.xlu2 %v1040_v16, %s5724_s27 }
 0x9c3   :  { %1067 = vrot.lane.b32.xlu0 %v1066_v18, %s5723_s21 }
 0x9c5   :  { %v1012_v29 = vpop.f32.mrf.mxu3 }
 0x9c6   :  { %v1088_v25 = vpop.f32.mrf.mxu2  ;;  %v1016_v30 = vrot.slane %v1012_v29, 2 }
 0x9c7   :  { %v1092_v26 = vrot.slane %v1088_v25, 2 }
 0x9c8   :  { %v1018_v31 = vadd.f32 %v1016_v30, %v6050_v22 }
 0x9ca   :  { %v1097_v32 = vsub.f32 0.0, %v1018_v31 }
 0x9cc   :  { %v1098_v33 = vmul.f32 1.442695, %v1097_v32 }
 0xa1c   :  { %v1042_v50 = vpop.permute.xlu2 %1041 }
 0xa1d   :  { %v1044_v51 = vadd.f32 %v1042_v50, %v6050_v22 }
 0xa1f   :  { %v1116_v52 = vsub.f32 0.0, %v1044_v51 }
 0xa21   :  { %v1117_v53 = vmul.f32 1.442695, %v1116_v52 }
 0xa35   :  { %v1068_v19 = vpop.permute.xlu0 %1067 }
 0xa36   :  { %v1070_v21 = vadd.f32 %v1068_v19, %v6050_v22 }
 0xa38   :  { %4973 = vtanh.f32 %v1070_v21 }
 0xa39   :  { %4975 = vpow2.f32 %v1098_v33 }
 0xa3e   :  { %v4974_v23 = vpop.eup %4973 }
 0xa3f   :  { %1160 = vrot.lane.b32.xlu1 %v4974_v23, %s5725_s2  ;;  %v4976_v34 = vpop.eup %4975 }
 0xa40   :  { %v1100_v61 = vadd.f32 1.0, %v4976_v34 }
 0xa42   :  { %4977 = vrcp.f32 %v1100_v61  ;;  %v1112_v40 = vand.u32 2147483648, %v1100_v61  ;;  %vm1106_vm10 = vweird.f32 %v1100_v61  ;;  %v1110_v41 = vand.u32 2147483647, %v1100_v61 }
 0xa43   :  { %4979 = vpow2.f32 %v1117_v53 }
 0xa44   :  { %v1113_v43 = vor.u32 1.1754944e-38, %v1112_v40  ;;  %vm1111_vm12 = vcmp.eq.f32.partialorder %v1110_v41, 8.507059e+37 }
 0xa47   :  { %1093 = vrot.lane.b32.xlu1 %v1092_v26, %s5722_s7 }
 0xa48   :  { %v4978_v35 = vpop.eup %4977 }
 0xa49   :  { %v1102_v36 = vmul.f32 %v4978_v35, %v1100_v61  ;;  %vm1107_vm9 = vweird.f32 %v4978_v35  ;;  %v4980_v54 = vpop.eup %4979 }
 0xa4a   :  { %vm1108_vm11 = vmor %vm1106_vm10, %vm1107_vm9  ;;  %v1119_v55 = vadd.f32 1.0, %v4980_v54 }
 0xa4b   :  { %v1103_v37 = vsub.f32 1.0, %v1102_v36 }
 0xa4c   :  { %4981 = vrcp.f32 %v1119_v55  ;;  %v1131_v60 = vand.u32 2147483648, %v1119_v55  ;;  %vm1125_vm15 = vweird.f32 %v1119_v55  ;;  %v1129_v62 = vand.u32 2147483647, %v1119_v55 }
 0xa4d   :  { %v1104_v38 = vmul.f32 %v4978_v35, %v1103_v37 }
 0xa4e   :  { %v1132_v0 = vor.u32 1.1754944e-38, %v1131_v60  ;;  %vm1130_vm2 = vcmp.eq.f32.partialorder %v1129_v62, 8.507059e+37 }
 0xa4f   :  { %v1105_v39 = vadd.f32 %v4978_v35, %v1104_v38 }
 0xa51   :  { %v1109_v42 = vsel %vm1108_vm11, %v4978_v35, %v1105_v39 }
 0xa52   :  { %v1114_v45 = vsel %vm1111_vm12, %v1113_v43, %v1109_v42  ;;  %v4982_v56 = vpop.eup %4981 }
 0xa53   :  { %v1121_v24 = vmul.f32 %v4982_v56, %v1119_v55  ;;  %vm1126_vm14 = vweird.f32 %v4982_v56 }
 0xa54   :  { %vm1127_vm1 = vmor %vm1125_vm15, %vm1126_vm14 }
 0xa55   :  { %v1122_v57 = vsub.f32 1.0, %v1121_v24 }
 0xa57   :  { %v1123_v58 = vmul.f32 %v4982_v56, %v1122_v57 }
 0xa59   :  { %v1124_v59 = vadd.f32 %v4982_v56, %v1123_v58 }
 0xa5b   :  { %v1128_v63 = vsel %vm1127_vm1, %v4982_v56, %v1124_v59 }
 0xa5c   :  { %v1133_v1 = vsel %vm1130_vm2, %v1132_v0, %v1128_v63 }
 0xa5d   :  { %v1158_v12 = vmul.f32 %v1156_v10, %v1133_v1 }
 0xab1   :  { %v1161_v44 = vpop.permute.xlu1 %1160 }
 0xab2   :  { %v1163_v49 = vmul.f32 %v1161_v44, %v1114_v45 }
 0xab4   :  { %1165 = vrot.lane.b32.xlu0 %v1163_v49, %s5724_s27 }
 0xab9   :  { %v1094_v17 = vpop.permute.xlu1 %1093 }
 0xaba   :  { %v1096_v18 = vadd.f32 %v1094_v17, %v6050_v22 }
 0xabc   :  { %v1136_v19 = vsub.f32 0.0, %v1096_v18 }
 0xabe   :  { %v1137_v21 = vmul.f32 1.442695, %v1136_v19 }
 0xb26   :  { %v1166_v13 = vpop.permute.xlu0 %1165 }
 0xb27   :  { %v6163_v15 = vadd.f32 %v1166_v13, %v1158_v12 }
 0xb29   :  { %4983 = vtanh.f32 %v6163_v15 }
 0xb2a   :  { %4985 = vpow2.f32 %v1137_v21  ;;  %v1336_v21 = vrot.slane %v6163_v15, 6 }
 0xb2f   :  { %v4984_v16 = vpop.eup %4983 }
 0xb30   :  { %1171 = vrot.lane.b32.xlu2 %v4984_v16, %s5723_s21  ;;  %v4986_v23 = vpop.eup %4985 }
 0xb31   :  { %v1139_v25 = vadd.f32 1.0, %v4986_v23 }
 0xb33   :  { %4987 = vrcp.f32 %v1139_v25  ;;  %v1151_v32 = vand.u32 2147483648, %v1139_v25  ;;  %vm1145_vm4 = vweird.f32 %v1139_v25  ;;  %v1149_v33 = vand.u32 2147483647, %v1139_v25 }
 0xb35   :  { %v1152_v61 = vor.u32 1.1754944e-38, %v1151_v32  ;;  %vm1150_vm6 = vcmp.eq.f32.partialorder %v1149_v33, 8.507059e+37 }
 0xb39   :  { %v4988_v26 = vpop.eup %4987 }
 0xb3a   :  { %v1141_v46 = vmul.f32 %v4988_v26, %v1139_v25  ;;  %vm1146_vm3 = vweird.f32 %v4988_v26 }
 0xb3b   :  { %vm1147_vm5 = vmor %vm1145_vm4, %vm1146_vm3 }
 0xb3c   :  { %v1142_v29 = vsub.f32 1.0, %v1141_v46 }
 0xb3e   :  { %v1143_v30 = vmul.f32 %v4988_v26, %v1142_v29 }
 0xb40   :  { %v1144_v31 = vadd.f32 %v4988_v26, %v1143_v30 }
 0xb42   :  { %v1148_v34 = vsel %vm1147_vm5, %v4988_v26, %v1144_v31 }
 0xb43   :  { %v1153_v22 = vsel %vm1150_vm6, %v1152_v61, %v1148_v34 }
 0xb8a   :  { %v1172_v35 = vpop.permute.xlu2 %1171 }
 0xb8b   :  { %v1174_v36 = vmul.f32 %v1172_v35, %v1153_v22 }
 0xb8d   :  { %v1176_v37 = vrot.slane %v1174_v36, 6 }
 0xb8f   :  { %1177 = vrot.lane.b32.xlu0 %v1176_v37, %s5726_s17 }
 0xc01   :  { %v6169_v38 = vpop.permute.xlu0 %1177 }
 0xc02   :  { %4739 = vmatmul.msk.f32.vlgmr.msra.gmra.mxu3 %vm443_vm13, %v6169_v38  ;;  %4740 = vmatmul.msk.f32.vlgmr.msrb.gmra.mxu0 %vm443_vm13, %v6169_v38 }
 0xc03   :  { %4741 = vmatmul.msk.f32.vlgmr.msra.gmra.mxu1 %vm443_vm13, %v6169_v38  ;;  %4742 = vmatmul.msk.f32.vlgmr.msra.gmra.mxu2 %vm443_vm13, %v6169_v38 }
 0xc04   :  { %1560 = vmatpush.msra.mxu3 %v5991_v2  ;;  %1584 = vmatpush.msrb.mxu0 %v6005_v6  ;;  %v6191_v2 = vadd.f32 %v6047_v20, %v6119_v48 }
 0xc05   :  { %1610 = vmatpush.msra.mxu1 %v5994_v3  ;;  %1636 = vmatpush.msra.mxu2 %v6008_v7 }
 0xc06   :  { %1561 = vmatpush.msra.mxu3 %v5997_v4  ;;  %1585 = vmatpush.msrb.mxu0 %v6013_v8 }
 0xc07   :  { %1611 = vmatpush.msra.mxu1 %v6002_v5  ;;  %1637 = vmatpush.msra.mxu2 %v6016_v9 }
 0xc7f   :  { %v1219_v39 = vpop.f32.mrf.mxu0 }
 0xc80   :  { %v1244_v40 = vpop.f32.mrf.mxu1  ;;  %1223 = vrot.lane.b32.xlu0 %v1219_v39, %s5724_s27 }
 0xc81   :  { %1248 = vrot.lane.b32.xlu1 %v1244_v40, %s5723_s21 }
 0xc85   :  { %v1198_v7 = vpop.f32.mrf.mxu3 }
 0xc86   :  { %v1269_v5 = vpop.f32.mrf.mxu2  ;;  %v1201_v8 = vadd.f32 %v1198_v7, %v6191_v2 }
 0xc88   :  { %v1277_v9 = vsub.f32 0.0, %v1201_v8  ;;  %v5199_v8 = vld [vmem:[%s6936_s13 + $0x8] sm:$0xff] }
 0xc8a   :  { %v1278_v41 = vmul.f32 1.442695, %v1277_v9  ;;  %v5200_v9 = vld [vmem:[%s6936_s13 + $0x18] sm:$0xff] }
 0xcf2   :  { %v1224_v24 = vpop.permute.xlu0 %1223 }
 0xcf3   :  { %v1249_v3 = vpop.permute.xlu1 %1248  ;;  %v1226_v57 = vadd.f32 %v1224_v24, %v6191_v2 }
 0xcf4   :  { %v1251_v6 = vadd.f32 %v1249_v3, %v6191_v2 }
 0xcf5   :  { %v1296_v58 = vsub.f32 0.0, %v1226_v57 }
 0xcf6   :  { %4989 = vtanh.f32 %v1251_v6 }
 0xcf7   :  { %4991 = vpow2.f32 %v1278_v41  ;;  %v1297_v59 = vmul.f32 1.442695, %v1296_v58  ;;  %v5201_v41 = vld [vmem:[%s6936_s13 + $0x28] sm:$0xff] }
 0xcfc   :  { %v4990_v4 = vpop.eup %4989 }
 0xcfd   :  { %1340 = vrot.lane.b32.xlu2 %v4990_v4, %s5725_s2  ;;  %v4992_v42 = vpop.eup %4991 }
 0xcfe   :  { %v1280_v43 = vadd.f32 1.0, %v4992_v42  ;;  %v5202_v42 = vld [vmem:[%s6936_s13 + $0x38] sm:$0xff] }
 0xd00   :  { %4993 = vrcp.f32 %v1280_v43  ;;  %v1292_v50 = vand.u32 2147483648, %v1280_v43  ;;  %vm1286_vm8 = vweird.f32 %v1280_v43  ;;  %v1290_v51 = vand.u32 2147483647, %v1280_v43 }
 0xd01   :  { %4995 = vpow2.f32 %v1297_v59 }
 0xd02   :  { %v1293_v53 = vor.u32 1.1754944e-38, %v1292_v50  ;;  %vm1291_vm10 = vcmp.eq.f32.partialorder %v1290_v51, 8.507059e+37 }
 0xd05   :  { %1273 = vrot.lane.b32.xlu2 %v1269_v5, %s5722_s7 }
 0xd06   :  { %v4994_v20 = vpop.eup %4993 }
 0xd07   :  { %v1282_v48 = vmul.f32 %v4994_v20, %v1280_v43  ;;  %vm1287_vm7 = vweird.f32 %v4994_v20  ;;  %v4996_v60 = vpop.eup %4995  ;;  %v5203_v43 = vld [vmem:[%s6936_s13] sm:$0xff] }
 0xd08   :  { %vm1288_vm9 = vmor %vm1286_vm8, %vm1287_vm7  ;;  %v1299_v62 = vadd.f32 1.0, %v4996_v60 }
 0xd09   :  { %v1283_v44 = vsub.f32 1.0, %v1282_v48  ;;  %v5205_v48 = vld [vmem:[%s6936_s13 + $0x20] sm:$0xff] }
 0xd0a   :  { %4997 = vrcp.f32 %v1299_v62  ;;  %v1311_v13 = vand.u32 2147483648, %v1299_v62  ;;  %vm1305_vm12 = vweird.f32 %v1299_v62  ;;  %v1309_v16 = vand.u32 2147483647, %v1299_v62 }
 0xd0b   :  { %v1284_v45 = vmul.f32 %v4994_v20, %v1283_v44  ;;  %v5206_v44 = vld [vmem:[%s6936_s13 + $0x30] sm:$0xff] }
 0xd0c   :  { %v1312_v18 = vor.u32 1.1754944e-38, %v1311_v13  ;;  %vm1310_vm15 = vcmp.eq.f32.partialorder %v1309_v16, 8.507059e+37 }
 0xd0d   :  { %v1285_v49 = vadd.f32 %v4994_v20, %v1284_v45 }
 0xd0f   :  { %v1289_v52 = vsel %vm1288_vm9, %v4994_v20, %v1285_v49  ;;  %v5204_v20 = vld [vmem:[%s6936_s13 + $0x10] sm:$0xff] }
 0xd10   :  { %v1294_v55 = vsel %vm1291_vm10, %v1293_v53, %v1289_v52  ;;  %v4998_v63 = vpop.eup %4997 }
 0xd11   :  { %v1301_v0 = vmul.f32 %v4998_v63, %v1299_v62  ;;  %vm1306_vm11 = vweird.f32 %v4998_v63 }
 0xd12   :  { %vm1307_vm14 = vmor %vm1305_vm12, %vm1306_vm11 }
 0xd13   :  { %v1302_v1 = vsub.f32 1.0, %v1301_v0 }
 0xd15   :  { %v1303_v10 = vmul.f32 %v4998_v63, %v1302_v1 }
 0xd17   :  { %v1304_v12 = vadd.f32 %v4998_v63, %v1303_v10 }
 0xd19   :  { %v1308_v17 = vsel %vm1307_vm14, %v4998_v63, %v1304_v12 }
 0xd1a   :  { %v1313_v19 = vsel %vm1310_vm15, %v1312_v18, %v1308_v17 }
 0xd1b   :  { %v1338_v23 = vmul.f32 %v1336_v21, %v1313_v19 }
 0xd57   :  { %v1341_v54 = vpop.permute.xlu2 %1340 }
 0xd58   :  { %v1343_v56 = vmul.f32 %v1341_v54, %v1294_v55 }
 0xd5a   :  { %1345 = vrot.lane.b32.xlu1 %v1343_v56, %s5724_s27 }
 0xd5f   :  { %v1274_v29 = vpop.permute.xlu2 %1273 }
 0xd60   :  { %v1276_v30 = vadd.f32 %v1274_v29, %v6191_v2 }
 0xd62   :  { %v1316_v31 = vsub.f32 0.0, %v1276_v30 }
 0xd64   :  { %v1317_v32 = vmul.f32 1.442695, %v1316_v31 }
 0xdcc   :  { %v1346_v25 = vpop.permute.xlu1 %1345 }
 0xdcd   :  { %v6200_v26 = vadd.f32 %v1346_v25, %v1338_v23 }
 0xdcf   :  { %4999 = vtanh.f32 %v6200_v26 }
 0xdd0   :  { %5001 = vpow2.f32 %v1317_v32 }
 0xdd5   :  { %v5000_v46 = vpop.eup %4999 }
 0xdd6   :  { %1351 = vrot.lane.b32.xlu0 %v5000_v46, %s5723_s21  ;;  %v5002_v33 = vpop.eup %5001 }
 0xdd7   :  { %v1319_v34 = vadd.f32 1.0, %v5002_v33 }
 0xdd9   :  { %5003 = vrcp.f32 %v1319_v34  ;;  %v1331_v37 = vand.u32 2147483648, %v1319_v34  ;;  %vm1325_vm2 = vweird.f32 %v1319_v34  ;;  %v1329_v39 = vand.u32 2147483647, %v1319_v34 }
 0xddb   :  { %v1332_v3 = vor.u32 1.1754944e-38, %v1331_v37  ;;  %vm1330_vm4 = vcmp.eq.f32.partialorder %v1329_v39, 8.507059e+37 }
 0xddf   :  { %v5004_v61 = vpop.eup %5003 }
 0xde0   :  { %v1321_v15 = vmul.f32 %v5004_v61, %v1319_v34  ;;  %vm1326_vm1 = vweird.f32 %v5004_v61 }
 0xde1   :  { %vm1327_vm3 = vmor %vm1325_vm2, %vm1326_vm1 }
 0xde2   :  { %v1322_v22 = vsub.f32 1.0, %v1321_v15 }
 0xde4   :  { %v1323_v35 = vmul.f32 %v5004_v61, %v1322_v22 }
 0xde6   :  { %v1324_v36 = vadd.f32 %v5004_v61, %v1323_v35 }
 0xde8   :  { %v1328_v40 = vsel %vm1327_vm3, %v5004_v61, %v1324_v36 }
 0xde9   :  { %v1333_v6 = vsel %vm1330_vm4, %v1332_v3, %v1328_v40 }
 0xe48   :  { %v1352_v4 = vpop.permute.xlu0 %1351 }
 0xe49   :  { %v6205_v5 = vmul.f32 %v1352_v4, %v1333_v6  ;;  %v1521_v6 = vrot.slane %v6200_v26, 6 }
 0xe4b   :  { %1356 = vrot.lane.b32.xlu1 %v6205_v5, %s5726_s17 }
 0xebd   :  { %v6209_v7 = vpop.permute.xlu1 %1356 }
 0xebe   :  { %4743 = vmatmul.msk.f32.vlgmr.msrb.gmra.mxu3 %vm443_vm13, %v6209_v7  ;;  %4744 = vmatmul.msk.f32.vlgmr.msra.gmra.mxu0 %vm443_vm13, %v6209_v7 }
 0xebf   :  { %4745 = vmatmul.msk.f32.vlgmr.msrb.gmra.mxu1 %vm443_vm13, %v6209_v7  ;;  %4746 = vmatmul.msk.f32.vlgmr.msrb.gmra.mxu2 %vm443_vm13, %v6209_v7 }
 0xec0   :  { %1746 = vmatpush.msrb.mxu3 %v5199_v8  ;;  %1770 = vmatpush.msra.mxu0 %v5200_v9 }
 0xec1   :  { %1796 = vmatpush.msrb.mxu1 %v5201_v41  ;;  %1822 = vmatpush.msrb.mxu2 %v5202_v42 }
 0xec2   :  { %1747 = vmatpush.msrb.mxu3 %v5203_v43  ;;  %1771 = vmatpush.msra.mxu0 %v5204_v20 }
 0xec3   :  { %1797 = vmatpush.msrb.mxu1 %v5205_v48  ;;  %1823 = vmatpush.msrb.mxu2 %v5206_v44 }
 0xf3b   :  { %v1401_v45 = vpop.f32.mrf.mxu0 }
 0xf3c   :  { %v1405_v49 = vrot.slane %v1401_v45, 6  ;;  %v1427_v50 = vpop.f32.mrf.mxu1 }
 0xf3d   :  { %v1431_v51 = vrot.slane %v1427_v50, 6 }
 0xf3e   :  { %1406 = vrot.lane.b32.xlu1 %v1405_v49, %s5724_s27 }
 0xf3f   :  { %1432 = vrot.lane.b32.xlu2 %v1431_v51, %s5723_s21 }
 0xf41   :  { %v1377_v24 = vpop.f32.mrf.mxu3 }
 0xf42   :  { %v1453_v55 = vpop.f32.mrf.mxu2  ;;  %v1381_v57 = vrot.slane %v1377_v24, 6 }
 0xf43   :  { %v1457_v56 = vrot.slane %v1453_v55, 6 }
 0xf44   :  { %v1383_v58 = vadd.f32 %v1381_v57, %v6191_v2 }
 0xf46   :  { %v1462_v59 = vsub.f32 0.0, %v1383_v58 }
 0xf48   :  { %v1463_v60 = vmul.f32 1.442695, %v1462_v59 }
 0xf99   :  { %v1433_v52 = vpop.permute.xlu2 %1432 }
 0xf9a   :  { %v1435_v53 = vadd.f32 %v1433_v52, %v6191_v2 }
 0xf9c   :  { %5005 = vtanh.f32 %v1435_v53 }
 0xf9d   :  { %5007 = vpow2.f32 %v1463_v60 }
 0xfa2   :  { %v5006_v54 = vpop.eup %5005 }
 0xfa3   :  { %1525 = vrot.lane.b32.xlu0 %v5006_v54, %s5725_s2  ;;  %v5008_v62 = vpop.eup %5007 }
 0xfa4   :  { %v1465_v63 = vadd.f32 1.0, %v5008_v62 }
 0xfa6   :  { %5009 = vrcp.f32 %v1465_v63  ;;  %v1477_v16 = vand.u32 2147483648, %v1465_v63  ;;  %vm1471_vm6 = vweird.f32 %v1465_v63  ;;  %v1475_v17 = vand.u32 2147483647, %v1465_v63 }
 0xfa8   :  { %v1478_v19 = vor.u32 1.1754944e-38, %v1477_v16  ;;  %vm1476_vm8 = vcmp.eq.f32.partialorder %v1475_v17, 8.507059e+37 }
 0xfab   :  { %1458 = vrot.lane.b32.xlu0 %v1457_v56, %s5722_s7 }
 0xfac   :  { %v5010_v0 = vpop.eup %5009 }
 0xfad   :  { %v1467_v1 = vmul.f32 %v5010_v0, %v1465_v63  ;;  %vm1472_vm5 = vweird.f32 %v5010_v0 }
 0xfae   :  { %vm1473_vm7 = vmor %vm1471_vm6, %vm1472_vm5 }
 0xfaf   :  { %v1468_v10 = vsub.f32 1.0, %v1467_v1 }
 0xfb0   :  { %v1407_v46 = vpop.permute.xlu1 %1406 }
 0xfb1   :  { %v1469_v12 = vmul.f32 %v5010_v0, %v1468_v10  ;;  %v1409_v29 = vadd.f32 %v1407_v46, %v6191_v2 }
 0xfb3   :  { %v1470_v13 = vadd.f32 %v5010_v0, %v1469_v12  ;;  %v1481_v30 = vsub.f32 0.0, %v1409_v29 }
 0xfb5   :  { %v1474_v18 = vsel %vm1473_vm7, %v5010_v0, %v1470_v13  ;;  %v1482_v31 = vmul.f32 1.442695, %v1481_v30 }
 0xfb6   :  { %v1479_v23 = vsel %vm1476_vm8, %v1478_v19, %v1474_v18 }
 0xfb7   :  { %5011 = vpow2.f32 %v1482_v31 }
 0xfbd   :  { %v5012_v32 = vpop.eup %5011 }
 0xfbe   :  { %v1484_v33 = vadd.f32 1.0, %v5012_v32 }
 0xfc0   :  { %5013 = vrcp.f32 %v1484_v33  ;;  %v1496_v36 = vand.u32 2147483648, %v1484_v33  ;;  %vm1490_vm10 = vweird.f32 %v1484_v33  ;;  %v1494_v37 = vand.u32 2147483647, %v1484_v33 }
 0xfc2   :  { %v1497_v40 = vor.u32 1.1754944e-38, %v1496_v36  ;;  %vm1495_vm12 = vcmp.eq.f32.partialorder %v1494_v37, 8.507059e+37 }
 0xfc6   :  { %v5014_v34 = vpop.eup %5013 }
 0xfc7   :  { %v1486_v61 = vmul.f32 %v5014_v34, %v1484_v33  ;;  %vm1491_vm9 = vweird.f32 %v5014_v34 }
 0xfc8   :  { %vm1492_vm11 = vmor %vm1490_vm10, %vm1491_vm9 }
 0xfc9   :  { %v1487_v15 = vsub.f32 1.0, %v1486_v61 }
 0xfcb   :  { %v1488_v22 = vmul.f32 %v5014_v34, %v1487_v15 }
 0xfcd   :  { %v1489_v35 = vadd.f32 %v5014_v34, %v1488_v22 }
 0xfcf   :  { %v1493_v39 = vsel %vm1492_vm11, %v5014_v34, %v1489_v35 }
 0xfd0   :  { %v1498_v3 = vsel %vm1495_vm12, %v1497_v40, %v1493_v39 }
 0xfd1   :  { %v1523_v4 = vmul.f32 %v1521_v6, %v1498_v3 }
0x1015   :  { %v1526_v21 = vpop.permute.xlu0 %1525 }
0x1016   :  { %v1528_v25 = vmul.f32 %v1526_v21, %v1479_v23 }
0x1018   :  { %1530 = vrot.lane.b32.xlu2 %v1528_v25, %s5724_s27 }
0x101d   :  { %v1459_v42 = vpop.permute.xlu0 %1458 }
0x101e   :  { %v1461_v43 = vadd.f32 %v1459_v42, %v6191_v2 }
0x1020   :  { %v1501_v20 = vsub.f32 0.0, %v1461_v43 }
0x1022   :  { %v1502_v48 = vmul.f32 1.442695, %v1501_v20 }
0x1072   :  { %v1531_v8 = vpop.permute.xlu2 %1530 }
0x1073   :  { %v6236_v9 = vadd.f32 %v1531_v8, %v1523_v4 }
0x1075   :  { %5015 = vtanh.f32 %v6236_v9 }
0x1076   :  { %5017 = vpow2.f32 %v1502_v48 }
0x107b   :  { %v5016_v41 = vpop.eup %5015 }
0x107c   :  { %1536 = vrot.lane.b32.xlu1 %v5016_v41, %s5723_s21  ;;  %v5018_v44 = vpop.eup %5017 }
0x107d   :  { %v1504_v45 = vadd.f32 1.0, %v5018_v44 }
0x107f   :  { %5019 = vrcp.f32 %v1504_v45  ;;  %v1516_v53 = vand.u32 2147483648, %v1504_v45  ;;  %vm1510_vm15 = vweird.f32 %v1504_v45  ;;  %v1514_v54 = vand.u32 2147483647, %v1504_v45 }
0x1081   :  { %v1517_v56 = vor.u32 1.1754944e-38, %v1516_v53  ;;  %vm1515_vm2 = vcmp.eq.f32.partialorder %v1514_v54, 8.507059e+37 }
0x1085   :  { %v5020_v49 = vpop.eup %5019 }
0x1086   :  { %v1506_v26 = vmul.f32 %v5020_v49, %v1504_v45  ;;  %vm1511_vm14 = vweird.f32 %v5020_v49 }
0x1087   :  { %vm1512_vm1 = vmor %vm1510_vm15, %vm1511_vm14 }
0x1088   :  { %v1507_v50 = vsub.f32 1.0, %v1506_v26 }
0x108a   :  { %v1508_v51 = vmul.f32 %v5020_v49, %v1507_v50 }
0x108c   :  { %v1509_v52 = vadd.f32 %v5020_v49, %v1508_v51 }
0x108e   :  { %v1513_v55 = vsel %vm1512_vm1, %v5020_v49, %v1509_v52  ;;  %v1707_v52 = vrot.slane %v6236_v9, 6 }
0x108f   :  { %v1518_v24 = vsel %vm1515_vm2, %v1517_v56, %v1513_v55 }
0x10ee   :  { %v1537_v57 = vpop.permute.xlu1 %1536 }
0x10ef   :  { %v1539_v58 = vmul.f32 %v1537_v57, %v1518_v24 }
0x10f1   :  { %v1541_v59 = vrot.slane %v1539_v58, 2 }
0x10f3   :  { %1542 = vrot.lane.b32.xlu2 %v1541_v59, %s5726_s17 }
0x114d   :  { %v6242_v60 = vpop.permute.xlu2 %1542 }
0x114e   :  { %4747 = vmatmul.msk.f32.vlgmr.msra.gmra.mxu3 %vm443_vm13, %v6242_v60  ;;  %4748 = vmatmul.msk.f32.vlgmr.msrb.gmra.mxu0 %vm443_vm13, %v6242_v60 }
0x114f   :  { %4749 = vmatmul.msk.f32.vlgmr.msra.gmra.mxu1 %vm443_vm13, %v6242_v60  ;;  %4750 = vmatmul.msk.f32.vlgmr.msra.gmra.mxu2 %vm443_vm13, %v6242_v60 }
0x11cb   :  { %v1587_v62 = vpop.f32.mrf.mxu0 }
0x11cc   :  { %v1591_v63 = vrot.slane %v1587_v62, 4  ;;  %v1613_v0 = vpop.f32.mrf.mxu1 }
0x11cd   :  { %v1617_v1 = vrot.slane %v1613_v0, 4 }
0x11ce   :  { %1592 = vrot.lane.b32.xlu2 %v1591_v63, %s5724_s27 }
0x11cf   :  { %1618 = vrot.lane.b32.xlu0 %v1617_v1, %s5723_s21 }
0x11d1   :  { %v1563_v18 = vpop.f32.mrf.mxu3 }
0x11d2   :  { %v1639_v16 = vpop.f32.mrf.mxu2  ;;  %v1567_v19 = vrot.slane %v1563_v18, 4 }
0x11d3   :  { %v1643_v17 = vrot.slane %v1639_v16, 4 }
0x11d4   :  { %v1569_v21 = vadd.f32 %v1567_v19, %v6191_v2 }
0x11d6   :  { %v1648_v23 = vsub.f32 0.0, %v1569_v21 }
0x11d8   :  { %v1649_v25 = vmul.f32 1.442695, %v1648_v23 }
0x1228   :  { %v1593_v40 = vpop.permute.xlu2 %1592 }
0x1229   :  { %v1595_v3 = vadd.f32 %v1593_v40, %v6191_v2  ;;  %v6325_v40 = vld [vmem:[%s6938_s10 + $0x30] sm:$0xff] }
0x122b   :  { %v1667_v6 = vsub.f32 0.0, %v1595_v3 }
0x122d   :  { %v1668_v4 = vmul.f32 1.442695, %v1667_v6 }
0x1241   :  { %v1619_v10 = vpop.permute.xlu0 %1618 }
0x1242   :  { %v1621_v12 = vadd.f32 %v1619_v10, %v6191_v2 }
0x1244   :  { %5021 = vtanh.f32 %v1621_v12 }
0x1245   :  { %5023 = vpow2.f32 %v1649_v25 }
0x124a   :  { %v5022_v13 = vpop.eup %5021 }
0x124b   :  { %1711 = vrot.lane.b32.xlu1 %v5022_v13, %s5725_s2  ;;  %v5024_v46 = vpop.eup %5023 }
0x124c   :  { %v1651_v29 = vadd.f32 1.0, %v5024_v46  ;;  %v6268_v46 = vld [vmem:[%s6938_s10 + $0x18] sm:$0xff] }
0x124d   :  { %1992 = vmatpush.msra.mxu1 %v6268_v46 }
0x124e   :  { %5025 = vrcp.f32 %v1651_v29  ;;  %v1663_v61 = vand.u32 2147483648, %v1651_v29  ;;  %vm1657_vm4 = vweird.f32 %v1651_v29  ;;  %v1661_v15 = vand.u32 2147483647, %v1651_v29 }
0x124f   :  { %5027 = vpow2.f32 %v1668_v4 }
0x1250   :  { %v1664_v35 = vor.u32 1.1754944e-38, %v1663_v61  ;;  %vm1662_vm6 = vcmp.eq.f32.partialorder %v1661_v15, 8.507059e+37  ;;  %v1912_v61 = vld [vmem:[#allocation9] sm:$0xff] }
0x1251   :  { %v6284_v15 = vld [vmem:[%s6938_s10 + $0x8] sm:$0xff] }
0x1252   :  { %1968 = vmatpush.msrb.mxu0 %v6284_v15 }
0x1253   :  { %1644 = vrot.lane.b32.xlu1 %v1643_v17, %s5722_s7 }
0x1254   :  { %v5026_v30 = vpop.eup %5025 }
0x1255   :  { %v1653_v31 = vmul.f32 %v5026_v30, %v1651_v29  ;;  %vm1658_vm3 = vweird.f32 %v5026_v30  ;;  %v5028_v8 = vpop.eup %5027  ;;  %v6271_v29 = vld [vmem:[%s6938_s10 + $0x28] sm:$0xff] }
0x1256   :  { %vm1659_vm5 = vmor %vm1657_vm4, %vm1658_vm3  ;;  %v1670_v41 = vadd.f32 1.0, %v5028_v8  ;;  %2018 = vmatpush.msra.mxu2 %v6271_v29 }
0x1257   :  { %v1654_v32 = vsub.f32 1.0, %v1653_v31  ;;  %v6279_v31 = vld [vmem:[%s6938_s10 + $0x20] sm:$0xff] }
0x1258   :  { %5029 = vrcp.f32 %v1670_v41  ;;  %v1682_v45 = vand.u32 2147483648, %v1670_v41  ;;  %vm1676_vm8 = vweird.f32 %v1670_v41  ;;  %v1680_v49 = vand.u32 2147483647, %v1670_v41  ;;  %2019 = vmatpush.msra.mxu2 %v6279_v31 }
0x1259   :  { %v1655_v33 = vmul.f32 %v5026_v30, %v1654_v32  ;;  %v1915_v32 = vld [vmem:[#allocation9 + $0x18] sm:$0xff] }
0x125a   :  { %v1683_v50 = vor.u32 1.1754944e-38, %v1682_v45  ;;  %vm1681_vm10 = vcmp.eq.f32.partialorder %v1680_v49, 8.507059e+37  ;;  %1932 = vmatpush.msra.mxu3 %v1915_v32 }
0x125b   :  { %v1656_v34 = vadd.f32 %v5026_v30, %v1655_v33  ;;  %v1914_v33 = vld [vmem:[#allocation9 + $0x10] sm:$0xff] }
0x125c   :  { %1933 = vmatpush.msra.mxu3 %v1914_v33 }
0x125d   :  { %v1660_v22 = vsel %vm1659_vm5, %v5026_v30, %v1656_v34  ;;  %v6274_v30 = vld [vmem:[%s6938_s10 + $0x10] sm:$0xff] }
0x125e   :  { %v1665_v37 = vsel %vm1662_vm6, %v1664_v35, %v1660_v22  ;;  %v5030_v42 = vpop.eup %5029  ;;  %1993 = vmatpush.msra.mxu1 %v6274_v30  ;;  %v1913_v34 = vld [vmem:[#allocation9 + $0x8] sm:$0xff]  ;;  %v6287_v22 = vld [vmem:[%s6938_s10] sm:$0xff] }
0x125f   :  { %v1672_v43 = vmul.f32 %v5030_v42, %v1670_v41  ;;  %vm1677_vm7 = vweird.f32 %v5030_v42  ;;  %1934 = vmatpush.msra.mxu3 %v1913_v34  ;;  %1969 = vmatpush.msrb.mxu0 %v6287_v22 }
0x1260   :  { %vm1678_vm9 = vmor %vm1676_vm8, %vm1677_vm7 }
0x1261   :  { %v1673_v20 = vsub.f32 1.0, %v1672_v43  ;;  %1935 = vmatpush.msra.mxu3 %v1912_v61 }
0x1263   :  { %v1674_v48 = vmul.f32 %v5030_v42, %v1673_v20 }
0x1265   :  { %v1675_v44 = vadd.f32 %v5030_v42, %v1674_v48 }
0x1267   :  { %v1679_v26 = vsel %vm1678_vm9, %v5030_v42, %v1675_v44  ;;  %v4915_v42 = vld [vmem:[#allocation10] ss:$0 sm:$0xff] }
0x1268   :  { %v1684_v51 = vsel %vm1681_vm10, %v1683_v50, %v1679_v26 }
0x1269   :  { %v1709_v53 = vmul.f32 %v1707_v52, %v1684_v51 }
0x12bd   :  { %v1712_v36 = vpop.permute.xlu1 %1711 }
0x12be   :  { %v1714_v39 = vmul.f32 %v1712_v36, %v1665_v37  ;;  %v5207_v36 = vld [vmem:[%s6937_s18] sm:$0xff]  ;;  %v5208_v37 = vld [vmem:[%s6937_s18 + $0x8] sm:$0xff] }
0x12c0   :  { %1716 = vrot.lane.b32.xlu0 %v1714_v39, %s5724_s27  ;;  %v6321_v39 = vld [vmem:[%s6938_s10 + $0x38] sm:$0xff] }
0x12c5   :  { %v1645_v24 = vpop.permute.xlu1 %1644 }
0x12c6   :  { %v1647_v57 = vadd.f32 %v1645_v24, %v6191_v2 }
0x12c8   :  { %v1687_v58 = vsub.f32 0.0, %v1647_v57 }
0x12ca   :  { %v1688_v59 = vmul.f32 1.442695, %v1687_v58 }
0x1332   :  { %v1717_v54 = vpop.permute.xlu0 %1716 }
0x1333   :  { %v6261_v55 = vadd.f32 %v1717_v54, %v1709_v53 }
0x1335   :  { %5031 = vtanh.f32 %v6261_v55 }
0x1336   :  { %5033 = vpow2.f32 %v1688_v59 }
0x133b   :  { %v5032_v56 = vpop.eup %5031 }
0x133c   :  { %1722 = vrot.lane.b32.xlu2 %v5032_v56, %s5723_s21  ;;  %v5034_v62 = vpop.eup %5033 }
0x133d   :  { %v1690_v63 = vadd.f32 1.0, %v5034_v62 }
0x133f   :  { %5035 = vrcp.f32 %v1690_v63  ;;  %v1702_v13 = vand.u32 2147483648, %v1690_v63  ;;  %vm1696_vm12 = vweird.f32 %v1690_v63  ;;  %v1700_v16 = vand.u32 2147483647, %v1690_v63 }
0x1341   :  { %v1703_v18 = vor.u32 1.1754944e-38, %v1702_v13  ;;  %vm1701_vm15 = vcmp.eq.f32.partialorder %v1700_v16, 8.507059e+37 }
0x1345   :  { %v5036_v0 = vpop.eup %5035 }
0x1346   :  { %v1692_v9 = vmul.f32 %v5036_v0, %v1690_v63  ;;  %vm1697_vm11 = vweird.f32 %v5036_v0 }
0x1347   :  { %vm1698_vm14 = vmor %vm1696_vm12, %vm1697_vm11 }
0x1348   :  { %v1693_v1 = vsub.f32 1.0, %v1692_v9 }
0x134a   :  { %v1694_v10 = vmul.f32 %v5036_v0, %v1693_v1 }
0x134c   :  { %v1695_v12 = vadd.f32 %v5036_v0, %v1694_v10 }
0x134e   :  { %v1699_v17 = vsel %vm1698_vm14, %v5036_v0, %v1695_v12 }
0x134f   :  { %v1704_v19 = vsel %vm1701_vm15, %v1703_v18, %v1699_v17 }
0x1396   :  { %v1723_v21 = vpop.permute.xlu2 %1722 }
0x1397   :  { %v1725_v23 = vmul.f32 %v1723_v21, %v1704_v19 }
0x1399   :  { %v1727_v25 = vrot.slane %v1725_v23, 4 }
0x139b   :  { %1728 = vrot.lane.b32.xlu0 %v1727_v25, %s5726_s17 }
0x140d   :  { %v6291_v35 = vpop.permute.xlu0 %1728 }
0x140e   :  { %4751 = vmatmul.msk.f32.vlgmr.msrb.gmra.mxu3 %vm443_vm13, %v6291_v35  ;;  %4752 = vmatmul.msk.f32.vlgmr.msra.gmra.mxu0 %vm443_vm13, %v6291_v35 }
0x140f   :  { %4753 = vmatmul.msk.f32.vlgmr.msrb.gmra.mxu1 %vm443_vm13, %v6291_v35  ;;  %4754 = vmatmul.msk.f32.vlgmr.msrb.gmra.mxu2 %vm443_vm13, %v6291_v35 }
0x1410   :  { %2151 = vmatpush.msrb.mxu1 %v6284_v15  ;;  %2175 = vmatpush.msrb.mxu2 %v6268_v46 }
0x1411   :  { %2201 = vmatpush.msrb.mxu3 %v6271_v29  ;;  %2044 = vmatpush.msra.mxu0 %v6321_v39 }
0x1412   :  { %2152 = vmatpush.msrb.mxu1 %v6287_v22  ;;  %2176 = vmatpush.msrb.mxu2 %v6274_v30 }
0x1413   :  { %2202 = vmatpush.msrb.mxu3 %v6279_v31  ;;  %2045 = vmatpush.msra.mxu0 %v6325_v40 }
0x1416   :  { %4755 = vmatmul.msk.f32.vlgmr.msra.gmra.mxu3 %vm402_vm0, %v5207_v36  ;;  %1970 = vmatmul.f32.vlgmr.msrb.gmra.mxu0 %v5721_v11 }
0x1417   :  { %1994 = vmatmul.f32.vlgmr.msra.gmra.mxu1 %v5721_v11  ;;  %2020 = vmatmul.f32.vlgmr.msra.gmra.mxu2 %v5721_v11 }
0x1418   :  { %2337 = vmatpush.msra.mxu1 %v6284_v15  ;;  %2361 = vmatpush.msra.mxu2 %v6268_v46 }
0x1419   :  { %2387 = vmatpush.msra.mxu3 %v6271_v29  ;;  %2227 = vmatpush.msrb.mxu0 %v6321_v39 }
0x141a   :  { %2338 = vmatpush.msra.mxu1 %v6287_v22  ;;  %2362 = vmatpush.msra.mxu2 %v6274_v30 }
0x141b   :  { %2388 = vmatpush.msra.mxu3 %v6279_v31  ;;  %2228 = vmatpush.msrb.mxu0 %v6325_v40 }
0x141e   :  { %4756 = vmatmul.msk.f32.gmra.mxu3 %vm402_vm0, %v5208_v37  ;;  %2046 = vmatmul.f32.vlgmr.msra.gmra.mxu0 %v5721_v11 }
0x141f   :  { %2413 = vmatpush.msra.mxu0 %v6321_v39 }
0x1421   :  { %2414 = vmatpush.msra.mxu0 %v6325_v40 }
0x148b   :  { %v6343_v45 = vpop.f32.mrf.mxu0 }
0x148c   :  { %v6333_v3 = vpop.f32.mrf.mxu1 }
0x1491   :  { %v6335_v6 = vpop.f32.mrf.mxu3 }
0x1492   :  { %v6337_v4 = vpop.f32.mrf.mxu2 }
0x1493   :  { %v1971_v52 = vpop.f32.mrf.mxu0 }
0x1494   :  { %v1995_v8 = vpop.f32.mrf.mxu1  ;;  %v1975_v24 = vrot.slane %v1971_v52, 2 }
0x1495   :  { %v1999_v41 = vrot.slane %v1995_v8, 2 }
0x1497   :  { %2000 = vrot.lane.b32.xlu0 %v1999_v41, %s5724_s27 }
0x1499   :  { %v1937_v43 = vpop.f32.mrf.mxu3 }
0x149a   :  { %v2021_v20 = vpop.f32.mrf.mxu2  ;;  %v6340_v48 = vadd.f32 %v4915_v42, %v1937_v43 }
0x149b   :  { %v2025_v44 = vrot.slane %v2021_v20, 2  ;;  %v2047_v54 = vpop.f32.mrf.mxu0 }
0x149c   :  { %v2051_v56 = vrot.slane %v2047_v54, 2 }
0x149d   :  { %2026 = vrot.lane.b32.xlu1 %v2025_v44, %s5723_s21 }
0x14a1   :  { %v1940_v49 = vpop.f32.mrf.mxu3 }
0x14a2   :  { %v6345_v26 = vadd.f32 %v4915_v42, %v1940_v49 }
0x14a4   :  { %v1977_v57 = vadd.f32 %v1975_v24, %v6345_v26 }
0x14a6   :  { %v2056_v58 = vsub.f32 0.0, %v1977_v57 }
0x14a8   :  { %v2057_v59 = vmul.f32 1.442695, %v2056_v58 }
0x1509   :  { %v2001_v25 = vpop.permute.xlu0 %2000 }
0x150a   :  { %v2003_v32 = vadd.f32 %v2001_v25, %v6345_v26 }
0x150c   :  { %v2075_v33 = vsub.f32 0.0, %v2003_v32 }
0x150e   :  { %v2076_v34 = vmul.f32 1.442695, %v2075_v33 }
0x150f   :  { %v2027_v50 = vpop.permute.xlu1 %2026 }
0x1510   :  { %v2029_v51 = vadd.f32 %v2027_v50, %v6345_v26 }
0x1512   :  { %5037 = vtanh.f32 %v2029_v51 }
0x1513   :  { %5039 = vpow2.f32 %v2057_v59 }
0x1518   :  { %v5038_v53 = vpop.eup %5037 }
0x1519   :  { %2116 = vrot.lane.b32.xlu2 %v5038_v53, %s5725_s2  ;;  %v5040_v62 = vpop.eup %5039 }
0x151a   :  { %v2059_v63 = vadd.f32 1.0, %v5040_v62 }
0x151c   :  { %5041 = vrcp.f32 %v2059_v63  ;;  %vm2065_vm1 = vweird.f32 %v2059_v63  ;;  %v2071_v12 = vand.u32 2147483648, %v2059_v63  ;;  %v2069_v16 = vand.u32 2147483647, %v2059_v63 }
0x151d   :  { %5043 = vpow2.f32 %v2076_v34 }
0x151e   :  { %v2072_v17 = vor.u32 1.1754944e-38, %v2071_v12  ;;  %vm2070_vm4 = vcmp.eq.f32.partialorder %v2069_v16, 8.507059e+37 }
0x1521   :  { %2052 = vrot.lane.b32.xlu2 %v2051_v56, %s5722_s7 }
0x1522   :  { %v5042_v0 = vpop.eup %5041 }
0x1523   :  { %v2061_v9 = vmul.f32 %v5042_v0, %v2059_v63  ;;  %vm2066_vm2 = vweird.f32 %v5042_v0  ;;  %v5044_v61 = vpop.eup %5043 }
0x1524   :  { %vm2067_vm3 = vmor %vm2065_vm1, %vm2066_vm2  ;;  %v2078_v36 = vadd.f32 1.0, %v5044_v61 }
0x1525   :  { %v2062_v1 = vsub.f32 1.0, %v2061_v9 }
0x1526   :  { %5045 = vrcp.f32 %v2078_v36  ;;  %vm2084_vm5 = vweird.f32 %v2078_v36  ;;  %v2090_v20 = vand.u32 2147483648, %v2078_v36  ;;  %v2088_v44 = vand.u32 2147483647, %v2078_v36 }
0x1527   :  { %v2063_v10 = vmul.f32 %v5042_v0, %v2062_v1 }
0x1528   :  { %v2091_v50 = vor.u32 1.1754944e-38, %v2090_v20  ;;  %vm2089_vm8 = vcmp.eq.f32.partialorder %v2088_v44, 8.507059e+37 }
0x1529   :  { %v2064_v13 = vadd.f32 %v5042_v0, %v2063_v10 }
0x152b   :  { %v2068_v18 = vsel %vm2067_vm3, %v5042_v0, %v2064_v13 }
0x152c   :  { %v2073_v21 = vsel %vm2070_vm4, %v2072_v17, %v2068_v18  ;;  %v5046_v37 = vpop.eup %5045 }
0x152d   :  { %v2080_v8 = vmul.f32 %v5046_v37, %v2078_v36  ;;  %vm2085_vm6 = vweird.f32 %v5046_v37 }
0x152e   :  { %vm2086_vm7 = vmor %vm2084_vm5, %vm2085_vm6 }
0x152f   :  { %v2081_v41 = vsub.f32 1.0, %v2080_v8 }
0x1531   :  { %v2082_v42 = vmul.f32 %v5046_v37, %v2081_v41 }
0x1533   :  { %v2083_v43 = vadd.f32 %v5046_v37, %v2082_v42 }
0x1535   :  { %v2087_v49 = vsel %vm2086_vm7, %v5046_v37, %v2083_v43 }
0x1536   :  { %v2092_v51 = vsel %vm2089_vm8, %v2091_v50, %v2087_v49 }
0x1537   :  { %v2114_v52 = vmul.f32 0.0, %v2092_v51 }
0x1573   :  { %v2117_v19 = vpop.permute.xlu2 %2116 }
0x1574   :  { %v2119_v23 = vmul.f32 %v2117_v19, %v2073_v21 }
0x1576   :  { %2121 = vrot.lane.b32.xlu1 %v2119_v23, %s5724_s27 }
0x157b   :  { %v2053_v24 = vpop.permute.xlu2 %2052 }
0x157c   :  { %v2055_v57 = vadd.f32 %v2053_v24, %v6345_v26 }
0x157e   :  { %v2095_v58 = vsub.f32 0.0, %v2055_v57 }
0x1580   :  { %v2096_v59 = vmul.f32 1.442695, %v2095_v58 }
0x15e8   :  { %v2122_v53 = vpop.permute.xlu1 %2121 }
0x15e9   :  { %v6353_v54 = vadd.f32 %v2122_v53, %v2114_v52 }
0x15eb   :  { %5047 = vtanh.f32 %v6353_v54 }
0x15ec   :  { %5049 = vpow2.f32 %v2096_v59 }
0x15f1   :  { %v5048_v56 = vpop.eup %5047 }
0x15f2   :  { %2127 = vrot.lane.b32.xlu0 %v5048_v56, %s5723_s21  ;;  %v5050_v62 = vpop.eup %5049 }
0x15f3   :  { %v2098_v63 = vadd.f32 1.0, %v5050_v62 }
0x15f5   :  { %5051 = vrcp.f32 %v2098_v63  ;;  %v2110_v13 = vand.u32 2147483648, %v2098_v63  ;;  %vm2104_vm10 = vweird.f32 %v2098_v63  ;;  %v2108_v16 = vand.u32 2147483647, %v2098_v63 }
0x15f7   :  { %v2111_v18 = vor.u32 1.1754944e-38, %v2110_v13  ;;  %vm2109_vm12 = vcmp.eq.f32.partialorder %v2108_v16, 8.507059e+37 }
0x15fb   :  { %v5052_v0 = vpop.eup %5051 }
0x15fc   :  { %v2100_v9 = vmul.f32 %v5052_v0, %v2098_v63  ;;  %vm2105_vm9 = vweird.f32 %v5052_v0 }
0x15fd   :  { %vm2106_vm11 = vmor %vm2104_vm10, %vm2105_vm9 }
0x15fe   :  { %v2101_v1 = vsub.f32 1.0, %v2100_v9 }
0x1600   :  { %v2102_v10 = vmul.f32 %v5052_v0, %v2101_v1 }
0x1602   :  { %v2103_v12 = vadd.f32 %v5052_v0, %v2102_v10 }
0x1604   :  { %v2107_v17 = vsel %vm2106_vm11, %v5052_v0, %v2103_v12 }
0x1605   :  { %v2112_v19 = vsel %vm2109_vm12, %v2111_v18, %v2107_v17 }
0x1664   :  { %v2128_v21 = vpop.permute.xlu0 %2127 }
0x1665   :  { %v2130_v23 = vmul.f32 %v2128_v21, %v2112_v19 }
0x1667   :  { %v2132_v25 = vrot.slane %v2130_v23, 6 }
0x1669   :  { %2133 = vrot.lane.b32.xlu1 %v2132_v25, %s5726_s17 }
0x16db   :  { %v6359_v32 = vpop.permute.xlu1 %2133 }
0x16dc   :  { %4763 = vmatmul.msk.f32.vlgmr.msrb.gmra.mxu1 %vm443_vm13, %v6359_v32  ;;  %4764 = vmatmul.msk.f32.vlgmr.msrb.gmra.mxu2 %vm443_vm13, %v6359_v32 }
0x16dd   :  { %4765 = vmatmul.msk.f32.vlgmr.msrb.gmra.mxu3 %vm443_vm13, %v6359_v32  ;;  %4766 = vmatmul.msk.f32.vlgmr.msrb.gmra.mxu0 %vm443_vm13, %v6359_v32 }
0x16de   :  { %2523 = vmatpush.msrb.mxu1 %v6284_v15  ;;  %2544 = vmatpush.msrb.mxu2 %v6268_v46 }
0x16df   :  { %2569 = vmatpush.msrb.mxu3 %v6271_v29  ;;  %2594 = vmatpush.msrb.mxu0 %v6321_v39 }
0x16e0   :  { %2524 = vmatpush.msrb.mxu1 %v6287_v22  ;;  %2545 = vmatpush.msrb.mxu2 %v6274_v30 }
0x16e1   :  { %2570 = vmatpush.msrb.mxu3 %v6279_v31  ;;  %2595 = vmatpush.msrb.mxu0 %v6325_v40 }
0x1759   :  { %v2154_v20 = vpop.f32.mrf.mxu1 }
0x175a   :  { %v2230_v42 = vpop.f32.mrf.mxu0  ;;  %v2158_v44 = vrot.slane %v2154_v20, 4 }
0x175b   :  { %v2234_v43 = vrot.slane %v2230_v42, 4 }
0x175c   :  { %v2160_v49 = vadd.f32 %v2158_v44, %v6345_v26 }
0x175e   :  { %v2239_v50 = vsub.f32 0.0, %v2160_v49 }
0x175f   :  { %v2178_v33 = vpop.f32.mrf.mxu2 }
0x1760   :  { %v2182_v34 = vrot.slane %v2178_v33, 4  ;;  %v2204_v61 = vpop.f32.mrf.mxu3  ;;  %v2240_v51 = vmul.f32 1.442695, %v2239_v50 }
0x1761   :  { %v2208_v36 = vrot.slane %v2204_v61, 4 }
0x1762   :  { %2183 = vrot.lane.b32.xlu1 %v2182_v34, %s5724_s27 }
0x1763   :  { %2209 = vrot.lane.b32.xlu2 %v2208_v36, %s5723_s21 }
0x17bd   :  { %v2210_v37 = vpop.permute.xlu2 %2209 }
0x17be   :  { %v2212_v8 = vadd.f32 %v2210_v37, %v6345_v26 }
0x17c0   :  { %5053 = vtanh.f32 %v2212_v8 }
0x17c1   :  { %5055 = vpow2.f32 %v2240_v51 }
0x17c6   :  { %v5054_v41 = vpop.eup %5053 }
0x17c7   :  { %2302 = vrot.lane.b32.xlu0 %v5054_v41, %s5725_s2  ;;  %v5056_v52 = vpop.eup %5055 }
0x17c8   :  { %v2242_v53 = vadd.f32 1.0, %v5056_v52 }
0x17ca   :  { %5057 = vrcp.f32 %v2242_v53  ;;  %v2254_v62 = vand.u32 2147483648, %v2242_v53  ;;  %vm2248_vm15 = vweird.f32 %v2242_v53  ;;  %v2252_v63 = vand.u32 2147483647, %v2242_v53 }
0x17cc   :  { %v2255_v9 = vor.u32 1.1754944e-38, %v2254_v62  ;;  %vm2253_vm2 = vcmp.eq.f32.partialorder %v2252_v63, 8.507059e+37 }
0x17cf   :  { %2235 = vrot.lane.b32.xlu0 %v2234_v43, %s5722_s7  ;;  %v2298_v43 = vrot.slane %v6353_v54, 2 }
0x17d0   :  { %v5058_v56 = vpop.eup %5057 }
0x17d1   :  { %v2244_v24 = vmul.f32 %v5058_v56, %v2242_v53  ;;  %vm2249_vm14 = vweird.f32 %v5058_v56 }
0x17d2   :  { %vm2250_vm1 = vmor %vm2248_vm15, %vm2249_vm14 }
0x17d3   :  { %v2245_v57 = vsub.f32 1.0, %v2244_v24 }
0x17d4   :  { %v2184_v13 = vpop.permute.xlu1 %2183 }
0x17d5   :  { %v2246_v58 = vmul.f32 %v5058_v56, %v2245_v57  ;;  %v2186_v16 = vadd.f32 %v2184_v13, %v6345_v26 }
0x17d7   :  { %v2247_v59 = vadd.f32 %v5058_v56, %v2246_v58  ;;  %v2258_v17 = vsub.f32 0.0, %v2186_v16 }
0x17d9   :  { %v2251_v0 = vsel %vm2250_vm1, %v5058_v56, %v2247_v59  ;;  %v2259_v18 = vmul.f32 1.442695, %v2258_v17 }
0x17da   :  { %v2256_v10 = vsel %vm2253_vm2, %v2255_v9, %v2251_v0 }
0x17db   :  { %5059 = vpow2.f32 %v2259_v18 }
0x17e1   :  { %v5060_v19 = vpop.eup %5059 }
0x17e2   :  { %v2261_v21 = vadd.f32 1.0, %v5060_v19 }
0x17e4   :  { %5061 = vrcp.f32 %v2261_v21  ;;  %v2273_v36 = vand.u32 2147483648, %v2261_v21  ;;  %vm2267_vm4 = vweird.f32 %v2261_v21  ;;  %v2271_v37 = vand.u32 2147483647, %v2261_v21 }
0x17e6   :  { %v2274_v41 = vor.u32 1.1754944e-38, %v2273_v36  ;;  %vm2272_vm6 = vcmp.eq.f32.partialorder %v2271_v37, 8.507059e+37 }
0x17ea   :  { %v5062_v23 = vpop.eup %5061 }
0x17eb   :  { %v2263_v25 = vmul.f32 %v5062_v23, %v2261_v21  ;;  %vm2268_vm3 = vweird.f32 %v5062_v23 }
0x17ec   :  { %vm2269_vm5 = vmor %vm2267_vm4, %vm2268_vm3 }
0x17ed   :  { %v2264_v33 = vsub.f32 1.0, %v2263_v25 }
0x17ef   :  { %v2265_v34 = vmul.f32 %v5062_v23, %v2264_v33 }
0x17f1   :  { %v2266_v61 = vadd.f32 %v5062_v23, %v2265_v34 }
0x17f3   :  { %v2270_v8 = vsel %vm2269_vm5, %v5062_v23, %v2266_v61 }
0x17f4   :  { %v2275_v42 = vsel %vm2272_vm6, %v2274_v41, %v2270_v8 }
0x17f5   :  { %v2300_v20 = vmul.f32 %v2298_v43, %v2275_v42 }
0x1839   :  { %v2303_v1 = vpop.permute.xlu0 %2302 }
0x183a   :  { %v2305_v12 = vmul.f32 %v2303_v1, %v2256_v10 }
0x183c   :  { %2307 = vrot.lane.b32.xlu2 %v2305_v12, %s5724_s27 }
0x1841   :  { %v2236_v51 = vpop.permute.xlu0 %2235 }
0x1842   :  { %v2238_v52 = vadd.f32 %v2236_v51, %v6345_v26 }
0x1844   :  { %v2278_v53 = vsub.f32 0.0, %v2238_v52 }
0x1846   :  { %v2279_v56 = vmul.f32 1.442695, %v2278_v53 }
0x1896   :  { %v2308_v44 = vpop.permute.xlu2 %2307 }
0x1897   :  { %v6386_v49 = vadd.f32 %v2308_v44, %v2300_v20 }
0x1899   :  { %5063 = vtanh.f32 %v6386_v49 }
0x189a   :  { %5065 = vpow2.f32 %v2279_v56 }
0x189f   :  { %v5064_v50 = vpop.eup %5063 }
0x18a0   :  { %2313 = vrot.lane.b32.xlu1 %v5064_v50, %s5723_s21  ;;  %v5066_v24 = vpop.eup %5065 }
0x18a1   :  { %v2281_v57 = vadd.f32 1.0, %v5066_v24 }
0x18a3   :  { %5067 = vrcp.f32 %v2281_v57  ;;  %v2293_v0 = vand.u32 2147483648, %v2281_v57  ;;  %vm2287_vm8 = vweird.f32 %v2281_v57  ;;  %v2291_v9 = vand.u32 2147483647, %v2281_v57 }
0x18a5   :  { %v2294_v10 = vor.u32 1.1754944e-38, %v2293_v0  ;;  %vm2292_vm10 = vcmp.eq.f32.partialorder %v2291_v9, 8.507059e+37 }
0x18a9   :  { %v5068_v58 = vpop.eup %5067 }
0x18aa   :  { %v2283_v54 = vmul.f32 %v5068_v58, %v2281_v57  ;;  %vm2288_vm7 = vweird.f32 %v5068_v58 }
0x18ab   :  { %vm2289_vm9 = vmor %vm2287_vm8, %vm2288_vm7 }
0x18ac   :  { %v2284_v59 = vsub.f32 1.0, %v2283_v54 }
0x18ae   :  { %v2285_v62 = vmul.f32 %v5068_v58, %v2284_v59 }
0x18b0   :  { %v2286_v63 = vadd.f32 %v5068_v58, %v2285_v62 }
0x18b2   :  { %v2290_v1 = vsel %vm2289_vm9, %v5068_v58, %v2286_v63 }
0x18b3   :  { %v2295_v12 = vsel %vm2292_vm10, %v2294_v10, %v2290_v1 }
0x1912   :  { %v2314_v13 = vpop.permute.xlu1 %2313 }
0x1913   :  { %v2316_v16 = vmul.f32 %v2314_v13, %v2295_v12 }
0x1915   :  { %v2318_v17 = vrot.slane %v2316_v16, 4 }
0x1917   :  { %2319 = vrot.lane.b32.xlu2 %v2318_v17, %s5726_s17 }
0x1971   :  { %v6392_v18 = vpop.permute.xlu2 %2319 }
0x1972   :  { %4767 = vmatmul.msk.f32.vlgmr.msra.gmra.mxu1 %vm443_vm13, %v6392_v18  ;;  %4768 = vmatmul.msk.f32.vlgmr.msra.gmra.mxu2 %vm443_vm13, %v6392_v18 }
0x1973   :  { %4769 = vmatmul.msk.f32.vlgmr.msra.gmra.mxu3 %vm443_vm13, %v6392_v18  ;;  %4770 = vmatmul.msk.f32.vlgmr.msra.gmra.mxu0 %vm443_vm13, %v6392_v18 }
0x1974   :  { %2702 = vmatpush.msra.mxu1 %v6284_v15  ;;  %2726 = vmatpush.msra.mxu2 %v6268_v46 }
0x1975   :  { %2752 = vmatpush.msra.mxu3 %v6271_v29  ;;  %2778 = vmatpush.msra.mxu0 %v6321_v39 }
0x1976   :  { %2703 = vmatpush.msra.mxu1 %v6287_v22  ;;  %2727 = vmatpush.msra.mxu2 %v6274_v30 }
0x1977   :  { %2753 = vmatpush.msra.mxu3 %v6279_v31  ;;  %2779 = vmatpush.msra.mxu0 %v6325_v40 }
0x19ef   :  { %v2340_v8 = vpop.f32.mrf.mxu1 }
0x19f0   :  { %v2416_v36 = vpop.f32.mrf.mxu0  ;;  %v2344_v41 = vrot.slane %v2340_v8, 6  ;;  %v2484_v8 = vrot.slane %v6386_v49, 2 }
0x19f1   :  { %v2420_v37 = vrot.slane %v2416_v36, 6 }
0x19f2   :  { %v2346_v42 = vadd.f32 %v2344_v41, %v6345_v26 }
0x19f4   :  { %v2425_v43 = vsub.f32 0.0, %v2346_v42 }
0x19f5   :  { %v2364_v19 = vpop.f32.mrf.mxu2 }
0x19f6   :  { %v2368_v21 = vrot.slane %v2364_v19, 6  ;;  %v2390_v23 = vpop.f32.mrf.mxu3  ;;  %v2426_v20 = vmul.f32 1.442695, %v2425_v43 }
0x19f7   :  { %v2394_v25 = vrot.slane %v2390_v23, 6 }
0x19f8   :  { %2369 = vrot.lane.b32.xlu2 %v2368_v21, %s5724_s27 }
0x19f9   :  { %2395 = vrot.lane.b32.xlu0 %v2394_v25, %s5723_s21 }
0x1a52   :  { %v2370_v9 = vpop.permute.xlu2 %2369 }
0x1a53   :  { %v2372_v1 = vadd.f32 %v2370_v9, %v6345_v26 }
0x1a55   :  { %v2444_v10 = vsub.f32 0.0, %v2372_v1 }
0x1a57   :  { %v2445_v12 = vmul.f32 1.442695, %v2444_v10 }
0x1a6b   :  { %v2396_v33 = vpop.permute.xlu0 %2395 }
0x1a6c   :  { %v2398_v34 = vadd.f32 %v2396_v33, %v6345_v26 }
0x1a6e   :  { %5069 = vtanh.f32 %v2398_v34 }
0x1a6f   :  { %5071 = vpow2.f32 %v2426_v20 }
0x1a74   :  { %v5070_v61 = vpop.eup %5069 }
0x1a75   :  { %2488 = vrot.lane.b32.xlu1 %v5070_v61, %s5725_s2  ;;  %v5072_v44 = vpop.eup %5071 }
0x1a76   :  { %v2428_v50 = vadd.f32 1.0, %v5072_v44 }
0x1a78   :  { %5073 = vrcp.f32 %v2428_v50  ;;  %v2440_v57 = vand.u32 2147483648, %v2428_v50  ;;  %vm2434_vm12 = vweird.f32 %v2428_v50  ;;  %v2438_v58 = vand.u32 2147483647, %v2428_v50 }
0x1a79   :  { %5075 = vpow2.f32 %v2445_v12 }
0x1a7a   :  { %v2441_v59 = vor.u32 1.1754944e-38, %v2440_v57  ;;  %vm2439_vm15 = vcmp.eq.f32.partialorder %v2438_v58, 8.507059e+37 }
0x1a7d   :  { %2421 = vrot.lane.b32.xlu1 %v2420_v37, %s5722_s7 }
0x1a7e   :  { %v5074_v51 = vpop.eup %5073 }
0x1a7f   :  { %v2430_v52 = vmul.f32 %v5074_v51, %v2428_v50  ;;  %vm2435_vm11 = vweird.f32 %v5074_v51  ;;  %v5076_v13 = vpop.eup %5075 }
0x1a80   :  { %vm2436_vm14 = vmor %vm2434_vm12, %vm2435_vm11  ;;  %v2447_v16 = vadd.f32 1.0, %v5076_v13 }
0x1a81   :  { %v2431_v53 = vsub.f32 1.0, %v2430_v52 }
0x1a82   :  { %5077 = vrcp.f32 %v2447_v16  ;;  %v2459_v33 = vand.u32 2147483648, %v2447_v16  ;;  %vm2453_vm2 = vweird.f32 %v2447_v16  ;;  %v2457_v34 = vand.u32 2147483647, %v2447_v16 }
0x1a83   :  { %v2432_v56 = vmul.f32 %v5074_v51, %v2431_v53 }
0x1a84   :  { %v2460_v36 = vor.u32 1.1754944e-38, %v2459_v33  ;;  %vm2458_vm4 = vcmp.eq.f32.partialorder %v2457_v34, 8.507059e+37 }
0x1a85   :  { %v2433_v24 = vadd.f32 %v5074_v51, %v2432_v56 }
0x1a87   :  { %v2437_v54 = vsel %vm2436_vm14, %v5074_v51, %v2433_v24 }
0x1a88   :  { %v2442_v63 = vsel %vm2439_vm15, %v2441_v59, %v2437_v54  ;;  %v5078_v17 = vpop.eup %5077 }
0x1a89   :  { %v2449_v19 = vmul.f32 %v5078_v17, %v2447_v16  ;;  %vm2454_vm1 = vweird.f32 %v5078_v17 }
0x1a8a   :  { %vm2455_vm3 = vmor %vm2453_vm2, %vm2454_vm1 }
0x1a8b   :  { %v2450_v21 = vsub.f32 1.0, %v2449_v19 }
0x1a8d   :  { %v2451_v23 = vmul.f32 %v5078_v17, %v2450_v21 }
0x1a8f   :  { %v2452_v25 = vadd.f32 %v5078_v17, %v2451_v23 }
0x1a91   :  { %v2456_v61 = vsel %vm2455_vm3, %v5078_v17, %v2452_v25 }
0x1a92   :  { %v2461_v37 = vsel %vm2458_vm4, %v2460_v36, %v2456_v61 }
0x1a93   :  { %v2486_v41 = vmul.f32 %v2484_v8, %v2461_v37 }
0x1ae7   :  { %v2489_v62 = vpop.permute.xlu1 %2488 }
0x1ae8   :  { %v2491_v0 = vmul.f32 %v2489_v62, %v2442_v63 }
0x1aea   :  { %2493 = vrot.lane.b32.xlu0 %v2491_v0, %s5724_s27 }
0x1aef   :  { %v2422_v44 = vpop.permute.xlu1 %2421 }
0x1af0   :  { %v2424_v50 = vadd.f32 %v2422_v44, %v6345_v26 }
0x1af2   :  { %v2464_v51 = vsub.f32 0.0, %v2424_v50 }
0x1af4   :  { %v2465_v52 = vmul.f32 1.442695, %v2464_v51 }
0x1b5c   :  { %v2494_v42 = vpop.permute.xlu0 %2493 }
0x1b5d   :  { %v6419_v43 = vadd.f32 %v2494_v42, %v2486_v41 }
0x1b5f   :  { %5079 = vtanh.f32 %v6419_v43 }
0x1b60   :  { %5081 = vpow2.f32 %v2465_v52 }
0x1b65   :  { %v5080_v20 = vpop.eup %5079 }
0x1b66   :  { %2499 = vrot.lane.b32.xlu2 %v5080_v20, %s5723_s21  ;;  %v5082_v53 = vpop.eup %5081 }
0x1b67   :  { %v2467_v56 = vadd.f32 1.0, %v5082_v53 }
0x1b69   :  { %5083 = vrcp.f32 %v2467_v56  ;;  %v2479_v59 = vand.u32 2147483648, %v2467_v56  ;;  %vm2473_vm6 = vweird.f32 %v2467_v56  ;;  %v2477_v62 = vand.u32 2147483647, %v2467_v56 }
0x1b6b   :  { %v2480_v0 = vor.u32 1.1754944e-38, %v2479_v59  ;;  %vm2478_vm8 = vcmp.eq.f32.partialorder %v2477_v62, 8.507059e+37 }
0x1b6f   :  { %v5084_v24 = vpop.eup %5083 }
0x1b70   :  { %v2469_v49 = vmul.f32 %v5084_v24, %v2467_v56  ;;  %vm2474_vm5 = vweird.f32 %v5084_v24 }
0x1b71   :  { %vm2475_vm7 = vmor %vm2473_vm6, %vm2474_vm5 }
0x1b72   :  { %v2470_v57 = vsub.f32 1.0, %v2469_v49 }
0x1b74   :  { %v2471_v58 = vmul.f32 %v5084_v24, %v2470_v57 }
0x1b76   :  { %v2472_v54 = vadd.f32 %v5084_v24, %v2471_v58 }
0x1b78   :  { %v2476_v63 = vsel %vm2475_vm7, %v5084_v24, %v2472_v54 }
0x1b79   :  { %v2481_v9 = vsel %vm2478_vm8, %v2480_v0, %v2476_v63 }
0x1bc0   :  { %v2500_v1 = vpop.permute.xlu2 %2499 }
0x1bc1   :  { %v2502_v10 = vmul.f32 %v2500_v1, %v2481_v9 }
0x1bc3   :  { %v2504_v12 = vrot.slane %v2502_v10, 2 }
0x1bc5   :  { %2505 = vrot.lane.b32.xlu0 %v2504_v12, %s5726_s17 }
0x1c37   :  { %v6425_v13 = vpop.permute.xlu0 %2505 }
0x1c38   :  { %4771 = vmatmul.msk.f32.vlgmr.msrb.gmra.mxu1 %vm443_vm13, %v6425_v13  ;;  %4772 = vmatmul.msk.f32.vlgmr.msrb.gmra.mxu2 %vm443_vm13, %v6425_v13 }
0x1c39   :  { %4773 = vmatmul.msk.f32.vlgmr.msrb.gmra.mxu3 %vm443_vm13, %v6425_v13  ;;  %4774 = vmatmul.msk.f32.vlgmr.msrb.gmra.mxu0 %vm443_vm13, %v6425_v13 }
0x1c3a   :  { %2888 = vmatpush.msrb.mxu1 %v6284_v15  ;;  %2912 = vmatpush.msrb.mxu2 %v6268_v46 }
0x1c3b   :  { %2938 = vmatpush.msrb.mxu3 %v6271_v29  ;;  %2964 = vmatpush.msrb.mxu0 %v6321_v39 }
0x1c3c   :  { %2889 = vmatpush.msrb.mxu1 %v6287_v22  ;;  %2913 = vmatpush.msrb.mxu2 %v6274_v30 }
0x1c3d   :  { %2939 = vmatpush.msrb.mxu3 %v6279_v31  ;;  %2965 = vmatpush.msrb.mxu0 %v6325_v40 }
0x1cb5   :  { %v2526_v33 = vpop.f32.mrf.mxu1 }
0x1cb6   :  { %v2597_v25 = vpop.f32.mrf.mxu0  ;;  %v2529_v34 = vadd.f32 %v2526_v33, %v6345_v26  ;;  %v2664_v33 = vrot.slane %v6419_v43, 2 }
0x1cb8   :  { %v2605_v61 = vsub.f32 0.0, %v2529_v34 }
0x1cba   :  { %v2606_v36 = vmul.f32 1.442695, %v2605_v61 }
0x1cbb   :  { %v2547_v16 = vpop.f32.mrf.mxu2 }
0x1cbc   :  { %v2572_v17 = vpop.f32.mrf.mxu3  ;;  %2551 = vrot.lane.b32.xlu0 %v2547_v16, %s5724_s27 }
0x1cbd   :  { %2576 = vrot.lane.b32.xlu1 %v2572_v17, %s5723_s21 }
0x1d2e   :  { %v2552_v58 = vpop.permute.xlu0 %2551 }
0x1d2f   :  { %v2577_v19 = vpop.permute.xlu1 %2576  ;;  %v2554_v54 = vadd.f32 %v2552_v58, %v6345_v26 }
0x1d30   :  { %v2579_v21 = vadd.f32 %v2577_v19, %v6345_v26 }
0x1d31   :  { %v2624_v59 = vsub.f32 0.0, %v2554_v54 }
0x1d32   :  { %5085 = vtanh.f32 %v2579_v21 }
0x1d33   :  { %5087 = vpow2.f32 %v2606_v36  ;;  %v2625_v62 = vmul.f32 1.442695, %v2624_v59 }
0x1d38   :  { %v5086_v23 = vpop.eup %5085 }
0x1d39   :  { %2668 = vrot.lane.b32.xlu2 %v5086_v23, %s5725_s2  ;;  %v5088_v37 = vpop.eup %5087 }
0x1d3a   :  { %v2608_v8 = vadd.f32 1.0, %v5088_v37 }
0x1d3c   :  { %5089 = vrcp.f32 %v2608_v8  ;;  %v2620_v51 = vand.u32 2147483648, %v2608_v8  ;;  %vm2614_vm10 = vweird.f32 %v2608_v8  ;;  %v2618_v52 = vand.u32 2147483647, %v2608_v8 }
0x1d3d   :  { %5091 = vpow2.f32 %v2625_v62 }
0x1d3e   :  { %v2621_v56 = vor.u32 1.1754944e-38, %v2620_v51  ;;  %vm2619_vm12 = vcmp.eq.f32.partialorder %v2618_v52, 8.507059e+37 }
0x1d41   :  { %2601 = vrot.lane.b32.xlu2 %v2597_v25, %s5722_s7 }
0x1d42   :  { %v5090_v41 = vpop.eup %5089 }
0x1d43   :  { %v2610_v42 = vmul.f32 %v5090_v41, %v2608_v8  ;;  %vm2615_vm9 = vweird.f32 %v5090_v41  ;;  %v5092_v63 = vpop.eup %5091 }
0x1d44   :  { %vm2616_vm11 = vmor %vm2614_vm10, %vm2615_vm9  ;;  %v2627_v0 = vadd.f32 1.0, %v5092_v63 }
0x1d45   :  { %v2611_v20 = vsub.f32 1.0, %v2610_v42 }
0x1d46   :  { %5093 = vrcp.f32 %v2627_v0  ;;  %v2639_v17 = vand.u32 2147483648, %v2627_v0  ;;  %vm2633_vm15 = vweird.f32 %v2627_v0  ;;  %v2637_v19 = vand.u32 2147483647, %v2627_v0 }
0x1d47   :  { %v2612_v44 = vmul.f32 %v5090_v41, %v2611_v20 }
0x1d48   :  { %v2640_v23 = vor.u32 1.1754944e-38, %v2639_v17  ;;  %vm2638_vm2 = vcmp.eq.f32.partialorder %v2637_v19, 8.507059e+37 }
0x1d49   :  { %v2613_v50 = vadd.f32 %v5090_v41, %v2612_v44 }
0x1d4b   :  { %v2617_v53 = vsel %vm2616_vm11, %v5090_v41, %v2613_v50 }
0x1d4c   :  { %v2622_v49 = vsel %vm2619_vm12, %v2621_v56, %v2617_v53  ;;  %v5094_v9 = vpop.eup %5093 }
0x1d4d   :  { %v2629_v1 = vmul.f32 %v5094_v9, %v2627_v0  ;;  %vm2634_vm14 = vweird.f32 %v5094_v9 }
0x1d4e   :  { %vm2635_vm1 = vmor %vm2633_vm15, %vm2634_vm14 }
0x1d4f   :  { %v2630_v10 = vsub.f32 1.0, %v2629_v1 }
0x1d51   :  { %v2631_v12 = vmul.f32 %v5094_v9, %v2630_v10 }
0x1d53   :  { %v2632_v16 = vadd.f32 %v5094_v9, %v2631_v12 }
0x1d55   :  { %v2636_v21 = vsel %vm2635_vm1, %v5094_v9, %v2632_v16 }
0x1d56   :  { %v2641_v25 = vsel %vm2638_vm2, %v2640_v23, %v2636_v21 }
0x1d57   :  { %v2666_v34 = vmul.f32 %v2664_v33, %v2641_v25 }
0x1d93   :  { %v2669_v24 = vpop.permute.xlu2 %2668 }
0x1d94   :  { %v2671_v57 = vmul.f32 %v2669_v24, %v2622_v49 }
0x1d96   :  { %2673 = vrot.lane.b32.xlu1 %v2671_v57, %s5724_s27 }
0x1d9b   :  { %v2602_v8 = vpop.permute.xlu2 %2601 }
0x1d9c   :  { %v2604_v41 = vadd.f32 %v2602_v8, %v6345_v26 }
0x1d9e   :  { %v2644_v42 = vsub.f32 0.0, %v2604_v41 }
0x1da0   :  { %v2645_v20 = vmul.f32 1.442695, %v2644_v42 }
0x1e08   :  { %v2674_v61 = vpop.permute.xlu1 %2673 }
0x1e09   :  { %v6452_v36 = vadd.f32 %v2674_v61, %v2666_v34 }
0x1e0b   :  { %5095 = vtanh.f32 %v6452_v36 }
0x1e0c   :  { %5097 = vpow2.f32 %v2645_v20 }
0x1e11   :  { %v5096_v37 = vpop.eup %5095 }
0x1e12   :  { %2679 = vrot.lane.b32.xlu0 %v5096_v37, %s5723_s21  ;;  %v5098_v44 = vpop.eup %5097 }
0x1e13   :  { %v2647_v50 = vadd.f32 1.0, %v5098_v44 }
0x1e15   :  { %5099 = vrcp.f32 %v2647_v50  ;;  %v2659_v24 = vand.u32 2147483648, %v2647_v50  ;;  %vm2653_vm4 = vweird.f32 %v2647_v50  ;;  %v2657_v49 = vand.u32 2147483647, %v2647_v50 }
0x1e17   :  { %v2660_v58 = vor.u32 1.1754944e-38, %v2659_v24  ;;  %vm2658_vm6 = vcmp.eq.f32.partialorder %v2657_v49, 8.507059e+37 }
0x1e1b   :  { %v5100_v51 = vpop.eup %5099 }
0x1e1c   :  { %v2649_v43 = vmul.f32 %v5100_v51, %v2647_v50  ;;  %vm2654_vm3 = vweird.f32 %v5100_v51 }
0x1e1d   :  { %vm2655_vm5 = vmor %vm2653_vm4, %vm2654_vm3 }
0x1e1e   :  { %v2650_v52 = vsub.f32 1.0, %v2649_v43 }
0x1e20   :  { %v2651_v53 = vmul.f32 %v5100_v51, %v2650_v52 }
0x1e22   :  { %v2652_v56 = vadd.f32 %v5100_v51, %v2651_v53 }
0x1e24   :  { %v2656_v57 = vsel %vm2655_vm5, %v5100_v51, %v2652_v56 }
0x1e25   :  { %v2661_v26 = vsel %vm2658_vm6, %v2660_v58, %v2656_v57 }
0x1e84   :  { %v2680_v54 = vpop.permute.xlu0 %2679 }
0x1e85   :  { %v6457_v59 = vmul.f32 %v2680_v54, %v2661_v26 }
0x1e87   :  { %2684 = vrot.lane.b32.xlu1 %v6457_v59, %s5726_s17 }
0x1ef9   :  { %v6461_v62 = vpop.permute.xlu1 %2684 }
0x1efa   :  { %4775 = vmatmul.msk.f32.vlgmr.msra.gmra.mxu1 %vm443_vm13, %v6461_v62  ;;  %4776 = vmatmul.msk.f32.vlgmr.msra.gmra.mxu2 %vm443_vm13, %v6461_v62 }
0x1efb   :  { %4777 = vmatmul.msk.f32.vlgmr.msra.gmra.mxu3 %vm443_vm13, %v6461_v62  ;;  %4778 = vmatmul.msk.f32.vlgmr.msra.gmra.mxu0 %vm443_vm13, %v6461_v62 }
0x1efc   :  { %3074 = vmatpush.msra.mxu1 %v6284_v15  ;;  %3098 = vmatpush.msra.mxu2 %v6268_v46 }
0x1efd   :  { %3124 = vmatpush.msra.mxu3 %v6271_v29  ;;  %3150 = vmatpush.msra.mxu0 %v6321_v39 }
0x1efe   :  { %3075 = vmatpush.msra.mxu1 %v6287_v22  ;;  %3099 = vmatpush.msra.mxu2 %v6274_v30 }
0x1eff   :  { %3125 = vmatpush.msra.mxu3 %v6279_v31  ;;  %3151 = vmatpush.msra.mxu0 %v6325_v40 }
0x1f77   :  { %v2705_v31 = vpop.f32.mrf.mxu1 }
0x1f78   :  { %v2781_v30 = vpop.f32.mrf.mxu0  ;;  %v2709_v39 = vrot.slane %v2705_v31, 2 }
0x1f79   :  { %v2785_v22 = vrot.slane %v2781_v30, 2 }
0x1f7a   :  { %v2711_v40 = vadd.f32 %v2709_v39, %v6340_v48 }
0x1f7c   :  { %v2790_v10 = vsub.f32 0.0, %v2711_v40 }
0x1f7d   :  { %v2729_v63 = vpop.f32.mrf.mxu2 }
0x1f7e   :  { %v2733_v0 = vrot.slane %v2729_v63, 2  ;;  %v2755_v9 = vpop.f32.mrf.mxu3  ;;  %v2791_v12 = vmul.f32 1.442695, %v2790_v10 }
0x1f7f   :  { %v2759_v1 = vrot.slane %v2755_v9, 2 }
0x1f80   :  { %2734 = vrot.lane.b32.xlu1 %v2733_v0, %s5724_s27 }
0x1f81   :  { %2760 = vrot.lane.b32.xlu2 %v2759_v1, %s5723_s21  ;;  %v2849_v1 = vrot.slane %v6452_v36, 2 }
0x1fdb   :  { %v2761_v46 = vpop.permute.xlu2 %2760 }
0x1fdc   :  { %v2763_v29 = vadd.f32 %v2761_v46, %v6340_v48 }
0x1fde   :  { %5101 = vtanh.f32 %v2763_v29 }
0x1fdf   :  { %5103 = vpow2.f32 %v2791_v12 }
0x1fe4   :  { %v5102_v15 = vpop.eup %5101 }
0x1fe5   :  { %2853 = vrot.lane.b32.xlu0 %v5102_v15, %s5725_s2  ;;  %v5104_v16 = vpop.eup %5103 }
0x1fe6   :  { %v2793_v17 = vadd.f32 1.0, %v5104_v16 }
0x1fe8   :  { %5105 = vrcp.f32 %v2793_v17  ;;  %v2805_v34 = vand.u32 2147483648, %v2793_v17  ;;  %vm2799_vm8 = vweird.f32 %v2793_v17  ;;  %v2803_v61 = vand.u32 2147483647, %v2793_v17 }
0x1fea   :  { %v2806_v8 = vor.u32 1.1754944e-38, %v2805_v34  ;;  %vm2804_vm10 = vcmp.eq.f32.partialorder %v2803_v61, 8.507059e+37 }
0x1fed   :  { %2786 = vrot.lane.b32.xlu0 %v2785_v22, %s5722_s7 }
0x1fee   :  { %v5106_v19 = vpop.eup %5105 }
0x1fef   :  { %v2795_v21 = vmul.f32 %v5106_v19, %v2793_v17  ;;  %vm2800_vm7 = vweird.f32 %v5106_v19 }
0x1ff0   :  { %vm2801_vm9 = vmor %vm2799_vm8, %vm2800_vm7 }
0x1ff1   :  { %v2796_v23 = vsub.f32 1.0, %v2795_v21 }
0x1ff2   :  { %v2735_v44 = vpop.permute.xlu1 %2734 }
0x1ff3   :  { %v2797_v25 = vmul.f32 %v5106_v19, %v2796_v23  ;;  %v2737_v50 = vadd.f32 %v2735_v44, %v6340_v48  ;;  %v5210_v44 = vld [vmem:[%s6938_s10 + $0x18] sm:$0xff] }
0x1ff5   :  { %v2798_v33 = vadd.f32 %v5106_v19, %v2797_v25  ;;  %v2809_v51 = vsub.f32 0.0, %v2737_v50  ;;  %v5211_v50 = vld [vmem:[%s6938_s10 + $0x28] sm:$0xff] }
0x1ff7   :  { %v2802_v37 = vsel %vm2801_vm9, %v5106_v19, %v2798_v33  ;;  %v2810_v43 = vmul.f32 1.442695, %v2809_v51  ;;  %v5212_v51 = vld [vmem:[%s6938_s10 + $0x38] sm:$0xff] }
0x1ff8   :  { %v2807_v42 = vsel %vm2804_vm10, %v2806_v8, %v2802_v37 }
0x1ff9   :  { %5107 = vpow2.f32 %v2810_v43  ;;  %v5213_v43 = vld [vmem:[%s6938_s10] sm:$0xff] }
0x1fff   :  { %v5108_v52 = vpop.eup %5107 }
0x2000   :  { %v2812_v53 = vadd.f32 1.0, %v5108_v52  ;;  %v5214_v52 = vld [vmem:[%s6938_s10 + $0x10] sm:$0xff] }
0x2002   :  { %5109 = vrcp.f32 %v2812_v53  ;;  %v2824_v26 = vand.u32 2147483648, %v2812_v53  ;;  %vm2818_vm12 = vweird.f32 %v2812_v53  ;;  %v2822_v54 = vand.u32 2147483647, %v2812_v53 }
0x2004   :  { %v2825_v0 = vor.u32 1.1754944e-38, %v2824_v26  ;;  %vm2823_vm15 = vcmp.eq.f32.partialorder %v2822_v54, 8.507059e+37 }
0x2008   :  { %v5110_v56 = vpop.eup %5109 }
0x2009   :  { %v2814_v24 = vmul.f32 %v5110_v56, %v2812_v53  ;;  %vm2819_vm11 = vweird.f32 %v5110_v56  ;;  %v5215_v53 = vld [vmem:[%s6938_s10 + $0x20] sm:$0xff] }
0x200a   :  { %vm2820_vm14 = vmor %vm2818_vm12, %vm2819_vm11 }
0x200b   :  { %v2815_v49 = vsub.f32 1.0, %v2814_v24 }
0x200d   :  { %v2816_v57 = vmul.f32 %v5110_v56, %v2815_v49 }
0x200f   :  { %v2817_v58 = vadd.f32 %v5110_v56, %v2816_v57 }
0x2011   :  { %v2821_v63 = vsel %vm2820_vm14, %v5110_v56, %v2817_v58  ;;  %v5216_v56 = vld [vmem:[%s6938_s10 + $0x30] sm:$0xff] }
0x2012   :  { %v2826_v9 = vsel %vm2823_vm15, %v2825_v0, %v2821_v63 }
0x2013   :  { %v2851_v46 = vmul.f32 %v2849_v1, %v2826_v9 }
0x2057   :  { %v2854_v41 = vpop.permute.xlu0 %2853 }
0x2058   :  { %v2856_v20 = vmul.f32 %v2854_v41, %v2807_v42 }
0x205a   :  { %2858 = vrot.lane.b32.xlu2 %v2856_v20, %s5724_s27  ;;  %v5209_v20 = vld [vmem:[%s6938_s10 + $0x8] sm:$0xff] }
0x205f   :  { %v2787_v22 = vpop.permute.xlu0 %2786 }
0x2060   :  { %v2789_v31 = vadd.f32 %v2787_v22, %v6340_v48 }
0x2062   :  { %v2829_v39 = vsub.f32 0.0, %v2789_v31 }
0x2064   :  { %v2830_v40 = vmul.f32 1.442695, %v2829_v39 }
0x20b4   :  { %v2859_v29 = vpop.permute.xlu2 %2858 }
0x20b5   :  { %v6488_v15 = vadd.f32 %v2859_v29, %v2851_v46 }
0x20b7   :  { %5111 = vtanh.f32 %v6488_v15 }
0x20b8   :  { %5113 = vpow2.f32 %v2830_v40 }
0x20bd   :  { %v5112_v30 = vpop.eup %5111 }
0x20be   :  { %2864 = vrot.lane.b32.xlu1 %v5112_v30, %s5723_s21  ;;  %v5114_v10 = vpop.eup %5113 }
0x20bf   :  { %v2832_v12 = vadd.f32 1.0, %v5114_v10 }
0x20c1   :  { %5115 = vrcp.f32 %v2832_v12  ;;  %v2844_v23 = vand.u32 2147483648, %v2832_v12  ;;  %vm2838_vm2 = vweird.f32 %v2832_v12  ;;  %v2842_v25 = vand.u32 2147483647, %v2832_v12 }
0x20c3   :  { %v2845_v34 = vor.u32 1.1754944e-38, %v2844_v23  ;;  %vm2843_vm4 = vcmp.eq.f32.partialorder %v2842_v25, 8.507059e+37 }
0x20c7   :  { %v5116_v16 = vpop.eup %5115 }
0x20c8   :  { %v2834_v36 = vmul.f32 %v5116_v16, %v2832_v12  ;;  %vm2839_vm1 = vweird.f32 %v5116_v16 }
0x20c9   :  { %vm2840_vm3 = vmor %vm2838_vm2, %vm2839_vm1 }
0x20ca   :  { %v2835_v17 = vsub.f32 1.0, %v2834_v36 }
0x20cc   :  { %v2836_v19 = vmul.f32 %v5116_v16, %v2835_v17 }
0x20ce   :  { %v2837_v21 = vadd.f32 %v5116_v16, %v2836_v19 }
0x20d0   :  { %v2841_v33 = vsel %vm2840_vm3, %v5116_v16, %v2837_v21 }
0x20d1   :  { %v2846_v61 = vsel %vm2843_vm4, %v2845_v34, %v2841_v33 }
0x2130   :  { %v2865_v37 = vpop.permute.xlu1 %2864 }
0x2131   :  { %v2867_v8 = vmul.f32 %v2865_v37, %v2846_v61 }
0x2133   :  { %v2869_v41 = vrot.slane %v2867_v8, 6 }
0x2135   :  { %2870 = vrot.lane.b32.xlu2 %v2869_v41, %s5726_s17 }
0x218f   :  { %v6494_v42 = vpop.permute.xlu2 %2870 }
0x2190   :  { %4779 = vmatmul.msk.f32.vlgmr.msrb.gmra.mxu1 %vm443_vm13, %v6494_v42  ;;  %4780 = vmatmul.msk.f32.vlgmr.msrb.gmra.mxu2 %vm443_vm13, %v6494_v42 }
0x2191   :  { %4781 = vmatmul.msk.f32.vlgmr.msrb.gmra.mxu3 %vm443_vm13, %v6494_v42  ;;  %4782 = vmatmul.msk.f32.vlgmr.msrb.gmra.mxu0 %vm443_vm13, %v6494_v42 }
0x2192   :  { %3260 = vmatpush.msrb.mxu1 %v5209_v20  ;;  %3281 = vmatpush.msrb.mxu2 %v5210_v44 }
0x2193   :  { %3306 = vmatpush.msrb.mxu3 %v5211_v50  ;;  %3331 = vmatpush.msrb.mxu0 %v5212_v51 }
0x2194   :  { %3261 = vmatpush.msrb.mxu1 %v5213_v43  ;;  %3282 = vmatpush.msrb.mxu2 %v5214_v52 }
0x2195   :  { %3307 = vmatpush.msrb.mxu3 %v5215_v53  ;;  %3332 = vmatpush.msrb.mxu0 %v5216_v56 }
0x220d   :  { %v2891_v1 = vpop.f32.mrf.mxu1 }
0x220e   :  { %v2967_v0 = vpop.f32.mrf.mxu0  ;;  %v2895_v46 = vrot.slane %v2891_v1, 4 }
0x220f   :  { %v2971_v9 = vrot.slane %v2967_v0, 4 }
0x2210   :  { %v2897_v29 = vadd.f32 %v2895_v46, %v6340_v48 }
0x2212   :  { %v2976_v30 = vsub.f32 0.0, %v2897_v29 }
0x2213   :  { %v2915_v24 = vpop.f32.mrf.mxu2 }
0x2214   :  { %v2919_v49 = vrot.slane %v2915_v24, 4  ;;  %v2941_v57 = vpop.f32.mrf.mxu3  ;;  %v2977_v22 = vmul.f32 1.442695, %v2976_v30 }
0x2215   :  { %v2945_v58 = vrot.slane %v2941_v57, 4 }
0x2216   :  { %2920 = vrot.lane.b32.xlu2 %v2919_v49, %s5724_s27 }
0x2217   :  { %2946 = vrot.lane.b32.xlu0 %v2945_v58, %s5723_s21 }
0x2270   :  { %v2921_v61 = vpop.permute.xlu2 %2920 }
0x2271   :  { %v2923_v37 = vadd.f32 %v2921_v61, %v6340_v48 }
0x2273   :  { %v2995_v8 = vsub.f32 0.0, %v2923_v37 }
0x2275   :  { %v2996_v41 = vmul.f32 1.442695, %v2995_v8 }
0x2289   :  { %v2947_v26 = vpop.permute.xlu0 %2946 }
0x228a   :  { %v2949_v54 = vadd.f32 %v2947_v26, %v6340_v48  ;;  %v3035_v26 = vrot.slane %v6488_v15, 2 }
0x228c   :  { %5117 = vtanh.f32 %v2949_v54 }
0x228d   :  { %5119 = vpow2.f32 %v2977_v22 }
0x2292   :  { %v5118_v63 = vpop.eup %5117 }
0x2293   :  { %3039 = vrot.lane.b32.xlu1 %v5118_v63, %s5725_s2  ;;  %v5120_v31 = vpop.eup %5119 }
0x2294   :  { %v2979_v39 = vadd.f32 1.0, %v5120_v31 }
0x2296   :  { %5121 = vrcp.f32 %v2979_v39  ;;  %v2991_v17 = vand.u32 2147483648, %v2979_v39  ;;  %vm2985_vm6 = vweird.f32 %v2979_v39  ;;  %v2989_v19 = vand.u32 2147483647, %v2979_v39 }
0x2297   :  { %5123 = vpow2.f32 %v2996_v41 }
0x2298   :  { %v2992_v23 = vor.u32 1.1754944e-38, %v2991_v17  ;;  %vm2990_vm8 = vcmp.eq.f32.partialorder %v2989_v19, 8.507059e+37 }
0x229b   :  { %2972 = vrot.lane.b32.xlu1 %v2971_v9, %s5722_s7 }
0x229c   :  { %v5122_v40 = vpop.eup %5121 }
0x229d   :  { %v2981_v10 = vmul.f32 %v5122_v40, %v2979_v39  ;;  %vm2986_vm5 = vweird.f32 %v5122_v40  ;;  %v5124_v20 = vpop.eup %5123 }
0x229e   :  { %vm2987_vm7 = vmor %vm2985_vm6, %vm2986_vm5  ;;  %v2998_v44 = vadd.f32 1.0, %v5124_v20 }
0x229f   :  { %v2982_v12 = vsub.f32 1.0, %v2981_v10 }
0x22a0   :  { %5125 = vrcp.f32 %v2998_v44  ;;  %v3010_v56 = vand.u32 2147483648, %v2998_v44  ;;  %vm3004_vm10 = vweird.f32 %v2998_v44  ;;  %v3008_v24 = vand.u32 2147483647, %v2998_v44 }
0x22a1   :  { %v2983_v16 = vmul.f32 %v5122_v40, %v2982_v12 }
0x22a2   :  { %v3011_v57 = vor.u32 1.1754944e-38, %v3010_v56  ;;  %vm3009_vm12 = vcmp.eq.f32.partialorder %v3008_v24, 8.507059e+37 }
0x22a3   :  { %v2984_v36 = vadd.f32 %v5122_v40, %v2983_v16 }
0x22a5   :  { %v2988_v21 = vsel %vm2987_vm7, %v5122_v40, %v2984_v36 }
0x22a6   :  { %v2993_v33 = vsel %vm2990_vm8, %v2992_v23, %v2988_v21  ;;  %v5126_v50 = vpop.eup %5125 }
0x22a7   :  { %v3000_v51 = vmul.f32 %v5126_v50, %v2998_v44  ;;  %vm3005_vm9 = vweird.f32 %v5126_v50 }
0x22a8   :  { %vm3006_vm11 = vmor %vm3004_vm10, %vm3005_vm9 }
0x22a9   :  { %v3001_v43 = vsub.f32 1.0, %v3000_v51 }
0x22ab   :  { %v3002_v52 = vmul.f32 %v5126_v50, %v3001_v43 }
0x22ad   :  { %v3003_v53 = vadd.f32 %v5126_v50, %v3002_v52 }
0x22af   :  { %v3007_v49 = vsel %vm3006_vm11, %v5126_v50, %v3003_v53 }
0x22b0   :  { %v3012_v58 = vsel %vm3009_vm12, %v3011_v57, %v3007_v49 }
0x22b1   :  { %v3037_v54 = vmul.f32 %v3035_v26, %v3012_v58 }
0x2305   :  { %v3040_v25 = vpop.permute.xlu1 %3039 }
0x2306   :  { %v3042_v34 = vmul.f32 %v3040_v25, %v2993_v33 }
0x2308   :  { %3044 = vrot.lane.b32.xlu0 %v3042_v34, %s5724_s27 }
0x230d   :  { %v2973_v1 = vpop.permute.xlu1 %2972 }
0x230e   :  { %v2975_v46 = vadd.f32 %v2973_v1, %v6340_v48 }
0x2310   :  { %v3015_v29 = vsub.f32 0.0, %v2975_v46 }
0x2312   :  { %v3016_v30 = vmul.f32 1.442695, %v3015_v29 }
0x237a   :  { %v3045_v63 = vpop.permute.xlu0 %3044 }
0x237b   :  { %v6521_v0 = vadd.f32 %v3045_v63, %v3037_v54 }
0x237d   :  { %5127 = vtanh.f32 %v6521_v0 }
0x237e   :  { %5129 = vpow2.f32 %v3016_v30 }
0x2383   :  { %v5128_v9 = vpop.eup %5127 }
0x2384   :  { %3050 = vrot.lane.b32.xlu2 %v5128_v9, %s5723_s21  ;;  %v5130_v22 = vpop.eup %5129 }
0x2385   :  { %v3018_v31 = vadd.f32 1.0, %v5130_v22 }
0x2387   :  { %5131 = vrcp.f32 %v3018_v31  ;;  %v3030_v16 = vand.u32 2147483648, %v3018_v31  ;;  %vm3024_vm15 = vweird.f32 %v3018_v31  ;;  %v3028_v36 = vand.u32 2147483647, %v3018_v31 }
0x2389   :  { %v3031_v19 = vor.u32 1.1754944e-38, %v3030_v16  ;;  %vm3029_vm2 = vcmp.eq.f32.partialorder %v3028_v36, 8.507059e+37 }
0x238d   :  { %v5132_v39 = vpop.eup %5131 }
0x238e   :  { %v3020_v15 = vmul.f32 %v5132_v39, %v3018_v31  ;;  %vm3025_vm14 = vweird.f32 %v5132_v39 }
0x238f   :  { %vm3026_vm1 = vmor %vm3024_vm15, %vm3025_vm14 }
0x2390   :  { %v3021_v40 = vsub.f32 1.0, %v3020_v15 }
0x2392   :  { %v3022_v10 = vmul.f32 %v5132_v39, %v3021_v40 }
0x2394   :  { %v3023_v12 = vadd.f32 %v5132_v39, %v3022_v10 }
0x2396   :  { %v3027_v17 = vsel %vm3026_vm1, %v5132_v39, %v3023_v12 }
0x2397   :  { %v3032_v21 = vsel %vm3029_vm2, %v3031_v19, %v3027_v17 }
0x23de   :  { %v3051_v23 = vpop.permute.xlu2 %3050 }
0x23df   :  { %v3053_v25 = vmul.f32 %v3051_v23, %v3032_v21 }
0x23e1   :  { %v3055_v33 = vrot.slane %v3053_v25, 4 }
0x23e3   :  { %3056 = vrot.lane.b32.xlu0 %v3055_v33, %s5726_s17 }
0x2455   :  { %v6527_v34 = vpop.permute.xlu0 %3056 }
0x2456   :  { %4783 = vmatmul.msk.f32.vlgmr.msra.gmra.mxu1 %vm443_vm13, %v6527_v34  ;;  %4784 = vmatmul.msk.f32.vlgmr.msra.gmra.mxu2 %vm443_vm13, %v6527_v34 }
0x2457   :  { %4785 = vmatmul.msk.f32.vlgmr.msra.gmra.mxu3 %vm443_vm13, %v6527_v34  ;;  %4786 = vmatmul.msk.f32.vlgmr.msra.gmra.mxu0 %vm443_vm13, %v6527_v34 }
0x24d3   :  { %v3077_v52 = vpop.f32.mrf.mxu1 }
0x24d4   :  { %v3153_v51 = vpop.f32.mrf.mxu0  ;;  %v3081_v53 = vrot.slane %v3077_v52, 6 }
0x24d5   :  { %v3157_v43 = vrot.slane %v3153_v51, 6 }
0x24d6   :  { %v3083_v56 = vadd.f32 %v3081_v53, %v6340_v48 }
0x24d8   :  { %v3162_v24 = vsub.f32 0.0, %v3083_v56 }
0x24d9   :  { %v3101_v61 = vpop.f32.mrf.mxu2 }
0x24da   :  { %v3105_v37 = vrot.slane %v3101_v61, 6  ;;  %v3127_v8 = vpop.f32.mrf.mxu3  ;;  %v3163_v49 = vmul.f32 1.442695, %v3162_v24 }
0x24db   :  { %v3131_v41 = vrot.slane %v3127_v8, 6 }
0x24dc   :  { %3106 = vrot.lane.b32.xlu0 %v3105_v37, %s5724_s27 }
0x24dd   :  { %3132 = vrot.lane.b32.xlu1 %v3131_v41, %s5723_s21 }
0x254e   :  { %v3107_v40 = vpop.permute.xlu0 %3106 }
0x254f   :  { %v3133_v20 = vpop.permute.xlu1 %3132  ;;  %v3109_v10 = vadd.f32 %v3107_v40, %v6340_v48  ;;  %v3421_v40 = vld [vmem:[#allocation12 + $0x8] sm:$0xff] }
0x2550   :  { %v3135_v44 = vadd.f32 %v3133_v20, %v6340_v48  ;;  %3464 = vmatpush.msra.mxu2 %v3421_v40  ;;  %3508 = vmatpush.msra.mxu0 %v3421_v40 }
0x2551   :  { %v3181_v12 = vsub.f32 0.0, %v3109_v10  ;;  %v6552_v10 = vld [vmem:[#allocation13 + $0x8] sm:$0xff] }
0x2552   :  { %5133 = vtanh.f32 %v3135_v44  ;;  %v3221_v44 = vrot.slane %v6521_v0, 2  ;;  %3488 = vmatpush.msra.mxu3 %v6552_v10  ;;  %3444 = vmatpush.msra.mxu1 %v6552_v10 }
0x2553   :  { %5135 = vpow2.f32 %v3163_v49  ;;  %v3182_v16 = vmul.f32 1.442695, %v3181_v12  ;;  %v3420_v12 = vld [vmem:[#allocation12] sm:$0xff] }
0x2554   :  { %3465 = vmatpush.msra.mxu2 %v3420_v12  ;;  %3509 = vmatpush.msra.mxu0 %v3420_v12 }
0x2558   :  { %v5134_v50 = vpop.eup %5133 }
0x2559   :  { %3225 = vrot.lane.b32.xlu2 %v5134_v50, %s5725_s2  ;;  %v5136_v57 = vpop.eup %5135 }
0x255a   :  { %v3165_v58 = vadd.f32 1.0, %v5136_v57 }
0x255c   :  { %5137 = vrcp.f32 %v3165_v58  ;;  %v3177_v46 = vand.u32 2147483648, %v3165_v58  ;;  %vm3171_vm4 = vweird.f32 %v3165_v58  ;;  %v3175_v29 = vand.u32 2147483647, %v3165_v58 }
0x255d   :  { %5139 = vpow2.f32 %v3182_v16  ;;  %v6555_v16 = vld [vmem:[#allocation13] sm:$0xff] }
0x255e   :  { %v3178_v22 = vor.u32 1.1754944e-38, %v3177_v46  ;;  %vm3176_vm6 = vcmp.eq.f32.partialorder %v3175_v29, 8.507059e+37  ;;  %3489 = vmatpush.msra.mxu3 %v6555_v16  ;;  %3445 = vmatpush.msra.mxu1 %v6555_v16 }
0x2561   :  { %3158 = vrot.lane.b32.xlu2 %v3157_v43, %s5722_s7 }
0x2562   :  { %v5138_v26 = vpop.eup %5137 }
0x2563   :  { %v3167_v54 = vmul.f32 %v5138_v26, %v3165_v58  ;;  %vm3172_vm3 = vweird.f32 %v5138_v26  ;;  %v5140_v36 = vpop.eup %5139 }
0x2564   :  { %vm3173_vm5 = vmor %vm3171_vm4, %vm3172_vm3  ;;  %v3184_v17 = vadd.f32 1.0, %v5140_v36 }
0x2565   :  { %v3168_v63 = vsub.f32 1.0, %v3167_v54 }
0x2566   :  { %5141 = vrcp.f32 %v3184_v17  ;;  %v3196_v61 = vand.u32 2147483648, %v3184_v17  ;;  %vm3190_vm8 = vweird.f32 %v3184_v17  ;;  %v3194_v37 = vand.u32 2147483647, %v3184_v17 }
0x2567   :  { %v3169_v9 = vmul.f32 %v5138_v26, %v3168_v63 }
0x2568   :  { %v3197_v41 = vor.u32 1.1754944e-38, %v3196_v61  ;;  %vm3195_vm10 = vcmp.eq.f32.partialorder %v3194_v37, 8.507059e+37 }
0x2569   :  { %v3170_v1 = vadd.f32 %v5138_v26, %v3169_v9 }
0x256b   :  { %v3174_v30 = vsel %vm3173_vm5, %v5138_v26, %v3170_v1 }
0x256c   :  { %v3179_v39 = vsel %vm3176_vm6, %v3178_v22, %v3174_v30  ;;  %v5142_v19 = vpop.eup %5141 }
0x256d   :  { %v3186_v21 = vmul.f32 %v5142_v19, %v3184_v17  ;;  %vm3191_vm7 = vweird.f32 %v5142_v19 }
0x256e   :  { %vm3192_vm9 = vmor %vm3190_vm8, %vm3191_vm7 }
0x256f   :  { %v3187_v23 = vsub.f32 1.0, %v3186_v21 }
0x2571   :  { %v3188_v25 = vmul.f32 %v5142_v19, %v3187_v23 }
0x2573   :  { %v3189_v33 = vadd.f32 %v5142_v19, %v3188_v25 }
0x2575   :  { %v3193_v8 = vsel %vm3192_vm9, %v5142_v19, %v3189_v33 }
0x2576   :  { %v3198_v20 = vsel %vm3195_vm10, %v3197_v41, %v3193_v8 }
0x2577   :  { %v3223_v50 = vmul.f32 %v3221_v44, %v3198_v20 }
0x25b3   :  { %v3226_v31 = vpop.permute.xlu2 %3225 }
0x25b4   :  { %v3228_v15 = vmul.f32 %v3226_v31, %v3179_v39 }
0x25b6   :  { %3230 = vrot.lane.b32.xlu1 %v3228_v15, %s5724_s27 }
0x25bb   :  { %v3159_v53 = vpop.permute.xlu2 %3158 }
0x25bc   :  { %v3161_v56 = vadd.f32 %v3159_v53, %v6340_v48 }
0x25be   :  { %v3201_v24 = vsub.f32 0.0, %v3161_v56 }
0x25c0   :  { %v3202_v49 = vmul.f32 1.442695, %v3201_v24 }
0x2628   :  { %v3231_v51 = vpop.permute.xlu1 %3230 }
0x2629   :  { %v6546_v43 = vadd.f32 %v3231_v51, %v3223_v50 }
0x262b   :  { %5143 = vtanh.f32 %v6546_v43 }
0x262c   :  { %5145 = vpow2.f32 %v3202_v49 }
0x2631   :  { %v5144_v52 = vpop.eup %5143 }
0x2632   :  { %3236 = vrot.lane.b32.xlu0 %v5144_v52, %s5723_s21  ;;  %v5146_v57 = vpop.eup %5145 }
0x2633   :  { %v3204_v58 = vadd.f32 1.0, %v5146_v57 }
0x2635   :  { %5147 = vrcp.f32 %v3204_v58  ;;  %v3216_v1 = vand.u32 2147483648, %v3204_v58  ;;  %vm3210_vm12 = vweird.f32 %v3204_v58  ;;  %v3214_v46 = vand.u32 2147483647, %v3204_v58 }
0x2637   :  { %v3217_v30 = vor.u32 1.1754944e-38, %v3216_v1  ;;  %vm3215_vm15 = vcmp.eq.f32.partialorder %v3214_v46, 8.507059e+37 }
0x263b   :  { %v5148_v26 = vpop.eup %5147 }
0x263c   :  { %v3206_v0 = vmul.f32 %v5148_v26, %v3204_v58  ;;  %vm3211_vm11 = vweird.f32 %v5148_v26 }
0x263d   :  { %vm3212_vm14 = vmor %vm3210_vm12, %vm3211_vm11 }
0x263e   :  { %v3207_v54 = vsub.f32 1.0, %v3206_v0  ;;  %v1803_v0 = vrot.slane %v6333_v3, 2 }
0x2640   :  { %v3208_v63 = vmul.f32 %v5148_v26, %v3207_v54  ;;  %v1777_v54 = vrot.slane %v6343_v45, 2 }
0x2642   :  { %v3209_v9 = vadd.f32 %v5148_v26, %v3208_v63 }
0x2644   :  { %v3213_v29 = vsel %vm3212_vm14, %v5148_v26, %v3209_v9 }
0x2645   :  { %v3218_v22 = vsel %vm3215_vm15, %v3217_v30, %v3213_v29 }
0x26a4   :  { %v3237_v31 = vpop.permute.xlu0 %3236 }
0x26a5   :  { %v3239_v39 = vmul.f32 %v3237_v31, %v3218_v22 }
0x26a7   :  { %v3241_v15 = vrot.slane %v3239_v39, 2 }
0x26a9   :  { %3242 = vrot.lane.b32.xlu1 %v3241_v15, %s5726_s17 }
0x271b   :  { %v6560_v36 = vpop.permute.xlu1 %3242 }
0x271c   :  { %4787 = vmatmul.msk.f32.vlgmr.msrb.gmra.mxu1 %vm443_vm13, %v6560_v36  ;;  %4788 = vmatmul.msk.f32.vlgmr.msrb.gmra.mxu2 %vm443_vm13, %v6560_v36 }
0x271d   :  { %4789 = vmatmul.msk.f32.vlgmr.msrb.gmra.mxu3 %vm443_vm13, %v6560_v36  ;;  %4790 = vmatmul.msk.f32.vlgmr.msrb.gmra.mxu0 %vm443_vm13, %v6560_v36 }
0x271e   :  { %3549 = vmatpush.msrb.mxu2 %v3421_v40  ;;  %3570 = vmatpush.msrb.mxu3 %v6552_v10 }
0x271f   :  { %3590 = vmatpush.msrb.mxu0 %v3421_v40  ;;  %3529 = vmatpush.msrb.mxu1 %v6552_v10 }
0x2720   :  { %3550 = vmatpush.msrb.mxu2 %v3420_v12  ;;  %3571 = vmatpush.msrb.mxu3 %v6555_v16 }
0x2721   :  { %3591 = vmatpush.msrb.mxu0 %v3420_v12  ;;  %3530 = vmatpush.msrb.mxu1 %v6555_v16 }
0x2724   :  { %4792 = vmatmul.msk.f32.vlgmr.msra.gmra.mxu2 %vm443_vm13, %v6066_v28 }
0x2725   :  { %4793 = vmatmul.msk.f32.vlgmr.msra.gmra.mxu3 %vm443_vm13, %v6560_v36  ;;  %4794 = vmatmul.msk.f32.vlgmr.msra.gmra.mxu0 %vm443_vm13, %v6101_v47 }
0x2726   :  { %3631 = vmatpush.msra.mxu2 %v3421_v40  ;;  %3652 = vmatpush.msra.mxu3 %v6552_v10 }
0x2727   :  { %3672 = vmatpush.msra.mxu0 %v3421_v40 }
0x2728   :  { %3632 = vmatpush.msra.mxu2 %v3420_v12  ;;  %3653 = vmatpush.msra.mxu3 %v6555_v16 }
0x2729   :  { %3673 = vmatpush.msra.mxu0 %v3420_v12 }
0x272c   :  { %4796 = vmatmul.msk.f32.vlgmr.msrb.gmra.mxu2 %vm443_vm13, %v6136_v14 }
0x272d   :  { %4797 = vmatmul.msk.f32.vlgmr.msrb.gmra.mxu3 %vm443_vm13, %v6494_v42  ;;  %4798 = vmatmul.msk.f32.vlgmr.msrb.gmra.mxu0 %vm443_vm13, %v6169_v38 }
0x272e   :  { %3713 = vmatpush.msrb.mxu2 %v3421_v40  ;;  %3734 = vmatpush.msrb.mxu3 %v6552_v10 }
0x272f   :  { %3760 = vmatpush.msrb.mxu0 %v3421_v40 }
0x2730   :  { %3714 = vmatpush.msrb.mxu2 %v3420_v12  ;;  %3735 = vmatpush.msrb.mxu3 %v6555_v16 }
0x2731   :  { %3761 = vmatpush.msrb.mxu0 %v3420_v12 }
0x2734   :  { %4800 = vmatmul.msk.f32.vlgmr.msra.gmra.mxu2 %vm443_vm13, %v6209_v7 }
0x2735   :  { %4801 = vmatmul.msk.f32.vlgmr.msra.gmra.mxu3 %vm443_vm13, %v6425_v13  ;;  %4802 = vmatmul.msk.f32.vlgmr.msra.gmra.mxu0 %vm443_vm13, %v6242_v60 }
0x273c   :  { %4804 = vmatmul.msk.f32.vlgmr.msrb.gmra.mxu2 %vm443_vm13, %v6291_v35 }
0x273d   :  { %4805 = vmatmul.msk.f32.vlgmr.msrb.gmra.mxu3 %vm443_vm13, %v6359_v32 }
0x2799   :  { %v3263_v25 = vpop.f32.mrf.mxu1 }
0x279a   :  { %v3334_v23 = vpop.f32.mrf.mxu0  ;;  %v3266_v33 = vadd.f32 %v3263_v25, %v6340_v48 }
0x279c   :  { %v3342_v61 = vsub.f32 0.0, %v3266_v33 }
0x279e   :  { %v3343_v37 = vmul.f32 1.442695, %v3342_v61 }
0x279f   :  { %v3284_v28 = vpop.f32.mrf.mxu2 }
0x27a0   :  { %v3309_v17 = vpop.f32.mrf.mxu3  ;;  %3288 = vrot.lane.b32.xlu1 %v3284_v28, %s5724_s27 }
0x27a1   :  { %3313 = vrot.lane.b32.xlu2 %v3309_v17, %s5723_s21 }
0x27fb   :  { %v3314_v19 = vpop.permute.xlu2 %3313 }
0x27fc   :  { %v3316_v7 = vadd.f32 %v3314_v19, %v6340_v48  ;;  %v3401_v19 = vrot.slane %v6546_v43, 2 }
0x27fe   :  { %5149 = vtanh.f32 %v3316_v7 }
0x27ff   :  { %5151 = vpow2.f32 %v3343_v37 }
0x2804   :  { %v5150_v21 = vpop.eup %5149 }
0x2805   :  { %3405 = vrot.lane.b32.xlu0 %v5150_v21, %s5725_s2  ;;  %v5152_v8 = vpop.eup %5151 }
0x2806   :  { %v3345_v41 = vadd.f32 1.0, %v5152_v8  ;;  %v1829_v8 = vrot.slane %v6337_v4, 2 }
0x2808   :  { %5153 = vrcp.f32 %v3345_v41  ;;  %v3357_v53 = vand.u32 2147483648, %v3345_v41  ;;  %vm3351_vm2 = vweird.f32 %v3345_v41  ;;  %v3355_v56 = vand.u32 2147483647, %v3345_v41 }
0x280a   :  { %v3358_v49 = vor.u32 1.1754944e-38, %v3357_v53  ;;  %vm3356_vm4 = vcmp.eq.f32.partialorder %v3355_v56, 8.507059e+37 }
0x280d   :  { %3338 = vrot.lane.b32.xlu0 %v3334_v23, %s5722_s7 }
0x280e   :  { %v5154_v20 = vpop.eup %5153 }
0x280f   :  { %v3347_v44 = vmul.f32 %v5154_v20, %v3345_v41  ;;  %vm3352_vm1 = vweird.f32 %v5154_v20 }
0x2810   :  { %vm3353_vm3 = vmor %vm3351_vm2, %vm3352_vm1 }
0x2811   :  { %v3348_v50 = vsub.f32 1.0, %v3347_v44 }
0x2812   :  { %v3289_v63 = vpop.permute.xlu1 %3288 }
0x2813   :  { %v3349_v51 = vmul.f32 %v5154_v20, %v3348_v50  ;;  %v3291_v9 = vadd.f32 %v3289_v63, %v6340_v48 }
0x2815   :  { %v3350_v52 = vadd.f32 %v5154_v20, %v3349_v51  ;;  %v3361_v1 = vsub.f32 0.0, %v3291_v9 }
0x2817   :  { %v3354_v24 = vsel %vm3353_vm3, %v5154_v20, %v3350_v52  ;;  %v3362_v46 = vmul.f32 1.442695, %v3361_v1  ;;  %v1753_v20 = vrot.slane %v6335_v6, 2  ;;  %vm4006_vm3 = vcmask 1043456  }
0x2818   :  { %v3359_v58 = vsel %vm3356_vm4, %v3358_v49, %v3354_v24  ;;  %vm3960_vm4 = vcmask 64512  }
0x2819   :  { %5155 = vpow2.f32 %v3362_v46  ;;  %v1755_v50 = vadd.f32 %v1753_v20, %v6191_v2  ;;  %v3971_v20 = vld [vmem:[#allocation15 + $0x4] sm:$0xf]  ;;  %3962 = vst.msk [vmem:[#allocation2 + $0x8] sm:$0xff] %vm3960_vm4, %v5721_v11 }
0x281a   :  { %4812 = vmatpush.msk.msra.mxu2 %vm4006_vm3, %v3971_v20  ;;  %3961 = vst.msk [vmem:[#allocation2] sm:$0xff] %vm3960_vm4, %v5721_v11 }
0x281b   :  { %v1834_v52 = vsub.f32 0.0, %v1755_v50  ;;  %3963 = vst.msk [vmem:[#allocation2 + $0x10] sm:$0xff] %vm3960_vm4, %v5721_v11 }
0x281c   :  { %3964 = vst.msk [vmem:[#allocation2 + $0x18] sm:$0xff] %vm3960_vm4, %v5721_v11 }
0x281d   :  { %v1835_v53 = vmul.f32 1.442695, %v1834_v52  ;;  %3965 = vst.msk [vmem:[#allocation2 + $0x20] sm:$0xff] %vm3960_vm4, %v5721_v11  ;;  %v1893_v11 = vrot.slane %v6261_v55, 6  ;;  %v3982_v55 = vld [vmem:[#allocation15] sm:$0xf] }
0x281f   :  { %v5156_v29 = vpop.eup %5155 }
0x2820   :  { %v3364_v30 = vadd.f32 1.0, %v5156_v29 }
0x2822   :  { %5157 = vrcp.f32 %v3364_v30  ;;  %v3376_v40 = vand.u32 2147483648, %v3364_v30  ;;  %vm3370_vm6 = vweird.f32 %v3364_v30  ;;  %v3374_v45 = vand.u32 2147483647, %v3364_v30 }
0x2824   :  { %v3377_v28 = vor.u32 1.1754944e-38, %v3376_v40  ;;  %vm3375_vm8 = vcmp.eq.f32.partialorder %v3374_v45, 8.507059e+37 }
0x2828   :  { %v5158_v22 = vpop.eup %5157 }
0x2829   :  { %v3366_v31 = vmul.f32 %v5158_v22, %v3364_v30  ;;  %vm3371_vm5 = vweird.f32 %v5158_v22 }
0x282a   :  { %vm3372_vm7 = vmor %vm3370_vm6, %vm3371_vm5  ;;  %vm3972_vm5 = vcmask 31744  }
0x282b   :  { %v3367_v39 = vsub.f32 1.0, %v3366_v31 }
0x282d   :  { %v3368_v15 = vmul.f32 %v5158_v22, %v3367_v39 }
0x282f   :  { %v3369_v3 = vadd.f32 %v5158_v22, %v3368_v15 }
0x2831   :  { %v3373_v12 = vsel %vm3372_vm7, %v5158_v22, %v3369_v3 }
0x2832   :  { %v3378_v17 = vsel %vm3375_vm8, %v3377_v28, %v3373_v12 }
0x2833   :  { %v3403_v7 = vmul.f32 %v3401_v19, %v3378_v17 }
0x2877   :  { %v3406_v57 = vpop.permute.xlu0 %3405 }
0x2878   :  { %v3408_v26 = vmul.f32 %v3406_v57, %v3359_v58 }
0x287a   :  { %3410 = vrot.lane.b32.xlu2 %v3408_v26, %s5724_s27 }
0x287f   :  { %v3339_v41 = vpop.permute.xlu0 %3338 }
0x2880   :  { %v3341_v43 = vadd.f32 %v3339_v41, %v6340_v48 }
0x2882   :  { %1804 = vrot.lane.b32.xlu2 %v1803_v0, %s5723_s21  ;;  %v3381_v44 = vsub.f32 0.0, %v3341_v43 }
0x2884   :  { %v3382_v51 = vmul.f32 1.442695, %v3381_v44  ;;  %v6628_v44 = vld [vmem:[%s6939_s20] sm:$0xff] }
0x2885   :  { %3973 = vst.msk [vmem:[#allocation2 + $0x8] sm:$0xff] %vm3972_vm5, %v6628_v44  ;;  %4813 = vmatmul.msk.f32.vlgmr.msra.gmra.mxu2 %vm3972_vm5, %v6628_v44 }
0x288a   :  { %1778 = vrot.lane.b32.xlu2 %v1777_v54, %s5724_s27 }
0x28d4   :  { %v3411_v21 = vpop.permute.xlu2 %3410 }
0x28d5   :  { %v3413_v23 = vadd.f32 %v3411_v21, %v3403_v7 }
0x28d7   :  { %5159 = vtanh.f32 %v3413_v23 }
0x28dc   :  { %v1805_v25 = vpop.permute.xlu2 %1804 }
0x28dd   :  { %v5160_v33 = vpop.eup %5159  ;;  %v1807_v61 = vadd.f32 %v1805_v25, %v6191_v2 }
0x28de   :  { %3416 = vrot.lane.b32.xlu1 %v5160_v33, %s5723_s21 }
0x28df   :  { %5161 = vtanh.f32 %v1807_v61 }
0x28e0   :  { %5163 = vpow2.f32 %v3382_v51 }
0x28e1   :  { %5165 = vpow2.f32 %v1835_v53 }
0x28e4   :  { %v1779_v7 = vpop.permute.xlu2 %1778 }
0x28e5   :  { %v5162_v37 = vpop.eup %5161  ;;  %v1781_v21 = vadd.f32 %v1779_v7, %v6191_v2 }
0x28e6   :  { %1897 = vrot.lane.b32.xlu1 %v5162_v37, %s5725_s2  ;;  %v5164_v56 = vpop.eup %5163 }
0x28e7   :  { %v3384_v24 = vadd.f32 1.0, %v5164_v56  ;;  %v5166_v49 = vpop.eup %5165  ;;  %v1853_v23 = vsub.f32 0.0, %v1781_v21 }
0x28e8   :  { %v1837_v4 = vadd.f32 1.0, %v5166_v49 }
0x28e9   :  { %5167 = vrcp.f32 %v3384_v24  ;;  %v3396_v9 = vand.u32 2147483648, %v3384_v24  ;;  %vm3390_vm10 = vweird.f32 %v3384_v24  ;;  %v3394_v1 = vand.u32 2147483647, %v3384_v24 }
0x28ea   :  { %5169 = vrcp.f32 %v1837_v4  ;;  %v1849_v3 = vand.u32 2147483648, %v1837_v4  ;;  %vm1843_vm15 = vweird.f32 %v1837_v4  ;;  %v1847_v40 = vand.u32 2147483647, %v1837_v4 }
0x28eb   :  { %v3397_v30 = vor.u32 1.1754944e-38, %v3396_v9  ;;  %vm3395_vm12 = vcmp.eq.f32.partialorder %v3394_v1, 8.507059e+37  ;;  %v1854_v25 = vmul.f32 1.442695, %v1853_v23 }
0x28ec   :  { %v1850_v12 = vor.u32 1.1754944e-38, %v1849_v3  ;;  %vm1848_vm2 = vcmp.eq.f32.partialorder %v1847_v40, 8.507059e+37 }
0x28ed   :  { %5171 = vpow2.f32 %v1854_v25 }
0x28ee   :  { %1830 = vrot.lane.b32.xlu1 %v1829_v8, %s5722_s7 }
0x28ef   :  { %v5168_v57 = vpop.eup %5167 }
0x28f0   :  { %v3386_v58 = vmul.f32 %v5168_v57, %v3384_v24  ;;  %v5170_v48 = vpop.eup %5169  ;;  %vm3391_vm9 = vweird.f32 %v5168_v57  ;;  %v6647_v24 = vld [vmem:[%s6939_s20 + $0x8] sm:$0xff] }
0x28f1   :  { %v1839_v6 = vmul.f32 %v5170_v48, %v1837_v4  ;;  %vm3392_vm11 = vmor %vm3390_vm10, %vm3391_vm9  ;;  %vm1844_vm14 = vweird.f32 %v5170_v48  ;;  %3974 = vst.msk [vmem:[#allocation2 + $0x10] sm:$0xff] %vm3972_vm5, %v6647_v24  ;;  %4814 = vmatmul.msk.f32.gmra.mxu2 %vm3972_vm5, %v6647_v24  ;;  %vm3988_vm10 = vcmask 1041408  }
0x28f2   :  { %v3387_v26 = vsub.f32 1.0, %v3386_v58  ;;  %vm1845_vm1 = vmor %vm1843_vm15, %vm1844_vm14 }
0x28f3   :  { %v1840_v63 = vsub.f32 1.0, %v1839_v6  ;;  %v5172_v33 = vpop.eup %5171  ;;  %v6670_v6 = vld [vmem:[%s6939_s20 + $0x18] sm:$0xff] }
0x28f4   :  { %v3388_v0 = vmul.f32 %v5168_v57, %v3387_v26  ;;  %v1856_v61 = vadd.f32 1.0, %v5172_v33  ;;  %3976 = vst.msk [vmem:[#allocation2 + $0x20] sm:$0xff] %vm3972_vm5, %v6670_v6 }
0x28f5   :  { %v1841_v29 = vmul.f32 %v5170_v48, %v1840_v63 }
0x28f6   :  { %v3389_v54 = vadd.f32 %v5168_v57, %v3388_v0  ;;  %5173 = vrcp.f32 %v1856_v61  ;;  %v1868_v51 = vand.u32 2147483648, %v1856_v61  ;;  %vm1862_vm7 = vweird.f32 %v1856_v61 }
0x28f7   :  { %v1842_v15 = vadd.f32 %v5170_v48, %v1841_v29  ;;  %v1866_v52 = vand.u32 2147483647, %v1856_v61 }
0x28f8   :  { %v3393_v46 = vsel %vm3392_vm11, %v5168_v57, %v3389_v54  ;;  %v1869_v49 = vor.u32 1.1754944e-38, %v1868_v51  ;;  %v3979_v9 = vld [vmem:[#allocation2 + $0x10] sm:$0xff]  ;;  %v3467_v51 = vpop.f32.mrf.mxu2 }
0x28f9   :  { %v3398_v22 = vsel %vm3395_vm12, %v3397_v30, %v3393_v46  ;;  %v1846_v45 = vsel %vm1845_vm1, %v5170_v48, %v1842_v15  ;;  %vm1867_vm9 = vcmp.eq.f32.partialorder %v1866_v52, 8.507059e+37  ;;  %v6659_v48 = vld [vmem:[%s6939_s20 + $0x10] sm:$0xff]  ;;  %v3992_v1 = vrot.slane %v3979_v9, 6  ;;  %v3491_v52 = vpop.f32.mrf.mxu3 }
0x28fa   :  { %v1851_v17 = vsel %vm1848_vm2, %v1850_v12, %v1846_v45  ;;  %3975 = vst.msk [vmem:[#allocation2 + $0x18] sm:$0xff] %vm3972_vm5, %v6659_v48  ;;  %4815 = vmatmul.msk.f32.gmra.mxu2 %vm3972_vm5, %v6659_v48 }
0x28fc   :  { %v5174_v37 = vpop.eup %5173 }
0x28fd   :  { %v1858_v8 = vmul.f32 %v5174_v37, %v1856_v61  ;;  %vm1863_vm6 = vweird.f32 %v5174_v37 }
0x28fe   :  { %vm1864_vm8 = vmor %vm1862_vm7, %vm1863_vm6 }
0x28ff   :  { %v1859_v41 = vsub.f32 1.0, %v1858_v8 }
0x2901   :  { %v1860_v43 = vmul.f32 %v5174_v37, %v1859_v41  ;;  %v3980_v29 = vld [vmem:[#allocation2 + $0x18] sm:$0xff] }
0x2902   :  { %4816 = vmatmul.msk.f32.gmra.mxu2 %vm3972_vm5, %v6670_v6  ;;  %v3994_v30 = vrot.slane %v3980_v29, 6 }
0x2903   :  { %v1861_v50 = vadd.f32 %v5174_v37, %v1860_v43 }
0x2905   :  { %v1865_v56 = vsel %vm1864_vm8, %v5174_v37, %v1861_v50 }
0x2906   :  { %v1870_v4 = vsel %vm1867_vm9, %v1869_v49, %v1865_v56  ;;  %v3511_v56 = vpop.f32.mrf.mxu0 }
0x2907   :  { %v1895_v57 = vmul.f32 %v1893_v11, %v1870_v4  ;;  %v6695_v11 = vld [vmem:[#allocation3] ss:$0 sm:$0xff] }
0x2950   :  { %v3417_v31 = vpop.permute.xlu1 %3416 }
0x2951   :  { %v6621_v39 = vmul.f32 %v3417_v31, %v3398_v22  ;;  %v3995_v22 = vsel %vm3988_vm10, %v3992_v1, %v3994_v30  ;;  %v3981_v31 = vld [vmem:[#allocation2 + $0x20] sm:$0xff] }
0x2952   :  { %v3996_v15 = vrot.slane %v3981_v31, 6 }
0x2953   :  { %3426 = vrot.lane.b32.xlu0 %v6621_v39, %s5726_s17 }
0x2954   :  { %v3997_v40 = vsel %vm3988_vm10, %v3994_v30, %v3996_v15 }
0x2958   :  { %v1898_v28 = vpop.permute.xlu1 %1897 }
0x2959   :  { %v1900_v19 = vmul.f32 %v1898_v28, %v1851_v17 }
0x295b   :  { %1902 = vrot.lane.b32.xlu0 %v1900_v19, %s5724_s27 }
0x2960   :  { %v1831_v3 = vpop.permute.xlu1 %1830 }
0x2961   :  { %v1833_v45 = vadd.f32 %v1831_v3, %v6191_v2 }
0x2963   :  { %v1873_v12 = vsub.f32 0.0, %v1833_v45 }
0x2965   :  { %v1874_v28 = vmul.f32 1.442695, %v1873_v12 }
0x29c5   :  { %v3427_v53 = vpop.permute.xlu0 %3426 }
0x29c6   :  { %4791 = vmatmul.msk.f32.vlgmr.msra.gmra.mxu1 %vm443_vm13, %v3427_v53  ;;  %v3552_v53 = vpop.f32.mrf.mxu2 }
0x29c7   :  { %3611 = vmatpush.msra.mxu1 %v6552_v10 }
0x29c9   :  { %3612 = vmatpush.msra.mxu1 %v6555_v16 }
0x29cd   :  { %v1903_v58 = vpop.permute.xlu0 %1902 }
0x29ce   :  { %v1905_v26 = vadd.f32 %v1903_v58, %v1895_v57  ;;  %4795 = vmatmul.msk.f32.vlgmr.msrb.gmra.mxu1 %vm443_vm13, %v6527_v34  ;;  %v3512_v57 = vadd.f32 %v3511_v56, %v3491_v52  ;;  %v3573_v58 = vpop.f32.mrf.mxu3 }
0x29cf   :  { %3693 = vmatpush.msrb.mxu1 %v6552_v10  ;;  %v6678_v10 = vld [vmem:[#allocation2] sm:$0xff] }
0x29d0   :  { %5175 = vtanh.f32 %v1905_v26 }
0x29d1   :  { %3694 = vmatpush.msrb.mxu1 %v6555_v16  ;;  %v3978_v16 = vld [vmem:[#allocation2 + $0x8] sm:$0xff]  ;;  %5177 = vpow2.f32 %v1874_v28 }
0x29d2   :  { %v3990_v54 = vrot.slane %v3978_v16, 6  ;;  %v6701_v16 = vadd.f32 %v6695_v11, %v3512_v57 }
0x29d4   :  { %v3993_v46 = vsel %vm3988_vm10, %v3990_v54, %v3992_v1 }
0x29d6   :  { %v5176_v0 = vpop.eup %5175  ;;  %4799 = vmatmul.msk.f32.vlgmr.msra.gmra.mxu1 %vm443_vm13, %v6461_v62  ;;  %v3989_v62 = vrot.slane %v6678_v10, 6  ;;  %v3655_v15 = vpop.f32.mrf.mxu3 }
0x29d7   :  { %1908 = vrot.lane.b32.xlu2 %v5176_v0, %s5723_s21  ;;  %4807 = vmatpush.msk.msra.mxu1 %vm4006_vm3, %v3982_v55  ;;  %v5178_v17 = vpop.eup %5177  ;;  %v3634_v55 = vpop.f32.mrf.mxu2 }
0x29d8   :  { %v3991_v63 = vsel %vm3988_vm10, %v3989_v62, %v3990_v54  ;;  %v1876_v19 = vadd.f32 1.0, %v5178_v17 }
0x29da   :  { %5179 = vrcp.f32 %v1876_v19  ;;  %v1888_v61 = vand.u32 2147483648, %v1876_v19  ;;  %vm1882_vm12 = vweird.f32 %v1876_v19  ;;  %v1886_v37 = vand.u32 2147483647, %v1876_v19 }
0x29dc   :  { %v1889_v2 = vor.u32 1.1754944e-38, %v1888_v61  ;;  %vm1887_vm15 = vcmp.eq.f32.partialorder %v1886_v37, 8.507059e+37 }
0x29de   :  { %4803 = vmatmul.msk.f32.vlgmr.msrb.gmra.mxu1 %vm443_vm13, %v6392_v18 }
0x29df   :  { %v3716_v3 = vpop.f32.mrf.mxu2 }
0x29e0   :  { %v5180_v7 = vpop.eup %5179 }
0x29e1   :  { %v1878_v21 = vmul.f32 %v5180_v7, %v1876_v19  ;;  %vm1883_vm11 = vweird.f32 %v5180_v7  ;;  %v4106_v19 = vld [vmem:[#allocation18] sm:$0xff] }
0x29e2   :  { %vm1884_vm14 = vmor %vm1882_vm12, %vm1883_vm11  ;;  %4144 = vmatpush.msra.mxu3 %v4106_v19 }
0x29e3   :  { %v1879_v23 = vsub.f32 1.0, %v1878_v21 }
0x29e5   :  { %v1880_v25 = vmul.f32 %v5180_v7, %v1879_v23 }
0x29e6   :  { %4808 = vmatmul.msk.f32.vlgmr.msra.gmra.mxu1 %vm3972_vm5, %v3991_v63  ;;  %v3593_v63 = vpop.f32.mrf.mxu0 }
0x29e7   :  { %v1881_v33 = vadd.f32 %v5180_v7, %v1880_v25  ;;  %v4071_v25 = vpop.f32.mrf.mxu2 }
0x29e9   :  { %v1885_v8 = vsel %vm1884_vm14, %v5180_v7, %v1881_v33 }
0x29ea   :  { %v1890_v41 = vsel %vm1887_vm15, %v1889_v2, %v1885_v8  ;;  %v4917_v8 = vld [vmem:[#allocation16] ss:$0 sm:$0xff] }
0x29ee   :  { %4809 = vmatmul.msk.f32.gmra.mxu1 %vm3972_vm5, %v3993_v46  ;;  %v3594_v46 = vadd.f32 %v3593_v63, %v3573_v58  ;;  %v3675_v12 = vpop.f32.mrf.mxu0 }
0x29ef   :  { %v3676_v28 = vadd.f32 %v3675_v12, %v3655_v15  ;;  %v4096_v15 = vld [vmem:[#allocation18 + $0x8] sm:$0xff] }
0x29f0   :  { %4185 = vmatpush.msra.mxu0 %v4096_v15 }
0x29f1   :  { %v6718_v21 = vadd.f32 %v6695_v11, %v3676_v28 }
0x29f6   :  { %4810 = vmatmul.msk.f32.gmra.mxu1 %vm3972_vm5, %v3995_v22  ;;  %v6710_v22 = vadd.f32 %v6695_v11, %v3594_v46 }
0x29fe   :  { %4811 = vmatmul.msk.f32.gmra.mxu1 %vm3972_vm5, %v3997_v40 }
0x2a31   :  { %v1909_v43 = vpop.permute.xlu2 %1908 }
0x2a32   :  { %v1911_v20 = vmul.f32 %v1909_v43, %v1890_v41 }
0x2a34   :  { %v3741_v50 = vrot.slane %v1911_v20, 6  ;;  %v4074_v20 = vpop.f32.mrf.mxu2 }
0x2a36   :  { %3742 = vrot.lane.b32.xlu0 %v3741_v50, %s5726_s17 }
0x2a43   :  { %v3447_v49 = vpop.f32.mrf.mxu1 }
0x2a44   :  { %v3468_v4 = vadd.f32 %v3467_v51, %v3447_v49  ;;  %v4077_v49 = vpop.f32.mrf.mxu2 }
0x2a46   :  { %v6698_v26 = vadd.f32 %v6695_v11, %v3468_v4 }
0x2a48   :  { %v3767_v9 = vmax.f32 %v6698_v26, %v6701_v16 }
0x2a4b   :  { %v3532_v0 = vpop.f32.mrf.mxu1 }
0x2a4c   :  { %v3553_v54 = vadd.f32 %v3552_v53, %v3532_v0 }
0x2a4e   :  { %v6706_v1 = vadd.f32 %v6695_v11, %v3553_v54 }
0x2a50   :  { %v3768_v29 = vmax.f32 %v3767_v9, %v6706_v1 }
0x2a52   :  { %v3769_v45 = vmax.f32 %v3768_v29, %v6710_v22 }
0x2a53   :  { %v3614_v30 = vpop.f32.mrf.mxu1 }
0x2a54   :  { %v3635_v31 = vadd.f32 %v3634_v55, %v3614_v30  ;;  %v4080_v30 = vpop.f32.mrf.mxu2 }
0x2a56   :  { %v6713_v40 = vadd.f32 %v6695_v11, %v3635_v31  ;;  %v4211_v31 = vld [vmem:[#allocation21] sm:$0xf] }
0x2a57   :  { %4825 = vmatpush.msk.msrb.mxu1 %vm4006_vm3, %v4211_v31 }
0x2a58   :  { %v3770_v17 = vmax.f32 %v3769_v45, %v6713_v40  ;;  %4826 = vmatmul.msk.f32.vlgmr.msrb.gmra.mxu1 %vm3972_vm5, %v6628_v44 }
0x2a5a   :  { %v3771_v61 = vmax.f32 %v3770_v17, %v6718_v21 }
0x2a5b   :  { %v3696_v7 = vpop.f32.mrf.mxu1 }
0x2a5c   :  { %v3717_v23 = vadd.f32 %v3716_v3, %v3696_v7 }
0x2a5e   :  { %v6721_v33 = vadd.f32 %v6695_v11, %v3717_v23 }
0x2a60   :  { %v6725_v37 = vmax.f32 %v3771_v61, %v6721_v33  ;;  %4827 = vmatmul.msk.f32.gmra.mxu1 %vm3972_vm5, %v6647_v24  ;;  %v4257_v24 = vld [vmem:[#allocation24 + $0x8] sm:$0xff]  ;;  %v3737_v61 = vpop.f32.mrf.mxu3 }
0x2a61   :  { %4346 = vmatpush.msrb.mxu3 %v4257_v24 }
0x2a63   :  { %v4027_v2 = vpop.f32.mrf.mxu1 }
0x2a64   :  { %v4072_v41 = vadd.f32 %v4071_v25, %v4027_v2 }
0x2a66   :  { %v4087_v43 = vadd.f32 %v4917_v8, %v4072_v41 }
0x2a68   :  { %v4091_v50 = vmax.f32 %v4087_v43, 0.0  ;;  %4828 = vmatmul.msk.f32.gmra.mxu1 %vm3972_vm5, %v6659_v48  ;;  %v4267_v48 = vld [vmem:[#allocation24] sm:$0xff] }
0x2a69   :  { %4305 = vmatpush.msrb.mxu2 %v4267_v48 }
0x2a6a   :  { %4097 = vst.msk [vmem:[#allocation2 + $0x8] sm:$0xff] %vm3960_vm4, %v4091_v50 }
0x2a6b   :  { %v4030_v51 = vpop.f32.mrf.mxu1 }
0x2a6c   :  { %v4075_v52 = vadd.f32 %v4074_v20, %v4030_v51  ;;  %v6762_v51 = vld [vmem:[#allocation22] ss:$0 sm:$0xff] }
0x2a6e   :  { %v4088_v53 = vadd.f32 %v4917_v8, %v4075_v52 }
0x2a70   :  { %v4092_v56 = vmax.f32 %v4088_v53, 0.0  ;;  %4829 = vmatmul.msk.f32.gmra.mxu1 %vm3972_vm5, %v6670_v6 }
0x2a71   :  { %v4102_v4 = vld [vmem:[#allocation2 + $0x8] sm:$0xff] }
0x2a72   :  { %4098 = vst.msk [vmem:[#allocation2 + $0x10] sm:$0xff] %vm3960_vm4, %v4092_v56  ;;  %v4113_v57 = vrot.slane %v4102_v4, 6 }
0x2a73   :  { %v4033_v58 = vpop.f32.mrf.mxu1 }
0x2a74   :  { %v4078_v55 = vadd.f32 %v4077_v49, %v4033_v58  ;;  %v4114_v0 = vsel %vm3988_vm10, %v3989_v62, %v4113_v57 }
0x2a75   :  { %4817 = vmatmul.msk.f32.vlgmr.msra.gmra.mxu3 %vm3960_vm4, %v4114_v0 }
0x2a76   :  { %v4089_v54 = vadd.f32 %v4917_v8, %v4078_v55 }
0x2a78   :  { %v4093_v63 = vmax.f32 %v4089_v54, 0.0 }
0x2a79   :  { %v4103_v9 = vld [vmem:[#allocation2 + $0x10] sm:$0xff] }
0x2a7a   :  { %4099 = vst.msk [vmem:[#allocation2 + $0x18] sm:$0xff] %vm3960_vm4, %v4093_v63  ;;  %v4115_v46 = vrot.slane %v4103_v9, 6 }
0x2a7b   :  { %v4036_v29 = vpop.f32.mrf.mxu1 }
0x2a7c   :  { %v4081_v3 = vadd.f32 %v4080_v30, %v4036_v29  ;;  %v4116_v45 = vsel %vm3988_vm10, %v4113_v57, %v4115_v46 }
0x2a7d   :  { %4818 = vmatmul.msk.f32.gmra.mxu3 %vm3960_vm4, %v4116_v45 }
0x2a7e   :  { %v4090_v62 = vadd.f32 %v4917_v8, %v4081_v3 }
0x2a80   :  { %v4094_v12 = vmax.f32 %v4090_v62, 0.0 }
0x2a81   :  { %v4104_v28 = vld [vmem:[#allocation2 + $0x18] sm:$0xff] }
0x2a82   :  { %4100 = vst.msk [vmem:[#allocation2 + $0x20] sm:$0xff] %vm3960_vm4, %v4094_v12  ;;  %v4117_v17 = vrot.slane %v4104_v28, 6 }
0x2a84   :  { %v4118_v19 = vsel %vm3988_vm10, %v4115_v46, %v4117_v17 }
0x2a85   :  { %4819 = vmatmul.msk.f32.gmra.mxu3 %vm3960_vm4, %v4118_v19 }
0x2a89   :  { %v4105_v7 = vld [vmem:[#allocation2 + $0x20] sm:$0xff] }
0x2a8a   :  { %v4119_v23 = vrot.slane %v4105_v7, 6 }
0x2a8c   :  { %v4120_v25 = vsel %vm3988_vm10, %v4117_v17, %v4119_v23 }
0x2a8d   :  { %4820 = vmatmul.msk.f32.gmra.mxu3 %vm3960_vm4, %v4120_v25 }
0x2aa8   :  { %v6750_v44 = vpop.permute.xlu0 %3742 }
0x2aa9   :  { %4806 = vmatmul.msk.f32.vlgmr.msrb.gmra.mxu0 %vm443_vm13, %v6750_v44 }
0x2ab1   :  { %4821 = vmatmul.msk.f32.vlgmr.msra.gmra.mxu0 %vm3960_vm4, %v4091_v50  ;;  %v6760_v50 = vld [vmem:[#allocation19] ss:$0 sm:$0xff] }
0x2ab9   :  { %4822 = vmatmul.msk.f32.gmra.mxu0 %vm3960_vm4, %v4092_v56 }
0x2ac1   :  { %4823 = vmatmul.msk.f32.gmra.mxu0 %vm3960_vm4, %v4093_v63 }
0x2ac9   :  { %4824 = vmatmul.msk.f32.gmra.mxu0 %vm3960_vm4, %v4094_v12 }
0x2ad5   :  { %v4236_v41 = vpop.f32.mrf.mxu1 }
0x2ad6   :  { %v4237_v63 = vadd.f32 %v6762_v51, %v4236_v41 }
0x2add   :  { %v4239_v9 = vpop.f32.mrf.mxu1 }
0x2ade   :  { %v4240_v12 = vadd.f32 %v6762_v51, %v4239_v9 }
0x2ae5   :  { %v4242_v24 = vpop.f32.mrf.mxu1 }
0x2af8   :  { %v4146_v2 = vpop.f32.mrf.mxu3 }
0x2b00   :  { %v4149_v0 = vpop.f32.mrf.mxu3 }
0x2b08   :  { %v4152_v23 = vpop.f32.mrf.mxu3 }
0x2b26   :  { %v3763_v8 = vpop.f32.mrf.mxu0 }
0x2b27   :  { %v3764_v6 = vadd.f32 %v3763_v8, %v3737_v61 }
0x2b29   :  { %v3766_v43 = vadd.f32 %v6695_v11, %v3764_v6 }
0x2b2b   :  { %v3773_v20 = vmax.f32 %v6725_v37, %v3766_v43 }
0x2b2d   :  { %v3774_v52 = vsub.f32 %v6698_v26, %v3773_v20  ;;  %v3777_v53 = vsub.f32 %v6701_v16, %v3773_v20  ;;  %v3780_v56 = vsub.f32 %v6706_v1, %v3773_v20  ;;  %v3786_v4 = vsub.f32 %v6713_v40, %v3773_v20 }
0x2b2e   :  { %v4187_v49 = vpop.f32.mrf.mxu0  ;;  %v3792_v57 = vsub.f32 %v6721_v33, %v3773_v20  ;;  %v3783_v37 = vsub.f32 %v6710_v22, %v3773_v20  ;;  %v3789_v40 = vsub.f32 %v6718_v21, %v3773_v20  ;;  %v5727_v33 = vmov 0  }
0x2b2f   :  { %v4188_v58 = vadd.f32 %v4187_v49, %v4146_v2  ;;  %v3775_v55 = vmul.f32 1.442695, %v3774_v52  ;;  %v3778_v11 = vmul.f32 1.442695, %v3777_v53  ;;  %v3781_v26 = vmul.f32 1.442695, %v3780_v56  ;;  %4913 = vset.pattern.permute.xlu0 %v5727_v33  ;;  %4912 = vset.pattern.permute.xlu2 %v5727_v33 }
0x2b30   :  { %v3784_v1 = vmul.f32 1.442695, %v3783_v37  ;;  %v3787_v29 = vmul.f32 1.442695, %v3786_v4  ;;  %v3795_v22 = vsub.f32 %v3766_v43, %v3773_v20  ;;  %4911 = vset.pattern.permute.xlu1 %v5727_v33  ;;  %v3790_v3 = vmul.f32 1.442695, %v3789_v40 }
0x2b31   :  { %v4203_v54 = vadd.f32 %v6760_v50, %v4188_v58  ;;  %5181 = vpow2.f32 %v3775_v55  ;;  %v3793_v28 = vmul.f32 1.442695, %v3792_v57  ;;  %v4273_v52 = vrot.slane %v6678_v10, 4 }
0x2b32   :  { %5183 = vpow2.f32 %v3778_v11  ;;  %v3796_v7 = vmul.f32 1.442695, %v3795_v22  ;;  %v4243_v57 = vadd.f32 %v6762_v51, %v4242_v24 }
0x2b33   :  { %v4207_v16 = vmax.f32 %v4203_v54, 0.0  ;;  %5185 = vpow2.f32 %v3781_v26  ;;  %v4155_v26 = vpop.f32.mrf.mxu3 }
0x2b34   :  { %5187 = vpow2.f32 %v3784_v1  ;;  %v4245_v1 = vpop.f32.mrf.mxu1 }
0x2b35   :  { %v4248_v46 = vadd.f32 %v4237_v63, %v4207_v16  ;;  %5189 = vpow2.f32 %v3787_v29 }
0x2b36   :  { %v4190_v30 = vpop.f32.mrf.mxu0  ;;  %5191 = vpow2.f32 %v3790_v3 }
0x2b37   :  { %v6773_v31 = vmax.f32 %v4248_v46, 0.0  ;;  %v4191_v15 = vadd.f32 %v4190_v30, %v4149_v0  ;;  %v6775_v45 = vpop.eup %5181  ;;  %5193 = vpow2.f32 %v3793_v28  ;;  %v4246_v30 = vadd.f32 %v6762_v51, %v4245_v1 }
0x2b38   :  { %v6777_v62 = vpop.eup %5183  ;;  %5195 = vpow2.f32 %v3796_v7 }
0x2b39   :  { %4258 = vst.msk [vmem:[#allocation2 + $0x8] sm:$0xff] %vm3960_vm4, %v6773_v31  ;;  %v4204_v21 = vadd.f32 %v6760_v50, %v4191_v15  ;;  %4834 = vmatmul.msk.f32.vlgmr.msrb.gmra.mxu3 %vm3960_vm4, %v6773_v31  ;;  %v3798_v17 = vadd.f32 %v6777_v62, %v6775_v45  ;;  %v6787_v19 = vpop.eup %5185 }
0x2b3a   :  { %v6790_v48 = vpop.eup %5187 }
0x2b3b   :  { %v4208_v25 = vmax.f32 %v4204_v21, 0.0  ;;  %v3799_v61 = vadd.f32 %v6787_v19, %v3798_v17  ;;  %v6793_v41 = vpop.eup %5189 }
0x2b3c   :  { %v5192_v49 = vpop.eup %5191 }
0x2b3d   :  { %v4249_v8 = vadd.f32 %v4240_v12, %v4208_v25  ;;  %v3800_v2 = vadd.f32 %v6790_v48, %v3799_v61  ;;  %v5194_v11 = vpop.eup %5193 }
0x2b3e   :  { %v4193_v6 = vpop.f32.mrf.mxu0  ;;  %v5196_v63 = vpop.eup %5195 }
0x2b3f   :  { %v6795_v43 = vmax.f32 %v4249_v8, 0.0  ;;  %v4194_v20 = vadd.f32 %v4193_v6, %v4152_v23  ;;  %v3801_v56 = vadd.f32 %v6793_v41, %v3800_v2 }
0x2b40   :  { %v4263_v53 = vld [vmem:[#allocation2 + $0x8] sm:$0xff] }
0x2b41   :  { %4259 = vst.msk [vmem:[#allocation2 + $0x10] sm:$0xff] %vm3960_vm4, %v6795_v43  ;;  %v4205_v4 = vadd.f32 %v6760_v50, %v4194_v20  ;;  %4835 = vmatmul.msk.f32.gmra.mxu3 %vm3960_vm4, %v6795_v43  ;;  %v4274_v58 = vrot.slane %v4263_v53, 4  ;;  %v3802_v55 = vadd.f32 %v5192_v49, %v3801_v56 }
0x2b43   :  { %v4209_v37 = vmax.f32 %v4205_v4, 0.0  ;;  %v4275_v0 = vsel %vm4006_vm3, %v4273_v52, %v4274_v58  ;;  %v3803_v54 = vadd.f32 %v5194_v11, %v3802_v55 }
0x2b44   :  { %4830 = vmatmul.msk.f32.vlgmr.msrb.gmra.mxu2 %vm3960_vm4, %v4275_v0 }
0x2b45   :  { %v4250_v9 = vadd.f32 %v4243_v57, %v4209_v37  ;;  %v3804_v40 = vadd.f32 %v5196_v63, %v3803_v54 }
0x2b46   :  { %v4196_v16 = vpop.f32.mrf.mxu0 }
0x2b47   :  { %v6809_v46 = vmax.f32 %v4250_v9, 0.0  ;;  %v4197_v33 = vadd.f32 %v4196_v16, %v4155_v26  ;;  %5197 = vrcp.f32 %v3804_v40  ;;  %v3816_v25 = vand.u32 2147483648, %v3804_v40 }
0x2b48   :  { %v4264_v29 = vld [vmem:[#allocation2 + $0x10] sm:$0xff]  ;;  %v3814_v8 = vand.u32 2147483647, %v3804_v40  ;;  %vm3810_vm2 = vweird.f32 %v3804_v40 }
0x2b49   :  { %4260 = vst.msk [vmem:[#allocation2 + $0x18] sm:$0xff] %vm3960_vm4, %v6809_v46  ;;  %v4206_v22 = vadd.f32 %v6760_v50, %v4197_v33  ;;  %4836 = vmatmul.msk.f32.gmra.mxu3 %vm3960_vm4, %v6809_v46  ;;  %v4276_v15 = vrot.slane %v4264_v29, 4  ;;  %v3817_v2 = vor.u32 1.1754944e-38, %v3816_v25 }
0x2b4a   :  { %vm3815_vm6 = vcmp.eq.f32.partialorder %v3814_v8, 8.507059e+37 }
0x2b4b   :  { %v4210_v3 = vmax.f32 %v4206_v22, 0.0  ;;  %v4277_v21 = vsel %vm4006_vm3, %v4274_v58, %v4276_v15 }
0x2b4c   :  { %4831 = vmatmul.msk.f32.gmra.mxu2 %vm3960_vm4, %v4277_v21 }
0x2b4d   :  { %v4251_v12 = vadd.f32 %v4246_v30, %v4210_v3  ;;  %v5198_v28 = vpop.eup %5197 }
0x2b4e   :  { %v3806_v7 = vmul.f32 %v5198_v28, %v3804_v40  ;;  %vm3811_vm1 = vweird.f32 %v5198_v28 }
0x2b4f   :  { %v6819_v17 = vmax.f32 %v4251_v12, 0.0  ;;  %vm3812_vm5 = vmor %vm3810_vm2, %vm3811_vm1 }
0x2b50   :  { %v4265_v23 = vld [vmem:[#allocation2 + $0x18] sm:$0xff]  ;;  %v3807_v51 = vsub.f32 1.0, %v3806_v7 }
0x2b51   :  { %4261 = vst.msk [vmem:[#allocation2 + $0x20] sm:$0xff] %vm3960_vm4, %v6819_v17  ;;  %4837 = vmatmul.msk.f32.gmra.mxu3 %vm3960_vm4, %v6819_v17  ;;  %v4278_v50 = vrot.slane %v4265_v23, 4 }
0x2b52   :  { %v3808_v61 = vmul.f32 %v5198_v28, %v3807_v51 }
0x2b53   :  { %v4279_v24 = vsel %vm4006_vm3, %v4276_v15, %v4278_v50 }
0x2b54   :  { %4832 = vmatmul.msk.f32.gmra.mxu2 %vm3960_vm4, %v4279_v24  ;;  %v3809_v6 = vadd.f32 %v5198_v28, %v3808_v61 }
0x2b56   :  { %v3813_v20 = vsel %vm3812_vm5, %v5198_v28, %v3809_v6 }
0x2b57   :  { %v3818_v53 = vsel %vm3815_vm6, %v3817_v2, %v3813_v20 }
0x2b58   :  { %v4266_v56 = vld [vmem:[#allocation2 + $0x20] sm:$0xff]  ;;  %v3870_v4 = vmul.f32 %v6790_v48, %v3818_v53  ;;  %v3850_v57 = vmul.f32 %v6787_v19, %v3818_v53  ;;  %v3830_v58 = vmul.f32 %v6777_v62, %v3818_v53  ;;  %v3890_v37 = vmul.f32 %v6793_v41, %v3818_v53  ;;  %v4373_v62 = vld [vmem:[#allocation27 + $0x8] sm:$0xff] }
0x2b59   :  { %v4280_v55 = vrot.slane %v4266_v56, 4  ;;  %v3920_v0 = vmul.f32 %v5194_v11, %v3818_v53  ;;  %v3900_v54 = vmul.f32 %v5192_v49, %v3818_v53  ;;  %v3940_v26 = vmul.f32 %v5196_v63, %v3818_v53  ;;  %4462 = vmatpush.msra.mxu1 %v4373_v62  ;;  %v4383_v41 = vld [vmem:[#allocation27] sm:$0xff]  ;;  %v4920_v11 = vld [vmem:[#allocation25] ss:$0 sm:$0xff] }
0x2b5a   :  { %3873 = vperm.xlu0 %4913, %v3870_v4   ;;  %3853 = vperm.xlu2 %4912, %v3850_v57   ;;  %v3820_v16 = vmul.f32 %v6775_v45, %v3818_v53 }
0x2b5b   :  { %v4281_v9 = vsel %vm4006_vm3, %v4278_v50, %v4280_v55  ;;  %3833 = vperm.xlu1 %4911, %v3830_v58   ;;  %4421 = vmatpush.msrb.mxu0 %v4383_v41 }
0x2b5c   :  { %4833 = vmatmul.msk.f32.gmra.mxu2 %vm3960_vm4, %v4281_v9 }
0x2b62   :  { %3893 = vperm.xlu0 %4913, %v3890_v37   ;;  %3923 = vperm.xlu2 %4912, %v3920_v0  }
0x2b63   :  { %3903 = vperm.xlu1 %4911, %v3900_v54  }
0x2b6a   :  { %3823 = vperm.xlu2 %4912, %v3820_v16  }
0x2b6b   :  { %3943 = vperm.xlu1 %4911, %v3940_v26  }
0x2bb4   :  { %v3854_v19 = vpop.permute.xlu2 %3853 }
0x2bb5   :  { %v3857_v48 = vmul.f32 %v3854_v19, %v6136_v14 }
0x2bb7   :  { %3859 = vrot.lane.b32.xlu1 %v3857_v48, %s5722_s7 }
0x2bbc   :  { %v4348_v49 = vpop.f32.mrf.mxu3  ;;  %v3924_v8 = vpop.permute.xlu2 %3923 }
0x2bc4   :  { %v4351_v40 = vpop.f32.mrf.mxu3 }
0x2bc7   :  { %v4307_v45 = vpop.f32.mrf.mxu2 }
0x2bc8   :  { %v4349_v63 = vadd.f32 %v4348_v49, %v4307_v45 }
0x2bca   :  { %v4364_v1 = vadd.f32 %v4920_v11, %v4349_v63 }
0x2bcc   :  { %v4368_v33 = vmax.f32 %v4364_v1, 0.0  ;;  %v3874_v29 = vpop.permute.xlu0 %3873  ;;  %v4354_v7 = vpop.f32.mrf.mxu3 }
0x2bcd   :  { %v3877_v22 = vmul.f32 %v3874_v29, %v6169_v38  ;;  %v3834_v30 = vpop.permute.xlu1 %3833  ;;  %v3864_v38 = vmul.f32 %v3854_v19, %v6527_v34 }
0x2bce   :  { %4374 = vst.msk [vmem:[#allocation2 + $0x8] sm:$0xff] %vm3960_vm4, %v4368_v33  ;;  %4842 = vmatmul.msk.f32.vlgmr.msra.gmra.mxu1 %vm3960_vm4, %v4368_v33  ;;  %v3837_v14 = vmul.f32 %v3834_v30, %v6101_v47  ;;  %v3844_v15 = vmul.f32 %v3834_v30, %v6560_v36  ;;  %v3884_v36 = vmul.f32 %v3874_v29, %v6494_v42 }
0x2bcf   :  { %v4310_v3 = vpop.f32.mrf.mxu2  ;;  %3879 = vrot.lane.b32.xlu2 %v3877_v22, %s5722_s7 }
0x2bd0   :  { %v4352_v21 = vadd.f32 %v4351_v40, %v4310_v3  ;;  %3846 = vrot.lane.b32.xlu1 %v3844_v15, %s5722_s7  ;;  %3839 = vrot.lane.b32.xlu0 %v3837_v14, %s5722_s7 }
0x2bd2   :  { %v4365_v12 = vadd.f32 %v4920_v11, %v4352_v21 }
0x2bd4   :  { %v4369_v28 = vmax.f32 %v4365_v12, 0.0  ;;  %v4357_v20 = vpop.f32.mrf.mxu3  ;;  %v3894_v16 = vpop.permute.xlu0 %3893 }
0x2bd5   :  { %v4379_v23 = vld [vmem:[#allocation2 + $0x8] sm:$0xff]  ;;  %v3904_v50 = vpop.permute.xlu1 %3903  ;;  %v3896_v1 = vmul.f32 %v3894_v16, %v6205_v5 }
0x2bd6   :  { %4375 = vst.msk [vmem:[#allocation2 + $0x10] sm:$0xff] %vm3960_vm4, %v4369_v28  ;;  %4843 = vmatmul.msk.f32.gmra.mxu1 %vm3960_vm4, %v4369_v28  ;;  %v4390_v47 = vrot.slane %v4379_v23, 4  ;;  %v3907_v51 = vmul.f32 %v3904_v50, %v6242_v60  ;;  %v3927_v60 = vmul.f32 %v3924_v8, %v6291_v35 }
0x2bd7   :  { %v4313_v25 = vpop.f32.mrf.mxu2  ;;  %3866 = vrot.lane.b32.xlu2 %v3864_v38, %s5722_s7 }
0x2bd8   :  { %v4355_v24 = vadd.f32 %v4354_v7, %v4313_v25  ;;  %v4391_v61 = vsel %vm4006_vm3, %v4273_v52, %v4390_v47  ;;  %3886 = vrot.lane.b32.xlu1 %v3884_v36, %s5722_s7  ;;  %3909 = vrot.lane.b32.xlu0 %v3907_v51, %s5722_s7  ;;  %v3914_v52 = vmul.f32 %v3904_v50, %v6425_v13 }
0x2bd9   :  { %4838 = vmatmul.msk.f32.vlgmr.msrb.gmra.mxu0 %vm3960_vm4, %v4391_v61  ;;  %v3934_v13 = vmul.f32 %v3924_v8, %v6392_v18  ;;  %v3824_v18 = vpop.permute.xlu2 %3823 }
0x2bda   :  { %v4366_v34 = vadd.f32 %v4920_v11, %v4355_v24  ;;  %v3828_v63 = vmul.f32 %v3824_v18, %v6621_v39 }
0x2bdc   :  { %v4370_v6 = vmax.f32 %v4366_v34, 0.0  ;;  %v4551_v34 = vld [vmem:[%s6940_s11] sm:$0xff] }
0x2bdd   :  { %v4380_v42 = vld [vmem:[#allocation2 + $0x10] sm:$0xff]  ;;  %v3944_v2 = vpop.permute.xlu1 %3943 }
0x2bde   :  { %4376 = vst.msk [vmem:[#allocation2 + $0x18] sm:$0xff] %vm3960_vm4, %v4370_v6  ;;  %4844 = vmatmul.msk.f32.gmra.mxu1 %vm3960_vm4, %v4370_v6  ;;  %v4392_v10 = vrot.slane %v4380_v42, 4  ;;  %v3947_v53 = vmul.f32 %v3944_v2, %v6750_v44  ;;  %v3954_v37 = vmul.f32 %v3944_v2, %v6359_v32  ;;  %v3826_v32 = vmul.f32 %v3824_v18, %v6062_v27 }
0x2bdf   :  { %v4316_v56 = vpop.f32.mrf.mxu2  ;;  %3929 = vrot.lane.b32.xlu2 %v3927_v60, %s5722_s7  ;;  %v3898_v27 = vmul.f32 %v3894_v16, %v6457_v59  ;;  %v4552_v59 = vld [vmem:[%s6940_s11 + $0x8] sm:$0xff]  ;;  %v4921_v60 = vld [vmem:[#allocation28] ss:$0 sm:$0xff] }
0x2be0   :  { %v4358_v4 = vadd.f32 %v4357_v20, %v4316_v56  ;;  %v4393_v57 = vsel %vm4006_vm3, %v4390_v47, %v4392_v10  ;;  %3916 = vrot.lane.b32.xlu1 %v3914_v52, %s5722_s7  ;;  %3949 = vrot.lane.b32.xlu0 %v3947_v53, %s5722_s7 }
0x2be1   :  { %4839 = vmatmul.msk.f32.gmra.mxu0 %vm3960_vm4, %v4393_v57 }
0x2be2   :  { %v4367_v35 = vadd.f32 %v4920_v11, %v4358_v4  ;;  %4572 = vmatpush.msra.mxu0 %v4552_v59 }
0x2be4   :  { %v4371_v58 = vmax.f32 %v4367_v35, 0.0  ;;  %4573 = vmatpush.msra.mxu0 %v4551_v34 }
0x2be5   :  { %v4381_v55 = vld [vmem:[#allocation2 + $0x18] sm:$0xff] }
0x2be6   :  { %4377 = vst.msk [vmem:[#allocation2 + $0x20] sm:$0xff] %vm3960_vm4, %v4371_v58  ;;  %4845 = vmatmul.msk.f32.gmra.mxu1 %vm3960_vm4, %v4371_v58  ;;  %v4394_v44 = vrot.slane %v4381_v55, 4 }
0x2be7   :  { %3936 = vrot.lane.b32.xlu2 %v3934_v13, %s5722_s7 }
0x2be8   :  { %v4395_v0 = vsel %vm4006_vm3, %v4392_v10, %v4394_v44  ;;  %3956 = vrot.lane.b32.xlu0 %v3954_v37, %s5722_s7 }
0x2be9   :  { %4840 = vmatmul.msk.f32.gmra.mxu0 %vm3960_vm4, %v4395_v0 }
0x2bed   :  { %v4382_v54 = vld [vmem:[#allocation2 + $0x20] sm:$0xff] }
0x2bee   :  { %v4396_v26 = vrot.slane %v4382_v54, 4 }
0x2bf0   :  { %v4397_v9 = vsel %vm4006_vm3, %v4394_v44, %v4396_v26  ;;  %vm4673_vm3 = vcmask 1024  }
0x2bf1   :  { %4841 = vmatmul.msk.f32.gmra.mxu0 %vm3960_vm4, %v4397_v9 }
0x2c29   :  { %v3860_v62 = vpop.permute.xlu1 %3859  ;;  %v3880_v19 = vpop.permute.xlu2 %3879 }
0x2c31   :  { %v3867_v11 = vpop.permute.xlu2 %3866 }
0x2c39   :  { %v3930_v3 = vpop.permute.xlu2 %3929 }
0x2c41   :  { %v3937_v47 = vpop.permute.xlu2 %3936 }
0x2c42   :  { %v3840_v48 = vpop.permute.xlu0 %3839  ;;  %v3847_v41 = vpop.permute.xlu1 %3846 }
0x2c43   :  { %v3842_v49 = vadd.f32 %v3840_v48, %v3826_v32  ;;  %v3849_v33 = vadd.f32 %v3847_v41, %v3828_v63  ;;  %v4610_v41 = vld [vmem:[%s6942_s3 + $0x38] sm:$0xff] }
0x2c44   :  { %v4606_v63 = vld [vmem:[%s6942_s3 + $0x18] sm:$0xff] }
0x2c45   :  { %v3862_v45 = vadd.f32 %v3860_v62, %v3842_v49  ;;  %v3869_v15 = vadd.f32 %v3867_v11, %v3849_v33  ;;  %v4609_v49 = vld [vmem:[%s6942_s3 + $0x30] sm:$0xff]  ;;  %v4608_v11 = vld [vmem:[%s6942_s3 + $0x28] sm:$0xff]  ;;  %v4603_v33 = vld [vmem:[%s6942_s3] sm:$0xff] }
0x2c47   :  { %v3882_v40 = vadd.f32 %v3880_v19, %v3862_v45  ;;  %v4496_v19 = vld [vmem:[#allocation30] sm:$0x3]  ;;  %v4607_v45 = vld [vmem:[%s6942_s3 + $0x20] sm:$0xff] }
0x2c49   :  { %v3897_v29 = vadd.f32 %v3896_v1, %v3882_v40  ;;  %v4605_v1 = vld [vmem:[%s6942_s3 + $0x10] sm:$0xff]  ;;  %v4604_v40 = vld [vmem:[%s6942_s3 + $0x8] sm:$0xff] }
0x2c4a   :  { %v3910_v22 = vpop.permute.xlu0 %3909  ;;  %v3887_v30 = vpop.permute.xlu1 %3886 }
0x2c4b   :  { %v3912_v14 = vadd.f32 %v3910_v22, %v3897_v29  ;;  %v3889_v21 = vadd.f32 %v3887_v30, %v3869_v15  ;;  %v4464_v12 = vpop.f32.mrf.mxu1  ;;  %v4922_v29 = vld [vmem:[%s6943_s15] ss:$0 sm:$0xff]  ;;  %v4645_v15 = vld [vmem:[%s5874_s4 + $0x18] sm:$0xff] }
0x2c4c   :  { %4665 = vmatpush.msrb.mxu0 %v4645_v15 }
0x2c4d   :  { %v3932_v28 = vadd.f32 %v3930_v3, %v3912_v14  ;;  %v3899_v38 = vadd.f32 %v3898_v27, %v3889_v21  ;;  %v4644_v3 = vld [vmem:[%s5874_s4 + $0x10] sm:$0xff]  ;;  %v4643_v21 = vld [vmem:[%s5874_s4 + $0x8] sm:$0xff] }
0x2c4e   :  { %4666 = vmatpush.msrb.mxu0 %v4644_v3 }
0x2c50   :  { %4667 = vmatpush.msrb.mxu0 %v4643_v21 }
0x2c52   :  { %v3950_v7 = vpop.permute.xlu0 %3949  ;;  %v3917_v23 = vpop.permute.xlu1 %3916 }
0x2c53   :  { %v3952_v39 = vadd.f32 %v3950_v7, %v3932_v28  ;;  %v3919_v5 = vadd.f32 %v3917_v23, %v3899_v38  ;;  %v4467_v51 = vpop.f32.mrf.mxu1  ;;  %v4923_v23 = vld [vmem:[%s5869_s23] ss:$0 sm:$0xff] }
0x2c55   :  { %4579 = vrot.lane.b32.xlu1 %v3952_v39, %s5726_s17  ;;  %v3939_v36 = vadd.f32 %v3937_v47, %v3919_v5  ;;  %v4924_v47 = vld [vmem:[#allocation4] ss:$0 sm:$0xff] }
0x2c56   :  { %v4423_v50 = vpop.f32.mrf.mxu0 }
0x2c57   :  { %v4465_v10 = vadd.f32 %v4464_v12, %v4423_v50  ;;  %v4642_v12 = vld [vmem:[%s5874_s4] sm:$0xff] }
0x2c58   :  { %4668 = vmatpush.msrb.mxu0 %v4642_v12 }
0x2c59   :  { %v4480_v57 = vadd.f32 %v4921_v60, %v4465_v10 }
0x2c5a   :  { %v3957_v25 = vpop.permute.xlu0 %3956 }
0x2c5b   :  { %v3959_v24 = vadd.f32 %v3957_v25, %v3939_v36  ;;  %v4470_v8 = vpop.f32.mrf.mxu1  ;;  %v4484_v44 = vmax.f32 %v4480_v57, 0.0 }
0x2c5d   :  { %4554 = vrot.lane.b32.xlu2 %v3959_v24, %s5726_s17  ;;  %v4488_v18 = vadd.f32 %v4484_v44, %v6773_v31 }
0x2c5e   :  { %v4426_v61 = vpop.f32.mrf.mxu0 }
0x2c5f   :  { %v4468_v2 = vadd.f32 %v4467_v51, %v4426_v61  ;;  %v4492_v62 = vmax.f32 %v4488_v18, 0.0 }
0x2c61   :  { %v4481_v56 = vadd.f32 %v4921_v60, %v4468_v2 }
0x2c63   :  { %v4473_v20 = vpop.f32.mrf.mxu1  ;;  %v4485_v55 = vmax.f32 %v4481_v56, 0.0 }
0x2c65   :  { %v4489_v26 = vadd.f32 %v4485_v55, %v6795_v43  ;;  %v4520_v43 = vld [vmem:[%s6941_s16] sm:$0xff] }
0x2c66   :  { %v4429_v6 = vpop.f32.mrf.mxu0  ;;  %4543 = vmatpush.msra.mxu3 %v4520_v43 }
0x2c67   :  { %v4471_v42 = vadd.f32 %v4470_v8, %v4429_v6  ;;  %v4493_v16 = vmax.f32 %v4489_v26, 0.0 }
0x2c68   :  { %4623 = vmatpush.msrb.mxu3 %v4610_v41 }
0x2c69   :  { %v4482_v52 = vadd.f32 %v4921_v60, %v4471_v42 }
0x2c6a   :  { %4624 = vmatpush.msrb.mxu3 %v4609_v49 }
0x2c6b   :  { %v4486_v35 = vmax.f32 %v4482_v52, 0.0 }
0x2c6c   :  { %4625 = vmatpush.msrb.mxu3 %v4608_v11 }
0x2c6d   :  { %v4490_v0 = vadd.f32 %v4486_v35, %v6809_v46  ;;  %v4550_v46 = vld [vmem:[#allocation31 + $0x8] sm:$0xff] }
0x2c6e   :  { %v4432_v53 = vpop.f32.mrf.mxu0  ;;  %4626 = vmatpush.msrb.mxu3 %v4607_v45 }
0x2c6f   :  { %v4474_v4 = vadd.f32 %v4473_v20, %v4432_v53  ;;  %v4494_v9 = vmax.f32 %v4490_v0, 0.0 }
0x2c70   :  { %4627 = vmatpush.msrb.mxu3 %v4606_v63 }
0x2c71   :  { %v4483_v58 = vadd.f32 %v4921_v60, %v4474_v4 }
0x2c72   :  { %4628 = vmatpush.msrb.mxu3 %v4605_v1 }
0x2c73   :  { %v4487_v13 = vmax.f32 %v4483_v58, 0.0 }
0x2c74   :  { %4629 = vmatpush.msrb.mxu3 %v4604_v40 }
0x2c75   :  { %v4491_v37 = vadd.f32 %v4487_v13, %v6819_v17  ;;  %v4549_v17 = vld [vmem:[#allocation31] sm:$0xff] }
0x2c76   :  { %4630 = vmatpush.msrb.mxu3 %v4603_v33 }
0x2c77   :  { %v4495_v54 = vmax.f32 %v4491_v37, 0.0 }
0x2c79   :  { %4512 = vmatpush.msra.mxu2 %v4495_v54 }
0x2c7b   :  { %4513 = vmatpush.msra.mxu2 %v4494_v9 }
0x2c7d   :  { %4514 = vmatpush.msra.mxu2 %v4493_v16 }
0x2c7f   :  { %4515 = vmatpush.msra.mxu2 %v4492_v62 }
0x2c80   :  { %4846 = vmatmul.msk.f32.vlgmr.msra.gmra.mxu2 %vm402_vm0, %v4496_v19 }
0x2c81   :  { %4597 = vmatpush.msrb.mxu2 %v4550_v46 }
0x2c83   :  { %4598 = vmatpush.msrb.mxu2 %v4549_v17 }
0x2cb7   :  { %v4555_v31 = vpop.permute.xlu2 %4554 }
0x2cb8   :  { %4848 = vmatmul.msk.f32.vlgmr.msra.gmra.mxu0 %vm443_vm13, %v4555_v31 }
0x2cc7   :  { %v4580_v32 = vpop.permute.xlu1 %4579 }
0x2cc8   :  { %4849 = vmatmul.msk.f32.vlgmr.msrb.gmra.mxu2 %vm443_vm13, %v4580_v32  ;;  %vm4611_vm13 = vcmask 523264  }
0x2d03   :  { %v4517_v48 = vpop.f32.mrf.mxu2 }
0x2d04   :  { %4847 = vmatmul.msk.f32.vlgmr.msra.gmra.mxu3 %vm3960_vm4, %v4517_v48 }
0x2d35   :  { %v4575_v28 = vpop.f32.mrf.mxu0 }
0x2d4b   :  { %v4600_v27 = vpop.f32.mrf.mxu2 }
0x2d4c   :  { %v4601_v7 = vadd.f32 %v4600_v27, %v4575_v28 }
0x2d87   :  { %v4545_v22 = vpop.f32.mrf.mxu3 }
0x2d88   :  { %v4546_v30 = vadd.f32 %v4922_v29, %v4545_v22 }
0x2d8a   :  { %v4548_v14 = vmax.f32 %v4546_v30, 0.0 }
0x2d8c   :  { %4850 = vmatmul.msk.f32.vlgmr.msrb.gmra.mxu3 %vm4611_vm13, %v4548_v14 }
0x2e0f   :  { %v4632_v39 = vpop.f32.mrf.mxu3 }
0x2e10   :  { %v4635_v38 = vadd.f32 %v4632_v39, %v4601_v7 }
0x2e12   :  { %v4640_v5 = vadd.f32 %v4923_v23, %v4635_v38 }
0x2e14   :  { %v4641_v50 = vmax.f32 %v4640_v5, 0.0 }
0x2e16   :  { %4851 = vmatmul.msk.f32.vlgmr.msrb.gmra.mxu0 %vm402_vm0, %v4641_v50 }
0x2e93   :  { %v4670_v36 = vpop.f32.mrf.mxu0 }
0x2e94   :  { %v4671_v51 = vadd.f32 %v4924_v47, %v4670_v36 }
0x2e96   :  { %4674 = vst.msk [vmem:[%s5879_s5] sm:$0x3] %vm4673_vm3, %v4671_v51 }
0x2e97   :  { %4679 = vsyncpa [#allocation6], 1 }
0x2e98   :  { %4680 = vsyncpa [#allocation8], 1 }
0x2e99   :  { %4681 = vsyncpa [#allocation11], 1 }
0x2e9a   :  { %4682 = vsyncpa [#allocation14], 1 }
0x2e9b   :  { %4683 = vsyncpa [#allocation17], 1 }
0x2e9c   :  { %4684 = vsyncpa [#allocation20], 1 }
0x2e9d   :  { %4685 = vsyncpa [#allocation23], 1 }
0x2e9e   :  { %4686 = vsyncpa [#allocation26], 1 }
0x2e9f   :  { %4687 = vsyncpa [#allocation29], 1 }
0x2ea0   :  { %4688 = vsyncpa [#allocation32], 1 }

</bundles_post_ra>
